<compile_context>
chip_gen: v7x
topology: tpu7x:2x2x1
jax: 0.10.0
libtpu: 0.0.40
codegen_flags: <defaults>
</compile_context>

<pallas_src>
import functools

import jax
import jax.numpy as jnp
import numpy as np
from jax.experimental import pallas as pl
from jax.experimental.pallas import tpu as pltpu

EPS = 1e-5  # nn.LayerNorm default


def _layernorm(x, g, b):
    mean = jnp.mean(x, axis=-1, keepdims=True)
    xc = x - mean
    var = jnp.mean(xc * xc, axis=-1, keepdims=True)
    return xc * jax.lax.rsqrt(var + EPS) * g + b


def _gelu_tanh(x):
    return 0.5 * x * (1.0 + jnp.tanh(0.7978845608028654 * (x + 0.044715 * x * x * x)))


# ------------------------------ fused kernel ------------------------------- #
def bottleneck_kernel(x_ref, vecs_ref, wqkv_ref, wo_ref, w1_ref, w2_ref,
                      ngb_ref, o_ref, *, heads, scale, cdt):
    tb, N, D = x_ref.shape
    M = tb * N
    depth = vecs_ref.shape[0]
    inner = wo_ref.shape[1]
    dh = inner // heads
    hidden_p = w1_ref.shape[2]

    # Flatten the TB batch elements into one (M, D) f32 activation slab that
    # stays resident (vregs / VMEM) for the whole layer stack.
    x0 = x_ref[...].reshape(M, D).astype(jnp.float32)

    def layer_step(l, x):
        vecs = vecs_ref[l]                                     # (8, dmax) f32
        lg1, lb1, bo = vecs[0:1, :D], vecs[1:2, :D], vecs[2:3, :D]
        lg2, lb2 = vecs[3:4, :D], vecs[4:5, :D]
        b1, b2 = vecs[5:6, :hidden_p], vecs[6:7, :D]

        # -------------- attention: x <- x + proj(MHSA(LN(x))) --------------
        xn = _layernorm(x, lg1, lb1)
        qkv = jnp.dot(xn.astype(cdt), wqkv_ref[l],
                      preferred_element_type=jnp.float32)      # (M, 3*inner) f32

        # Scale / casts hoisted onto 128-lane-aligned groups (done once, not
        # per 32-lane head slice).  1/sqrt(dh) folded into q.
        q_all = (qkv[:, :inner] * scale).astype(cdt)
        k_all = qkv[:, inner:2 * inner].astype(cdt)
        v_all = qkv[:, 2 * inner:].astype(cdt)

        ov_rows = []
        for b in range(tb):                                    # static unroll
            r = slice(b * N, (b + 1) * N)
            ov_heads = []
            for h in range(heads):                             # static unroll
                c = slice(h * dh, (h + 1) * dh)
                q, k, v = q_all[r, c], k_all[r, c], v_all[r, c]
                s = jax.lax.dot_general(q, k, (((1,), (1,)), ((), ())),
                                        preferred_element_type=jnp.float32)
                s = s - jnp.max(s, axis=-1, keepdims=True)
                e = jnp.exp(s)
                p = e / jnp.sum(e, axis=-1, keepdims=True)     # exact softmax
                ov_heads.append(jnp.dot(p.astype(cdt), v,
                                        preferred_element_type=jnp.float32))
            ov_rows.append(jnp.concatenate(ov_heads, axis=-1)) # (N, inner)
        ov = jnp.concatenate(ov_rows, axis=0)                  # (M, inner) f32

        # Single full-contraction (K=inner) projection through wo.
        x = x + jnp.dot(ov.astype(cdt), wo_ref[l],
                        preferred_element_type=jnp.float32) + bo

        # ----------- feed-forward: x <- x + W2 GELU(W1 LN(x)+b1) + b2 -------
        yn = _layernorm(x, lg2, lb2)
        hmid = jnp.dot(yn.astype(cdt), w1_ref[l],
                       preferred_element_type=jnp.float32) + b1
        hmid = _gelu_tanh(hmid)
        x = x + jnp.dot(hmid.astype(cdt), w2_ref[l],
                        preferred_element_type=jnp.float32) + b2
        return x

    x = jax.lax.fori_loop(0, depth, layer_step, x0, unroll=True)

    # Final LayerNorm fused; output written exactly once per grid step.
    ngb = ngb_ref[...]
    out = _layernorm(x, ngb[0:1, :], ngb[1:2, :])
    o_ref[...] = out.astype(o_ref.dtype).reshape(tb, N, D)


# ------------------------------ wrapper ------------------------------------ #
def bottleneck_forward(x, params, heads, tb=None):
    B, N, D = x.shape
    inner = params["wqkv"].shape[2] // 3
    dh = inner // heads
    scale = float(dh) ** -0.5
    cdt = params["wqkv"].dtype                                 # matmul input dtype (bf16)

    # Batch tile: more rows per MXU pass + fewer grid steps.  For v7x (2 TCs)
    # prefer an even number of grid steps when B is large; at B=2 we take the
    # single fat step (latency-bound regime).
    if tb is None:
        tb = B if B <= 8 else 8
    assert B % tb == 0, "TODO(synk): pad batch to a multiple of the batch tile"

    def resident_spec(arr):
        zeros = (0,) * arr.ndim
        return pl.BlockSpec(arr.shape, lambda b, _z=zeros: _z)  # loaded once, stays resident

    weight_keys = ("vecs", "wqkv", "wo", "w1", "w2", "norm_gb")
    kern = functools.partial(bottleneck_kernel, heads=heads, scale=scale, cdt=cdt)
    return pl.pallas_call(
        kern,
        out_shape=jax.ShapeDtypeStruct((B, N, D), x.dtype),
        grid=(B // tb,),
        in_specs=[pl.BlockSpec((tb, N, D), lambda b: (b, 0, 0))]
                 + [resident_spec(params[k]) for k in weight_keys],
        out_specs=pl.BlockSpec((tb, N, D), lambda b: (b, 0, 0)),
        compiler_params=pltpu.CompilerParams(
            dimension_semantics=("parallel",),
            # Whole weight stack (~0.4 MB bf16) + activations fit trivially;
            # 32 MiB leaves ample headroom under v7x's 64 MiB physical VMEM.
            vmem_limit_bytes=32 * 1024 * 1024,
        ),
    )(x, *[params[k] for k in weight_keys])


# ------------------------------ param init --------------------------------- #
def _round_up(v, m):
    return ((v + m - 1) // m) * m


def init_params(key, dim, depth, heads, mlp_ratio, w_dtype=jnp.bfloat16):
    dh = dim // heads
    inner = dh * heads
    hidden = int(dim * mlp_ratio)
    # Lane-pad the MLP hidden dim to a multiple of 128.  Exact: padded w1
    # columns / b1 entries / w2 rows are zero -> identical function.
    hidden_p = max(_round_up(hidden, 128), 128)
    dmax = max(dim, hidden_p)

    wqkv, wo, w1, w2, vecs = [], [], [], [], []
    for _ in range(depth):
        key, k1, k2, k3, k4, k5, k6, k7 = jax.random.split(key, 8)
        wqkv.append((0.02 * jax.random.normal(k1, (dim, 3 * inner), jnp.float32)).astype(w_dtype))
        wo.append((0.02 * jax.random.normal(k2, (inner, dim), jnp.float32)).astype(w_dtype))
        w1_l = 0.02 * jax.random.normal(k3, (dim, hidden), jnp.float32)
        w1.append(jnp.pad(w1_l, ((0, 0), (0, hidden_p - hidden))).astype(w_dtype))
        w2_l = 0.02 * jax.random.normal(k4, (hidden, dim), jnp.float32)
        w2.append(jnp.pad(w2_l, ((0, hidden_p - hidden), (0, 0))).astype(w_dtype))

        # Packed per-layer vectors (one DMA stream instead of seven):
        # rows: 0=lg1 1=lb1 2=bo 3=lg2 4=lb2 5=b1 6=b2 7=pad
        v = jnp.zeros((8, dmax), jnp.float32)
        v = v.at[0, :dim].set(1.0)                                        # lg1
        v = v.at[2, :dim].set(0.02 * jax.random.normal(k5, (dim,)))       # bo
        v = v.at[3, :dim].set(1.0)                                        # lg2
        v = v.at[5, :hidden].set(0.02 * jax.random.normal(k6, (hidden,))) # b1
        v = v.at[6, :dim].set(0.02 * jax.random.normal(k7, (dim,)))       # b2
        vecs.append(v)

    norm_gb = jnp.stack([jnp.ones((dim,), jnp.float32),
                         jnp.zeros((dim,), jnp.float32)], axis=0)          # (2, dim)
    return {
        "wqkv": jnp.stack(wqkv), "wo": jnp.stack(wo),
        "w1": jnp.stack(w1), "w2": jnp.stack(w2),
        "vecs": jnp.stack(vecs), "norm_gb": norm_gb,
    }


# ------------------------------ pure-JAX reference -------------------------- #
# Mirrors the kernel's numerics (bf16 matmul inputs, f32 accumulation, scale
# folded into q, tanh GELU) so the comparison checks the Pallas implementation
# itself; the bf16 / tanh-GELU choices are deliberate perf tradeoffs vs the
# f32/erf PyTorch module.
def ref_forward(x, params, heads):
    f32 = jnp.float32
    cdt = params["wqkv"].dtype
    depth = params["wqkv"].shape[0]
    inner = params["wqkv"].shape[2] // 3
    dh = inner // heads
    hidden_p = params["w1"].shape[2]
    scale = float(dh) ** -0.5
    B, N, D = x.shape
    x = x.astype(f32)

    for l in range(depth):
        vec = params["vecs"][l]
        lg1, lb1, bo = vec[0, :D], vec[1, :D], vec[2, :D]
        lg2, lb2 = vec[3, :D], vec[4, :D]
        b1, b2 = vec[5, :hidden_p], vec[6, :D]

        xn = _layernorm(x, lg1, lb1)
        qkv = jnp.einsum("bnd,df->bnf", xn.astype(cdt), params["wqkv"][l],
                         preferred_element_type=f32)
        q, k, v = jnp.split(qkv, 3, axis=-1)
        q = (q * scale).astype(cdt).reshape(B, N, heads, dh).transpose(0, 2, 1, 3)
        k = k.astype(cdt).reshape(B, N, heads, dh).transpose(0, 2, 1, 3)
        v = v.astype(cdt).reshape(B, N, heads, dh).transpose(0, 2, 1, 3)
        dots = jnp.einsum("bhnd,bhmd->bhnm", q, k, preferred_element_type=f32)
        attn = jax.nn.softmax(dots, axis=-1)
        o = jnp.einsum("bhnm,bhmd->bhnd", attn.astype(cdt), v,
                       preferred_element_type=f32)
        o = o.transpose(0, 2, 1, 3).reshape(B, N, inner)
        x = x + jnp.einsum("bni,id->bnd", o.astype(cdt), params["wo"][l],
                           preferred_element_type=f32) + bo

        yn = _layernorm(x, lg2, lb2)
        h = jnp.einsum("bnd,dh->bnh", yn.astype(cdt), params["w1"][l],
                       preferred_element_type=f32) + b1
        h = _gelu_tanh(h)
        x = x + jnp.einsum("bnh,hd->bnd", h.astype(cdt), params["w2"][l],
                           preferred_element_type=f32) + b2

    gb = params["norm_gb"]
    return _layernorm(x, gb[0], gb[1])


if __name__ == "__main__":
    # Small but lane-friendly shapes: D = 128 (lane-dense), N = 16 (sublane
    # multiple); MLP hidden (int(128*0.4)=51) zero-padded to 128.
    B, N, D = 2, 16, 128
    heads, depth, mlp_ratio = 4, 2, 0.4

    key = jax.random.PRNGKey(0)
    kx, kp = jax.random.split(key)
    x = jax.random.normal(kx, (B, N, D), jnp.float32)
    params = init_params(kp, D, depth, heads, mlp_ratio)

    fwd = jax.jit(functools.partial(bottleneck_forward, heads=heads))
    out = jax.block_until_ready(fwd(x, params))
    ref = jax.block_until_ready(ref_forward(x, params, heads))

    # Tolerance covers bf16 rounding-boundary / accumulation-order differences
    # between the fused kernel and the independently formulated reference.
    np.testing.assert_allclose(np.asarray(out), np.asarray(ref), atol=2e-3, rtol=2e-3)
    print("KERNEL_OK")
</pallas_src>

<mosaic_0001>
module attributes {stable_mosaic.version = 11 : i64} {
  func.func @bottleneck_kernel(%arg0: i32, %arg1: memref<2x16x128xf32, #tpu.memory_space<vmem>>, %arg2: memref<2x8x128xf32, #tpu.memory_space<vmem>>, %arg3: memref<2x128x384xbf16, #tpu.memory_space<vmem>>, %arg4: memref<2x128x128xbf16, #tpu.memory_space<vmem>>, %arg5: memref<2x128x128xbf16, #tpu.memory_space<vmem>>, %arg6: memref<2x128x128xbf16, #tpu.memory_space<vmem>>, %arg7: memref<2x128xf32, #tpu.memory_space<vmem>>, %arg8: memref<2x16x128xf32, #tpu.memory_space<vmem>>) attributes {dimension_semantics = [#tpu.dimension_semantics<parallel>], iteration_bounds = array<i64: 1>, scalar_prefetch = 0 : i64, scratch_operands = 0 : i64, tpu.core_type = #tpu.core_type<tc>, window_params = [{transform_indices = @transform_0, window_bounds = array<i64: 2, 16, 128>}, {pipeline_mode = #tpu.pipeline_mode<synchronous>, transform_indices = @transform_1, window_bounds = array<i64: 2, 8, 128>}, {pipeline_mode = #tpu.pipeline_mode<synchronous>, transform_indices = @transform_2, window_bounds = array<i64: 2, 128, 384>}, {pipeline_mode = #tpu.pipeline_mode<synchronous>, transform_indices = @transform_3, window_bounds = array<i64: 2, 128, 128>}, {pipeline_mode = #tpu.pipeline_mode<synchronous>, transform_indices = @transform_4, window_bounds = array<i64: 2, 128, 128>}, {pipeline_mode = #tpu.pipeline_mode<synchronous>, transform_indices = @transform_5, window_bounds = array<i64: 2, 128, 128>}, {pipeline_mode = #tpu.pipeline_mode<synchronous>, transform_indices = @transform_6, window_bounds = array<i64: 2, 128>}, {transform_indices = @transform_7, window_bounds = array<i64: 2, 16, 128>}]} {
    %c0 = arith.constant 0 : index
    %c0_0 = arith.constant 0 : index
    %c0_1 = arith.constant 0 : index
    %0 = vector.load %arg1[%c0, %c0_0, %c0_1] : memref<2x16x128xf32, #tpu.memory_space<vmem>>, vector<2x16x128xf32>
    %1 = vector.shape_cast %0 : vector<2x16x128xf32> to vector<32x128xf32>
    %c0_i32 = arith.constant 0 : i32
    %2 = arith.index_cast %c0_i32 : i32 to index
    %c0_2 = arith.constant 0 : index
    %c0_3 = arith.constant 0 : index
    %3 = vector.load %arg2[%2, %c0_2, %c0_3] : memref<2x8x128xf32, #tpu.memory_space<vmem>>, vector<1x8x128xf32>
    %4 = vector.shape_cast %3 : vector<1x8x128xf32> to vector<8x128xf32>
    %5 = vector.extract_strided_slice %4 {offsets = [0, 0], sizes = [1, 128], strides = [1, 1]} : vector<8x128xf32> to vector<1x128xf32>
    %6 = vector.extract_strided_slice %4 {offsets = [1, 0], sizes = [1, 128], strides = [1, 1]} : vector<8x128xf32> to vector<1x128xf32>
    %7 = vector.extract_strided_slice %4 {offsets = [2, 0], sizes = [1, 128], strides = [1, 1]} : vector<8x128xf32> to vector<1x128xf32>
    %8 = vector.extract_strided_slice %4 {offsets = [3, 0], sizes = [1, 128], strides = [1, 1]} : vector<8x128xf32> to vector<1x128xf32>
    %9 = vector.extract_strided_slice %4 {offsets = [4, 0], sizes = [1, 128], strides = [1, 1]} : vector<8x128xf32> to vector<1x128xf32>
    %10 = vector.extract_strided_slice %4 {offsets = [5, 0], sizes = [1, 128], strides = [1, 1]} : vector<8x128xf32> to vector<1x128xf32>
    %11 = vector.extract_strided_slice %4 {offsets = [6, 0], sizes = [1, 128], strides = [1, 1]} : vector<8x128xf32> to vector<1x128xf32>
    %cst = arith.constant dense<0.000000e+00> : vector<32xf32>
    %12 = vector.multi_reduction <add>, %1, %cst [1] : vector<32x128xf32> to vector<32xf32>
    %13 = vector.shape_cast %12 : vector<32xf32> to vector<32x1xf32>
    %cst_4 = arith.constant 1.280000e+02 : f32
    %14 = vector.broadcast %cst_4 : f32 to vector<32x1xf32>
    %15 = arith.divf %13, %14 : vector<32x1xf32>
    %16 = vector.broadcast %15 : vector<32x1xf32> to vector<32x128xf32>
    %17 = arith.subf %1, %16 : vector<32x128xf32>
    %18 = arith.mulf %17, %17 : vector<32x128xf32>
    %cst_5 = arith.constant dense<0.000000e+00> : vector<32xf32>
    %19 = vector.multi_reduction <add>, %18, %cst_5 [1] : vector<32x128xf32> to vector<32xf32>
    %20 = vector.shape_cast %19 : vector<32xf32> to vector<32x1xf32>
    %cst_6 = arith.constant 1.280000e+02 : f32
    %21 = vector.broadcast %cst_6 : f32 to vector<32x1xf32>
    %22 = arith.divf %20, %21 : vector<32x1xf32>
    %cst_7 = arith.constant 9.99999974E-6 : f32
    %23 = vector.broadcast %cst_7 : f32 to vector<32x1xf32>
    %24 = arith.addf %22, %23 : vector<32x1xf32>
    %25 = math.rsqrt %24 : vector<32x1xf32>
    %26 = vector.broadcast %25 : vector<32x1xf32> to vector<32x128xf32>
    %27 = arith.mulf %17, %26 : vector<32x128xf32>
    %28 = vector.broadcast %5 : vector<1x128xf32> to vector<32x128xf32>
    %29 = arith.mulf %27, %28 : vector<32x128xf32>
    %30 = vector.broadcast %6 : vector<1x128xf32> to vector<32x128xf32>
    %31 = arith.addf %29, %30 : vector<32x128xf32>
    %32 = arith.truncf %31 : vector<32x128xf32> to vector<32x128xbf16>
    %33 = arith.index_cast %c0_i32 : i32 to index
    %c0_8 = arith.constant 0 : index
    %c0_9 = arith.constant 0 : index
    %34 = vector.load %arg3[%33, %c0_8, %c0_9] : memref<2x128x384xbf16, #tpu.memory_space<vmem>>, vector<1x128x384xbf16>
    %35 = vector.shape_cast %34 : vector<1x128x384xbf16> to vector<128x384xbf16>
    %cst_10 = arith.constant dense<0.000000e+00> : vector<32x384xf32>
    %36 = tpu.matmul %32, %35, %cst_10 {dimension_numbers = #tpu.dot_dimension_numbers<[1], [0], [0], [1], [0, 0, 1, 1], [], []>} : vector<32x128xbf16>, vector<128x384xbf16>, vector<32x384xf32> -> vector<32x384xf32>
    %37 = vector.extract_strided_slice %36 {offsets = [0, 0], sizes = [32, 128], strides = [1, 1]} : vector<32x384xf32> to vector<32x128xf32>
    %cst_11 = arith.constant 0.176776692 : f32
    %38 = vector.broadcast %cst_11 : f32 to vector<32x128xf32>
    %39 = arith.mulf %37, %38 : vector<32x128xf32>
    %40 = arith.truncf %39 : vector<32x128xf32> to vector<32x128xbf16>
    %41 = vector.extract_strided_slice %36 {offsets = [0, 128], sizes = [32, 128], strides = [1, 1]} : vector<32x384xf32> to vector<32x128xf32>
    %42 = arith.truncf %41 : vector<32x128xf32> to vector<32x128xbf16>
    %43 = vector.extract_strided_slice %36 {offsets = [0, 256], sizes = [32, 128], strides = [1, 1]} : vector<32x384xf32> to vector<32x128xf32>
    %44 = arith.truncf %43 : vector<32x128xf32> to vector<32x128xbf16>
    %45 = vector.extract_strided_slice %40 {offsets = [0, 0], sizes = [16, 32], strides = [1, 1]} : vector<32x128xbf16> to vector<16x32xbf16>
    %46 = vector.extract_strided_slice %42 {offsets = [0, 0], sizes = [16, 32], strides = [1, 1]} : vector<32x128xbf16> to vector<16x32xbf16>
    %47 = vector.extract_strided_slice %44 {offsets = [0, 0], sizes = [16, 32], strides = [1, 1]} : vector<32x128xbf16> to vector<16x32xbf16>
    %cst_12 = arith.constant dense<0.000000e+00> : vector<16x16xf32>
    %48 = tpu.matmul %45, %46, %cst_12 {dimension_numbers = #tpu.dot_dimension_numbers<[1], [1], [0], [0], [0, 0, 1, 0], [], []>} : vector<16x32xbf16>, vector<16x32xbf16>, vector<16x16xf32> -> vector<16x16xf32>
    %cst_13 = arith.constant dense<0xFF800000> : vector<16xf32>
    %49 = vector.multi_reduction <maximumf>, %48, %cst_13 [1] : vector<16x16xf32> to vector<16xf32>
    %50 = vector.shape_cast %49 : vector<16xf32> to vector<16x1xf32>
    %51 = vector.broadcast %50 : vector<16x1xf32> to vector<16x16xf32>
    %52 = arith.subf %48, %51 : vector<16x16xf32>
    %53 = math.exp %52 : vector<16x16xf32>
    %cst_14 = arith.constant dense<0.000000e+00> : vector<16xf32>
    %54 = vector.multi_reduction <add>, %53, %cst_14 [1] : vector<16x16xf32> to vector<16xf32>
    %55 = vector.shape_cast %54 : vector<16xf32> to vector<16x1xf32>
    %56 = vector.broadcast %55 : vector<16x1xf32> to vector<16x16xf32>
    %57 = arith.divf %53, %56 : vector<16x16xf32>
    %58 = arith.truncf %57 : vector<16x16xf32> to vector<16x16xbf16>
    %cst_15 = arith.constant dense<0.000000e+00> : vector<16x32xf32>
    %59 = tpu.matmul %58, %47, %cst_15 {dimension_numbers = #tpu.dot_dimension_numbers<[1], [0], [0], [1], [0, 0, 1, 1], [], []>} : vector<16x16xbf16>, vector<16x32xbf16>, vector<16x32xf32> -> vector<16x32xf32>
    %60 = vector.extract_strided_slice %40 {offsets = [0, 32], sizes = [16, 32], strides = [1, 1]} : vector<32x128xbf16> to vector<16x32xbf16>
    %61 = vector.extract_strided_slice %42 {offsets = [0, 32], sizes = [16, 32], strides = [1, 1]} : vector<32x128xbf16> to vector<16x32xbf16>
    %62 = vector.extract_strided_slice %44 {offsets = [0, 32], sizes = [16, 32], strides = [1, 1]} : vector<32x128xbf16> to vector<16x32xbf16>
    %cst_16 = arith.constant dense<0.000000e+00> : vector<16x16xf32>
    %63 = tpu.matmul %60, %61, %cst_16 {dimension_numbers = #tpu.dot_dimension_numbers<[1], [1], [0], [0], [0, 0, 1, 0], [], []>} : vector<16x32xbf16>, vector<16x32xbf16>, vector<16x16xf32> -> vector<16x16xf32>
    %cst_17 = arith.constant dense<0xFF800000> : vector<16xf32>
    %64 = vector.multi_reduction <maximumf>, %63, %cst_17 [1] : vector<16x16xf32> to vector<16xf32>
    %65 = vector.shape_cast %64 : vector<16xf32> to vector<16x1xf32>
    %66 = vector.broadcast %65 : vector<16x1xf32> to vector<16x16xf32>
    %67 = arith.subf %63, %66 : vector<16x16xf32>
    %68 = math.exp %67 : vector<16x16xf32>
    %cst_18 = arith.constant dense<0.000000e+00> : vector<16xf32>
    %69 = vector.multi_reduction <add>, %68, %cst_18 [1] : vector<16x16xf32> to vector<16xf32>
    %70 = vector.shape_cast %69 : vector<16xf32> to vector<16x1xf32>
    %71 = vector.broadcast %70 : vector<16x1xf32> to vector<16x16xf32>
    %72 = arith.divf %68, %71 : vector<16x16xf32>
    %73 = arith.truncf %72 : vector<16x16xf32> to vector<16x16xbf16>
    %cst_19 = arith.constant dense<0.000000e+00> : vector<16x32xf32>
    %74 = tpu.matmul %73, %62, %cst_19 {dimension_numbers = #tpu.dot_dimension_numbers<[1], [0], [0], [1], [0, 0, 1, 1], [], []>} : vector<16x16xbf16>, vector<16x32xbf16>, vector<16x32xf32> -> vector<16x32xf32>
    %75 = vector.extract_strided_slice %40 {offsets = [0, 64], sizes = [16, 32], strides = [1, 1]} : vector<32x128xbf16> to vector<16x32xbf16>
    %76 = vector.extract_strided_slice %42 {offsets = [0, 64], sizes = [16, 32], strides = [1, 1]} : vector<32x128xbf16> to vector<16x32xbf16>
    %77 = vector.extract_strided_slice %44 {offsets = [0, 64], sizes = [16, 32], strides = [1, 1]} : vector<32x128xbf16> to vector<16x32xbf16>
    %cst_20 = arith.constant dense<0.000000e+00> : vector<16x16xf32>
    %78 = tpu.matmul %75, %76, %cst_20 {dimension_numbers = #tpu.dot_dimension_numbers<[1], [1], [0], [0], [0, 0, 1, 0], [], []>} : vector<16x32xbf16>, vector<16x32xbf16>, vector<16x16xf32> -> vector<16x16xf32>
    %cst_21 = arith.constant dense<0xFF800000> : vector<16xf32>
    %79 = vector.multi_reduction <maximumf>, %78, %cst_21 [1] : vector<16x16xf32> to vector<16xf32>
    %80 = vector.shape_cast %79 : vector<16xf32> to vector<16x1xf32>
    %81 = vector.broadcast %80 : vector<16x1xf32> to vector<16x16xf32>
    %82 = arith.subf %78, %81 : vector<16x16xf32>
    %83 = math.exp %82 : vector<16x16xf32>
    %cst_22 = arith.constant dense<0.000000e+00> : vector<16xf32>
    %84 = vector.multi_reduction <add>, %83, %cst_22 [1] : vector<16x16xf32> to vector<16xf32>
    %85 = vector.shape_cast %84 : vector<16xf32> to vector<16x1xf32>
    %86 = vector.broadcast %85 : vector<16x1xf32> to vector<16x16xf32>
    %87 = arith.divf %83, %86 : vector<16x16xf32>
    %88 = arith.truncf %87 : vector<16x16xf32> to vector<16x16xbf16>
    %cst_23 = arith.constant dense<0.000000e+00> : vector<16x32xf32>
    %89 = tpu.matmul %88, %77, %cst_23 {dimension_numbers = #tpu.dot_dimension_numbers<[1], [0], [0], [1], [0, 0, 1, 1], [], []>} : vector<16x16xbf16>, vector<16x32xbf16>, vector<16x32xf32> -> vector<16x32xf32>
    %90 = vector.extract_strided_slice %40 {offsets = [0, 96], sizes = [16, 32], strides = [1, 1]} : vector<32x128xbf16> to vector<16x32xbf16>
    %91 = vector.extract_strided_slice %42 {offsets = [0, 96], sizes = [16, 32], strides = [1, 1]} : vector<32x128xbf16> to vector<16x32xbf16>
    %92 = vector.extract_strided_slice %44 {offsets = [0, 96], sizes = [16, 32], strides = [1, 1]} : vector<32x128xbf16> to vector<16x32xbf16>
    %cst_24 = arith.constant dense<0.000000e+00> : vector<16x16xf32>
    %93 = tpu.matmul %90, %91, %cst_24 {dimension_numbers = #tpu.dot_dimension_numbers<[1], [1], [0], [0], [0, 0, 1, 0], [], []>} : vector<16x32xbf16>, vector<16x32xbf16>, vector<16x16xf32> -> vector<16x16xf32>
    %cst_25 = arith.constant dense<0xFF800000> : vector<16xf32>
    %94 = vector.multi_reduction <maximumf>, %93, %cst_25 [1] : vector<16x16xf32> to vector<16xf32>
    %95 = vector.shape_cast %94 : vector<16xf32> to vector<16x1xf32>
    %96 = vector.broadcast %95 : vector<16x1xf32> to vector<16x16xf32>
    %97 = arith.subf %93, %96 : vector<16x16xf32>
    %98 = math.exp %97 : vector<16x16xf32>
    %cst_26 = arith.constant dense<0.000000e+00> : vector<16xf32>
    %99 = vector.multi_reduction <add>, %98, %cst_26 [1] : vector<16x16xf32> to vector<16xf32>
    %100 = vector.shape_cast %99 : vector<16xf32> to vector<16x1xf32>
    %101 = vector.broadcast %100 : vector<16x1xf32> to vector<16x16xf32>
    %102 = arith.divf %98, %101 : vector<16x16xf32>
    %103 = arith.truncf %102 : vector<16x16xf32> to vector<16x16xbf16>
    %cst_27 = arith.constant dense<0.000000e+00> : vector<16x32xf32>
    %104 = tpu.matmul %103, %92, %cst_27 {dimension_numbers = #tpu.dot_dimension_numbers<[1], [0], [0], [1], [0, 0, 1, 1], [], []>} : vector<16x16xbf16>, vector<16x32xbf16>, vector<16x32xf32> -> vector<16x32xf32>
    %105 = tpu.concatenate %59, %74, %89, %104 in 1 : vector<16x32xf32>, vector<16x32xf32>, vector<16x32xf32>, vector<16x32xf32> -> vector<16x128xf32>
    %106 = vector.extract_strided_slice %40 {offsets = [16, 0], sizes = [16, 32], strides = [1, 1]} : vector<32x128xbf16> to vector<16x32xbf16>
    %107 = vector.extract_strided_slice %42 {offsets = [16, 0], sizes = [16, 32], strides = [1, 1]} : vector<32x128xbf16> to vector<16x32xbf16>
    %108 = vector.extract_strided_slice %44 {offsets = [16, 0], sizes = [16, 32], strides = [1, 1]} : vector<32x128xbf16> to vector<16x32xbf16>
    %cst_28 = arith.constant dense<0.000000e+00> : vector<16x16xf32>
    %109 = tpu.matmul %106, %107, %cst_28 {dimension_numbers = #tpu.dot_dimension_numbers<[1], [1], [0], [0], [0, 0, 1, 0], [], []>} : vector<16x32xbf16>, vector<16x32xbf16>, vector<16x16xf32> -> vector<16x16xf32>
    %cst_29 = arith.constant dense<0xFF800000> : vector<16xf32>
    %110 = vector.multi_reduction <maximumf>, %109, %cst_29 [1] : vector<16x16xf32> to vector<16xf32>
    %111 = vector.shape_cast %110 : vector<16xf32> to vector<16x1xf32>
    %112 = vector.broadcast %111 : vector<16x1xf32> to vector<16x16xf32>
    %113 = arith.subf %109, %112 : vector<16x16xf32>
    %114 = math.exp %113 : vector<16x16xf32>
    %cst_30 = arith.constant dense<0.000000e+00> : vector<16xf32>
    %115 = vector.multi_reduction <add>, %114, %cst_30 [1] : vector<16x16xf32> to vector<16xf32>
    %116 = vector.shape_cast %115 : vector<16xf32> to vector<16x1xf32>
    %117 = vector.broadcast %116 : vector<16x1xf32> to vector<16x16xf32>
    %118 = arith.divf %114, %117 : vector<16x16xf32>
    %119 = arith.truncf %118 : vector<16x16xf32> to vector<16x16xbf16>
    %cst_31 = arith.constant dense<0.000000e+00> : vector<16x32xf32>
    %120 = tpu.matmul %119, %108, %cst_31 {dimension_numbers = #tpu.dot_dimension_numbers<[1], [0], [0], [1], [0, 0, 1, 1], [], []>} : vector<16x16xbf16>, vector<16x32xbf16>, vector<16x32xf32> -> vector<16x32xf32>
    %121 = vector.extract_strided_slice %40 {offsets = [16, 32], sizes = [16, 32], strides = [1, 1]} : vector<32x128xbf16> to vector<16x32xbf16>
    %122 = vector.extract_strided_slice %42 {offsets = [16, 32], sizes = [16, 32], strides = [1, 1]} : vector<32x128xbf16> to vector<16x32xbf16>
    %123 = vector.extract_strided_slice %44 {offsets = [16, 32], sizes = [16, 32], strides = [1, 1]} : vector<32x128xbf16> to vector<16x32xbf16>
    %cst_32 = arith.constant dense<0.000000e+00> : vector<16x16xf32>
    %124 = tpu.matmul %121, %122, %cst_32 {dimension_numbers = #tpu.dot_dimension_numbers<[1], [1], [0], [0], [0, 0, 1, 0], [], []>} : vector<16x32xbf16>, vector<16x32xbf16>, vector<16x16xf32> -> vector<16x16xf32>
    %cst_33 = arith.constant dense<0xFF800000> : vector<16xf32>
    %125 = vector.multi_reduction <maximumf>, %124, %cst_33 [1] : vector<16x16xf32> to vector<16xf32>
    %126 = vector.shape_cast %125 : vector<16xf32> to vector<16x1xf32>
    %127 = vector.broadcast %126 : vector<16x1xf32> to vector<16x16xf32>
    %128 = arith.subf %124, %127 : vector<16x16xf32>
    %129 = math.exp %128 : vector<16x16xf32>
    %cst_34 = arith.constant dense<0.000000e+00> : vector<16xf32>
    %130 = vector.multi_reduction <add>, %129, %cst_34 [1] : vector<16x16xf32> to vector<16xf32>
    %131 = vector.shape_cast %130 : vector<16xf32> to vector<16x1xf32>
    %132 = vector.broadcast %131 : vector<16x1xf32> to vector<16x16xf32>
    %133 = arith.divf %129, %132 : vector<16x16xf32>
    %134 = arith.truncf %133 : vector<16x16xf32> to vector<16x16xbf16>
    %cst_35 = arith.constant dense<0.000000e+00> : vector<16x32xf32>
    %135 = tpu.matmul %134, %123, %cst_35 {dimension_numbers = #tpu.dot_dimension_numbers<[1], [0], [0], [1], [0, 0, 1, 1], [], []>} : vector<16x16xbf16>, vector<16x32xbf16>, vector<16x32xf32> -> vector<16x32xf32>
    %136 = vector.extract_strided_slice %40 {offsets = [16, 64], sizes = [16, 32], strides = [1, 1]} : vector<32x128xbf16> to vector<16x32xbf16>
    %137 = vector.extract_strided_slice %42 {offsets = [16, 64], sizes = [16, 32], strides = [1, 1]} : vector<32x128xbf16> to vector<16x32xbf16>
    %138 = vector.extract_strided_slice %44 {offsets = [16, 64], sizes = [16, 32], strides = [1, 1]} : vector<32x128xbf16> to vector<16x32xbf16>
    %cst_36 = arith.constant dense<0.000000e+00> : vector<16x16xf32>
    %139 = tpu.matmul %136, %137, %cst_36 {dimension_numbers = #tpu.dot_dimension_numbers<[1], [1], [0], [0], [0, 0, 1, 0], [], []>} : vector<16x32xbf16>, vector<16x32xbf16>, vector<16x16xf32> -> vector<16x16xf32>
    %cst_37 = arith.constant dense<0xFF800000> : vector<16xf32>
    %140 = vector.multi_reduction <maximumf>, %139, %cst_37 [1] : vector<16x16xf32> to vector<16xf32>
    %141 = vector.shape_cast %140 : vector<16xf32> to vector<16x1xf32>
    %142 = vector.broadcast %141 : vector<16x1xf32> to vector<16x16xf32>
    %143 = arith.subf %139, %142 : vector<16x16xf32>
    %144 = math.exp %143 : vector<16x16xf32>
    %cst_38 = arith.constant dense<0.000000e+00> : vector<16xf32>
    %145 = vector.multi_reduction <add>, %144, %cst_38 [1] : vector<16x16xf32> to vector<16xf32>
    %146 = vector.shape_cast %145 : vector<16xf32> to vector<16x1xf32>
    %147 = vector.broadcast %146 : vector<16x1xf32> to vector<16x16xf32>
    %148 = arith.divf %144, %147 : vector<16x16xf32>
    %149 = arith.truncf %148 : vector<16x16xf32> to vector<16x16xbf16>
    %cst_39 = arith.constant dense<0.000000e+00> : vector<16x32xf32>
    %150 = tpu.matmul %149, %138, %cst_39 {dimension_numbers = #tpu.dot_dimension_numbers<[1], [0], [0], [1], [0, 0, 1, 1], [], []>} : vector<16x16xbf16>, vector<16x32xbf16>, vector<16x32xf32> -> vector<16x32xf32>
    %151 = vector.extract_strided_slice %40 {offsets = [16, 96], sizes = [16, 32], strides = [1, 1]} : vector<32x128xbf16> to vector<16x32xbf16>
    %152 = vector.extract_strided_slice %42 {offsets = [16, 96], sizes = [16, 32], strides = [1, 1]} : vector<32x128xbf16> to vector<16x32xbf16>
    %153 = vector.extract_strided_slice %44 {offsets = [16, 96], sizes = [16, 32], strides = [1, 1]} : vector<32x128xbf16> to vector<16x32xbf16>
    %cst_40 = arith.constant dense<0.000000e+00> : vector<16x16xf32>
    %154 = tpu.matmul %151, %152, %cst_40 {dimension_numbers = #tpu.dot_dimension_numbers<[1], [1], [0], [0], [0, 0, 1, 0], [], []>} : vector<16x32xbf16>, vector<16x32xbf16>, vector<16x16xf32> -> vector<16x16xf32>
    %cst_41 = arith.constant dense<0xFF800000> : vector<16xf32>
    %155 = vector.multi_reduction <maximumf>, %154, %cst_41 [1] : vector<16x16xf32> to vector<16xf32>
    %156 = vector.shape_cast %155 : vector<16xf32> to vector<16x1xf32>
    %157 = vector.broadcast %156 : vector<16x1xf32> to vector<16x16xf32>
    %158 = arith.subf %154, %157 : vector<16x16xf32>
    %159 = math.exp %158 : vector<16x16xf32>
    %cst_42 = arith.constant dense<0.000000e+00> : vector<16xf32>
    %160 = vector.multi_reduction <add>, %159, %cst_42 [1] : vector<16x16xf32> to vector<16xf32>
    %161 = vector.shape_cast %160 : vector<16xf32> to vector<16x1xf32>
    %162 = vector.broadcast %161 : vector<16x1xf32> to vector<16x16xf32>
    %163 = arith.divf %159, %162 : vector<16x16xf32>
    %164 = arith.truncf %163 : vector<16x16xf32> to vector<16x16xbf16>
    %cst_43 = arith.constant dense<0.000000e+00> : vector<16x32xf32>
    %165 = tpu.matmul %164, %153, %cst_43 {dimension_numbers = #tpu.dot_dimension_numbers<[1], [0], [0], [1], [0, 0, 1, 1], [], []>} : vector<16x16xbf16>, vector<16x32xbf16>, vector<16x32xf32> -> vector<16x32xf32>
    %166 = tpu.concatenate %120, %135, %150, %165 in 1 : vector<16x32xf32>, vector<16x32xf32>, vector<16x32xf32>, vector<16x32xf32> -> vector<16x128xf32>
    %167 = tpu.concatenate %105, %166 in 0 : vector<16x128xf32>, vector<16x128xf32> -> vector<32x128xf32>
    %168 = arith.truncf %167 : vector<32x128xf32> to vector<32x128xbf16>
    %169 = arith.index_cast %c0_i32 : i32 to index
    %c0_44 = arith.constant 0 : index
    %c0_45 = arith.constant 0 : index
    %170 = vector.load %arg4[%169, %c0_44, %c0_45] : memref<2x128x128xbf16, #tpu.memory_space<vmem>>, vector<1x128x128xbf16>
    %171 = vector.shape_cast %170 : vector<1x128x128xbf16> to vector<128x128xbf16>
    %cst_46 = arith.constant dense<0.000000e+00> : vector<32x128xf32>
    %172 = tpu.matmul %168, %171, %cst_46 {dimension_numbers = #tpu.dot_dimension_numbers<[1], [0], [0], [1], [0, 0, 1, 1], [], []>} : vector<32x128xbf16>, vector<128x128xbf16>, vector<32x128xf32> -> vector<32x128xf32>
    %173 = arith.addf %1, %172 : vector<32x128xf32>
    %174 = vector.broadcast %7 : vector<1x128xf32> to vector<32x128xf32>
    %175 = arith.addf %173, %174 : vector<32x128xf32>
    %cst_47 = arith.constant dense<0.000000e+00> : vector<32xf32>
    %176 = vector.multi_reduction <add>, %175, %cst_47 [1] : vector<32x128xf32> to vector<32xf32>
    %177 = vector.shape_cast %176 : vector<32xf32> to vector<32x1xf32>
    %cst_48 = arith.constant 1.280000e+02 : f32
    %178 = vector.broadcast %cst_48 : f32 to vector<32x1xf32>
    %179 = arith.divf %177, %178 : vector<32x1xf32>
    %180 = vector.broadcast %179 : vector<32x1xf32> to vector<32x128xf32>
    %181 = arith.subf %175, %180 : vector<32x128xf32>
    %182 = arith.mulf %181, %181 : vector<32x128xf32>
    %cst_49 = arith.constant dense<0.000000e+00> : vector<32xf32>
    %183 = vector.multi_reduction <add>, %182, %cst_49 [1] : vector<32x128xf32> to vector<32xf32>
    %184 = vector.shape_cast %183 : vector<32xf32> to vector<32x1xf32>
    %cst_50 = arith.constant 1.280000e+02 : f32
    %185 = vector.broadcast %cst_50 : f32 to vector<32x1xf32>
    %186 = arith.divf %184, %185 : vector<32x1xf32>
    %cst_51 = arith.constant 9.99999974E-6 : f32
    %187 = vector.broadcast %cst_51 : f32 to vector<32x1xf32>
    %188 = arith.addf %186, %187 : vector<32x1xf32>
    %189 = math.rsqrt %188 : vector<32x1xf32>
    %190 = vector.broadcast %189 : vector<32x1xf32> to vector<32x128xf32>
    %191 = arith.mulf %181, %190 : vector<32x128xf32>
    %192 = vector.broadcast %8 : vector<1x128xf32> to vector<32x128xf32>
    %193 = arith.mulf %191, %192 : vector<32x128xf32>
    %194 = vector.broadcast %9 : vector<1x128xf32> to vector<32x128xf32>
    %195 = arith.addf %193, %194 : vector<32x128xf32>
    %196 = arith.truncf %195 : vector<32x128xf32> to vector<32x128xbf16>
    %197 = arith.index_cast %c0_i32 : i32 to index
    %c0_52 = arith.constant 0 : index
    %c0_53 = arith.constant 0 : index
    %198 = vector.load %arg5[%197, %c0_52, %c0_53] : memref<2x128x128xbf16, #tpu.memory_space<vmem>>, vector<1x128x128xbf16>
    %199 = vector.shape_cast %198 : vector<1x128x128xbf16> to vector<128x128xbf16>
    %cst_54 = arith.constant dense<0.000000e+00> : vector<32x128xf32>
    %200 = tpu.matmul %196, %199, %cst_54 {dimension_numbers = #tpu.dot_dimension_numbers<[1], [0], [0], [1], [0, 0, 1, 1], [], []>} : vector<32x128xbf16>, vector<128x128xbf16>, vector<32x128xf32> -> vector<32x128xf32>
    %201 = vector.broadcast %10 : vector<1x128xf32> to vector<32x128xf32>
    %202 = arith.addf %200, %201 : vector<32x128xf32>
    %cst_55 = arith.constant 5.000000e-01 : f32
    %203 = vector.broadcast %cst_55 : f32 to vector<32x128xf32>
    %204 = arith.mulf %203, %202 : vector<32x128xf32>
    %cst_56 = arith.constant 4.471500e-02 : f32
    %205 = vector.broadcast %cst_56 : f32 to vector<32x128xf32>
    %206 = arith.mulf %205, %202 : vector<32x128xf32>
    %207 = arith.mulf %206, %202 : vector<32x128xf32>
    %208 = arith.mulf %207, %202 : vector<32x128xf32>
    %209 = arith.addf %202, %208 : vector<32x128xf32>
    %cst_57 = arith.constant 0.797884583 : f32
    %210 = vector.broadcast %cst_57 : f32 to vector<32x128xf32>
    %211 = arith.mulf %210, %209 : vector<32x128xf32>
    %212 = math.tanh %211 : vector<32x128xf32>
    %cst_58 = arith.constant 1.000000e+00 : f32
    %213 = vector.broadcast %cst_58 : f32 to vector<32x128xf32>
    %214 = arith.addf %213, %212 : vector<32x128xf32>
    %215 = arith.mulf %204, %214 : vector<32x128xf32>
    %216 = arith.truncf %215 : vector<32x128xf32> to vector<32x128xbf16>
    %217 = arith.index_cast %c0_i32 : i32 to index
    %c0_59 = arith.constant 0 : index
    %c0_60 = arith.constant 0 : index
    %218 = vector.load %arg6[%217, %c0_59, %c0_60] : memref<2x128x128xbf16, #tpu.memory_space<vmem>>, vector<1x128x128xbf16>
    %219 = vector.shape_cast %218 : vector<1x128x128xbf16> to vector<128x128xbf16>
    %cst_61 = arith.constant dense<0.000000e+00> : vector<32x128xf32>
    %220 = tpu.matmul %216, %219, %cst_61 {dimension_numbers = #tpu.dot_dimension_numbers<[1], [0], [0], [1], [0, 0, 1, 1], [], []>} : vector<32x128xbf16>, vector<128x128xbf16>, vector<32x128xf32> -> vector<32x128xf32>
    %221 = arith.addf %175, %220 : vector<32x128xf32>
    %222 = vector.broadcast %11 : vector<1x128xf32> to vector<32x128xf32>
    %223 = arith.addf %221, %222 : vector<32x128xf32>
    %c1_i32 = arith.constant 1 : i32
    %224 = arith.index_cast %c1_i32 : i32 to index
    %c0_62 = arith.constant 0 : index
    %c0_63 = arith.constant 0 : index
    %225 = vector.load %arg2[%224, %c0_62, %c0_63] : memref<2x8x128xf32, #tpu.memory_space<vmem>>, vector<1x8x128xf32>
    %226 = vector.shape_cast %225 : vector<1x8x128xf32> to vector<8x128xf32>
    %227 = vector.extract_strided_slice %226 {offsets = [0, 0], sizes = [1, 128], strides = [1, 1]} : vector<8x128xf32> to vector<1x128xf32>
    %228 = vector.extract_strided_slice %226 {offsets = [1, 0], sizes = [1, 128], strides = [1, 1]} : vector<8x128xf32> to vector<1x128xf32>
    %229 = vector.extract_strided_slice %226 {offsets = [2, 0], sizes = [1, 128], strides = [1, 1]} : vector<8x128xf32> to vector<1x128xf32>
    %230 = vector.extract_strided_slice %226 {offsets = [3, 0], sizes = [1, 128], strides = [1, 1]} : vector<8x128xf32> to vector<1x128xf32>
    %231 = vector.extract_strided_slice %226 {offsets = [4, 0], sizes = [1, 128], strides = [1, 1]} : vector<8x128xf32> to vector<1x128xf32>
    %232 = vector.extract_strided_slice %226 {offsets = [5, 0], sizes = [1, 128], strides = [1, 1]} : vector<8x128xf32> to vector<1x128xf32>
    %233 = vector.extract_strided_slice %226 {offsets = [6, 0], sizes = [1, 128], strides = [1, 1]} : vector<8x128xf32> to vector<1x128xf32>
    %cst_64 = arith.constant dense<0.000000e+00> : vector<32xf32>
    %234 = vector.multi_reduction <add>, %223, %cst_64 [1] : vector<32x128xf32> to vector<32xf32>
    %235 = vector.shape_cast %234 : vector<32xf32> to vector<32x1xf32>
    %cst_65 = arith.constant 1.280000e+02 : f32
    %236 = vector.broadcast %cst_65 : f32 to vector<32x1xf32>
    %237 = arith.divf %235, %236 : vector<32x1xf32>
    %238 = vector.broadcast %237 : vector<32x1xf32> to vector<32x128xf32>
    %239 = arith.subf %223, %238 : vector<32x128xf32>
    %240 = arith.mulf %239, %239 : vector<32x128xf32>
    %cst_66 = arith.constant dense<0.000000e+00> : vector<32xf32>
    %241 = vector.multi_reduction <add>, %240, %cst_66 [1] : vector<32x128xf32> to vector<32xf32>
    %242 = vector.shape_cast %241 : vector<32xf32> to vector<32x1xf32>
    %cst_67 = arith.constant 1.280000e+02 : f32
    %243 = vector.broadcast %cst_67 : f32 to vector<32x1xf32>
    %244 = arith.divf %242, %243 : vector<32x1xf32>
    %cst_68 = arith.constant 9.99999974E-6 : f32
    %245 = vector.broadcast %cst_68 : f32 to vector<32x1xf32>
    %246 = arith.addf %244, %245 : vector<32x1xf32>
    %247 = math.rsqrt %246 : vector<32x1xf32>
    %248 = vector.broadcast %247 : vector<32x1xf32> to vector<32x128xf32>
    %249 = arith.mulf %239, %248 : vector<32x128xf32>
    %250 = vector.broadcast %227 : vector<1x128xf32> to vector<32x128xf32>
    %251 = arith.mulf %249, %250 : vector<32x128xf32>
    %252 = vector.broadcast %228 : vector<1x128xf32> to vector<32x128xf32>
    %253 = arith.addf %251, %252 : vector<32x128xf32>
    %254 = arith.truncf %253 : vector<32x128xf32> to vector<32x128xbf16>
    %255 = arith.index_cast %c1_i32 : i32 to index
    %c0_69 = arith.constant 0 : index
    %c0_70 = arith.constant 0 : index
    %256 = vector.load %arg3[%255, %c0_69, %c0_70] : memref<2x128x384xbf16, #tpu.memory_space<vmem>>, vector<1x128x384xbf16>
    %257 = vector.shape_cast %256 : vector<1x128x384xbf16> to vector<128x384xbf16>
    %cst_71 = arith.constant dense<0.000000e+00> : vector<32x384xf32>
    %258 = tpu.matmul %254, %257, %cst_71 {dimension_numbers = #tpu.dot_dimension_numbers<[1], [0], [0], [1], [0, 0, 1, 1], [], []>} : vector<32x128xbf16>, vector<128x384xbf16>, vector<32x384xf32> -> vector<32x384xf32>
    %259 = vector.extract_strided_slice %258 {offsets = [0, 0], sizes = [32, 128], strides = [1, 1]} : vector<32x384xf32> to vector<32x128xf32>
    %cst_72 = arith.constant 0.176776692 : f32
    %260 = vector.broadcast %cst_72 : f32 to vector<32x128xf32>
    %261 = arith.mulf %259, %260 : vector<32x128xf32>
    %262 = arith.truncf %261 : vector<32x128xf32> to vector<32x128xbf16>
    %263 = vector.extract_strided_slice %258 {offsets = [0, 128], sizes = [32, 128], strides = [1, 1]} : vector<32x384xf32> to vector<32x128xf32>
    %264 = arith.truncf %263 : vector<32x128xf32> to vector<32x128xbf16>
    %265 = vector.extract_strided_slice %258 {offsets = [0, 256], sizes = [32, 128], strides = [1, 1]} : vector<32x384xf32> to vector<32x128xf32>
    %266 = arith.truncf %265 : vector<32x128xf32> to vector<32x128xbf16>
    %267 = vector.extract_strided_slice %262 {offsets = [0, 0], sizes = [16, 32], strides = [1, 1]} : vector<32x128xbf16> to vector<16x32xbf16>
    %268 = vector.extract_strided_slice %264 {offsets = [0, 0], sizes = [16, 32], strides = [1, 1]} : vector<32x128xbf16> to vector<16x32xbf16>
    %269 = vector.extract_strided_slice %266 {offsets = [0, 0], sizes = [16, 32], strides = [1, 1]} : vector<32x128xbf16> to vector<16x32xbf16>
    %cst_73 = arith.constant dense<0.000000e+00> : vector<16x16xf32>
    %270 = tpu.matmul %267, %268, %cst_73 {dimension_numbers = #tpu.dot_dimension_numbers<[1], [1], [0], [0], [0, 0, 1, 0], [], []>} : vector<16x32xbf16>, vector<16x32xbf16>, vector<16x16xf32> -> vector<16x16xf32>
    %cst_74 = arith.constant dense<0xFF800000> : vector<16xf32>
    %271 = vector.multi_reduction <maximumf>, %270, %cst_74 [1] : vector<16x16xf32> to vector<16xf32>
    %272 = vector.shape_cast %271 : vector<16xf32> to vector<16x1xf32>
    %273 = vector.broadcast %272 : vector<16x1xf32> to vector<16x16xf32>
    %274 = arith.subf %270, %273 : vector<16x16xf32>
    %275 = math.exp %274 : vector<16x16xf32>
    %cst_75 = arith.constant dense<0.000000e+00> : vector<16xf32>
    %276 = vector.multi_reduction <add>, %275, %cst_75 [1] : vector<16x16xf32> to vector<16xf32>
    %277 = vector.shape_cast %276 : vector<16xf32> to vector<16x1xf32>
    %278 = vector.broadcast %277 : vector<16x1xf32> to vector<16x16xf32>
    %279 = arith.divf %275, %278 : vector<16x16xf32>
    %280 = arith.truncf %279 : vector<16x16xf32> to vector<16x16xbf16>
    %cst_76 = arith.constant dense<0.000000e+00> : vector<16x32xf32>
    %281 = tpu.matmul %280, %269, %cst_76 {dimension_numbers = #tpu.dot_dimension_numbers<[1], [0], [0], [1], [0, 0, 1, 1], [], []>} : vector<16x16xbf16>, vector<16x32xbf16>, vector<16x32xf32> -> vector<16x32xf32>
    %282 = vector.extract_strided_slice %262 {offsets = [0, 32], sizes = [16, 32], strides = [1, 1]} : vector<32x128xbf16> to vector<16x32xbf16>
    %283 = vector.extract_strided_slice %264 {offsets = [0, 32], sizes = [16, 32], strides = [1, 1]} : vector<32x128xbf16> to vector<16x32xbf16>
    %284 = vector.extract_strided_slice %266 {offsets = [0, 32], sizes = [16, 32], strides = [1, 1]} : vector<32x128xbf16> to vector<16x32xbf16>
    %cst_77 = arith.constant dense<0.000000e+00> : vector<16x16xf32>
    %285 = tpu.matmul %282, %283, %cst_77 {dimension_numbers = #tpu.dot_dimension_numbers<[1], [1], [0], [0], [0, 0, 1, 0], [], []>} : vector<16x32xbf16>, vector<16x32xbf16>, vector<16x16xf32> -> vector<16x16xf32>
    %cst_78 = arith.constant dense<0xFF800000> : vector<16xf32>
    %286 = vector.multi_reduction <maximumf>, %285, %cst_78 [1] : vector<16x16xf32> to vector<16xf32>
    %287 = vector.shape_cast %286 : vector<16xf32> to vector<16x1xf32>
    %288 = vector.broadcast %287 : vector<16x1xf32> to vector<16x16xf32>
    %289 = arith.subf %285, %288 : vector<16x16xf32>
    %290 = math.exp %289 : vector<16x16xf32>
    %cst_79 = arith.constant dense<0.000000e+00> : vector<16xf32>
    %291 = vector.multi_reduction <add>, %290, %cst_79 [1] : vector<16x16xf32> to vector<16xf32>
    %292 = vector.shape_cast %291 : vector<16xf32> to vector<16x1xf32>
    %293 = vector.broadcast %292 : vector<16x1xf32> to vector<16x16xf32>
    %294 = arith.divf %290, %293 : vector<16x16xf32>
    %295 = arith.truncf %294 : vector<16x16xf32> to vector<16x16xbf16>
    %cst_80 = arith.constant dense<0.000000e+00> : vector<16x32xf32>
    %296 = tpu.matmul %295, %284, %cst_80 {dimension_numbers = #tpu.dot_dimension_numbers<[1], [0], [0], [1], [0, 0, 1, 1], [], []>} : vector<16x16xbf16>, vector<16x32xbf16>, vector<16x32xf32> -> vector<16x32xf32>
    %297 = vector.extract_strided_slice %262 {offsets = [0, 64], sizes = [16, 32], strides = [1, 1]} : vector<32x128xbf16> to vector<16x32xbf16>
    %298 = vector.extract_strided_slice %264 {offsets = [0, 64], sizes = [16, 32], strides = [1, 1]} : vector<32x128xbf16> to vector<16x32xbf16>
    %299 = vector.extract_strided_slice %266 {offsets = [0, 64], sizes = [16, 32], strides = [1, 1]} : vector<32x128xbf16> to vector<16x32xbf16>
    %cst_81 = arith.constant dense<0.000000e+00> : vector<16x16xf32>
    %300 = tpu.matmul %297, %298, %cst_81 {dimension_numbers = #tpu.dot_dimension_numbers<[1], [1], [0], [0], [0, 0, 1, 0], [], []>} : vector<16x32xbf16>, vector<16x32xbf16>, vector<16x16xf32> -> vector<16x16xf32>
    %cst_82 = arith.constant dense<0xFF800000> : vector<16xf32>
    %301 = vector.multi_reduction <maximumf>, %300, %cst_82 [1] : vector<16x16xf32> to vector<16xf32>
    %302 = vector.shape_cast %301 : vector<16xf32> to vector<16x1xf32>
    %303 = vector.broadcast %302 : vector<16x1xf32> to vector<16x16xf32>
    %304 = arith.subf %300, %303 : vector<16x16xf32>
    %305 = math.exp %304 : vector<16x16xf32>
    %cst_83 = arith.constant dense<0.000000e+00> : vector<16xf32>
    %306 = vector.multi_reduction <add>, %305, %cst_83 [1] : vector<16x16xf32> to vector<16xf32>
    %307 = vector.shape_cast %306 : vector<16xf32> to vector<16x1xf32>
    %308 = vector.broadcast %307 : vector<16x1xf32> to vector<16x16xf32>
    %309 = arith.divf %305, %308 : vector<16x16xf32>
    %310 = arith.truncf %309 : vector<16x16xf32> to vector<16x16xbf16>
    %cst_84 = arith.constant dense<0.000000e+00> : vector<16x32xf32>
    %311 = tpu.matmul %310, %299, %cst_84 {dimension_numbers = #tpu.dot_dimension_numbers<[1], [0], [0], [1], [0, 0, 1, 1], [], []>} : vector<16x16xbf16>, vector<16x32xbf16>, vector<16x32xf32> -> vector<16x32xf32>
    %312 = vector.extract_strided_slice %262 {offsets = [0, 96], sizes = [16, 32], strides = [1, 1]} : vector<32x128xbf16> to vector<16x32xbf16>
    %313 = vector.extract_strided_slice %264 {offsets = [0, 96], sizes = [16, 32], strides = [1, 1]} : vector<32x128xbf16> to vector<16x32xbf16>
    %314 = vector.extract_strided_slice %266 {offsets = [0, 96], sizes = [16, 32], strides = [1, 1]} : vector<32x128xbf16> to vector<16x32xbf16>
    %cst_85 = arith.constant dense<0.000000e+00> : vector<16x16xf32>
    %315 = tpu.matmul %312, %313, %cst_85 {dimension_numbers = #tpu.dot_dimension_numbers<[1], [1], [0], [0], [0, 0, 1, 0], [], []>} : vector<16x32xbf16>, vector<16x32xbf16>, vector<16x16xf32> -> vector<16x16xf32>
    %cst_86 = arith.constant dense<0xFF800000> : vector<16xf32>
    %316 = vector.multi_reduction <maximumf>, %315, %cst_86 [1] : vector<16x16xf32> to vector<16xf32>
    %317 = vector.shape_cast %316 : vector<16xf32> to vector<16x1xf32>
    %318 = vector.broadcast %317 : vector<16x1xf32> to vector<16x16xf32>
    %319 = arith.subf %315, %318 : vector<16x16xf32>
    %320 = math.exp %319 : vector<16x16xf32>
    %cst_87 = arith.constant dense<0.000000e+00> : vector<16xf32>
    %321 = vector.multi_reduction <add>, %320, %cst_87 [1] : vector<16x16xf32> to vector<16xf32>
    %322 = vector.shape_cast %321 : vector<16xf32> to vector<16x1xf32>
    %323 = vector.broadcast %322 : vector<16x1xf32> to vector<16x16xf32>
    %324 = arith.divf %320, %323 : vector<16x16xf32>
    %325 = arith.truncf %324 : vector<16x16xf32> to vector<16x16xbf16>
    %cst_88 = arith.constant dense<0.000000e+00> : vector<16x32xf32>
    %326 = tpu.matmul %325, %314, %cst_88 {dimension_numbers = #tpu.dot_dimension_numbers<[1], [0], [0], [1], [0, 0, 1, 1], [], []>} : vector<16x16xbf16>, vector<16x32xbf16>, vector<16x32xf32> -> vector<16x32xf32>
    %327 = tpu.concatenate %281, %296, %311, %326 in 1 : vector<16x32xf32>, vector<16x32xf32>, vector<16x32xf32>, vector<16x32xf32> -> vector<16x128xf32>
    %328 = vector.extract_strided_slice %262 {offsets = [16, 0], sizes = [16, 32], strides = [1, 1]} : vector<32x128xbf16> to vector<16x32xbf16>
    %329 = vector.extract_strided_slice %264 {offsets = [16, 0], sizes = [16, 32], strides = [1, 1]} : vector<32x128xbf16> to vector<16x32xbf16>
    %330 = vector.extract_strided_slice %266 {offsets = [16, 0], sizes = [16, 32], strides = [1, 1]} : vector<32x128xbf16> to vector<16x32xbf16>
    %cst_89 = arith.constant dense<0.000000e+00> : vector<16x16xf32>
    %331 = tpu.matmul %328, %329, %cst_89 {dimension_numbers = #tpu.dot_dimension_numbers<[1], [1], [0], [0], [0, 0, 1, 0], [], []>} : vector<16x32xbf16>, vector<16x32xbf16>, vector<16x16xf32> -> vector<16x16xf32>
    %cst_90 = arith.constant dense<0xFF800000> : vector<16xf32>
    %332 = vector.multi_reduction <maximumf>, %331, %cst_90 [1] : vector<16x16xf32> to vector<16xf32>
    %333 = vector.shape_cast %332 : vector<16xf32> to vector<16x1xf32>
    %334 = vector.broadcast %333 : vector<16x1xf32> to vector<16x16xf32>
    %335 = arith.subf %331, %334 : vector<16x16xf32>
    %336 = math.exp %335 : vector<16x16xf32>
    %cst_91 = arith.constant dense<0.000000e+00> : vector<16xf32>
    %337 = vector.multi_reduction <add>, %336, %cst_91 [1] : vector<16x16xf32> to vector<16xf32>
    %338 = vector.shape_cast %337 : vector<16xf32> to vector<16x1xf32>
    %339 = vector.broadcast %338 : vector<16x1xf32> to vector<16x16xf32>
    %340 = arith.divf %336, %339 : vector<16x16xf32>
    %341 = arith.truncf %340 : vector<16x16xf32> to vector<16x16xbf16>
    %cst_92 = arith.constant dense<0.000000e+00> : vector<16x32xf32>
    %342 = tpu.matmul %341, %330, %cst_92 {dimension_numbers = #tpu.dot_dimension_numbers<[1], [0], [0], [1], [0, 0, 1, 1], [], []>} : vector<16x16xbf16>, vector<16x32xbf16>, vector<16x32xf32> -> vector<16x32xf32>
    %343 = vector.extract_strided_slice %262 {offsets = [16, 32], sizes = [16, 32], strides = [1, 1]} : vector<32x128xbf16> to vector<16x32xbf16>
    %344 = vector.extract_strided_slice %264 {offsets = [16, 32], sizes = [16, 32], strides = [1, 1]} : vector<32x128xbf16> to vector<16x32xbf16>
    %345 = vector.extract_strided_slice %266 {offsets = [16, 32], sizes = [16, 32], strides = [1, 1]} : vector<32x128xbf16> to vector<16x32xbf16>
    %cst_93 = arith.constant dense<0.000000e+00> : vector<16x16xf32>
    %346 = tpu.matmul %343, %344, %cst_93 {dimension_numbers = #tpu.dot_dimension_numbers<[1], [1], [0], [0], [0, 0, 1, 0], [], []>} : vector<16x32xbf16>, vector<16x32xbf16>, vector<16x16xf32> -> vector<16x16xf32>
    %cst_94 = arith.constant dense<0xFF800000> : vector<16xf32>
    %347 = vector.multi_reduction <maximumf>, %346, %cst_94 [1] : vector<16x16xf32> to vector<16xf32>
    %348 = vector.shape_cast %347 : vector<16xf32> to vector<16x1xf32>
    %349 = vector.broadcast %348 : vector<16x1xf32> to vector<16x16xf32>
    %350 = arith.subf %346, %349 : vector<16x16xf32>
    %351 = math.exp %350 : vector<16x16xf32>
    %cst_95 = arith.constant dense<0.000000e+00> : vector<16xf32>
    %352 = vector.multi_reduction <add>, %351, %cst_95 [1] : vector<16x16xf32> to vector<16xf32>
    %353 = vector.shape_cast %352 : vector<16xf32> to vector<16x1xf32>
    %354 = vector.broadcast %353 : vector<16x1xf32> to vector<16x16xf32>
    %355 = arith.divf %351, %354 : vector<16x16xf32>
    %356 = arith.truncf %355 : vector<16x16xf32> to vector<16x16xbf16>
    %cst_96 = arith.constant dense<0.000000e+00> : vector<16x32xf32>
    %357 = tpu.matmul %356, %345, %cst_96 {dimension_numbers = #tpu.dot_dimension_numbers<[1], [0], [0], [1], [0, 0, 1, 1], [], []>} : vector<16x16xbf16>, vector<16x32xbf16>, vector<16x32xf32> -> vector<16x32xf32>
    %358 = vector.extract_strided_slice %262 {offsets = [16, 64], sizes = [16, 32], strides = [1, 1]} : vector<32x128xbf16> to vector<16x32xbf16>
    %359 = vector.extract_strided_slice %264 {offsets = [16, 64], sizes = [16, 32], strides = [1, 1]} : vector<32x128xbf16> to vector<16x32xbf16>
    %360 = vector.extract_strided_slice %266 {offsets = [16, 64], sizes = [16, 32], strides = [1, 1]} : vector<32x128xbf16> to vector<16x32xbf16>
    %cst_97 = arith.constant dense<0.000000e+00> : vector<16x16xf32>
    %361 = tpu.matmul %358, %359, %cst_97 {dimension_numbers = #tpu.dot_dimension_numbers<[1], [1], [0], [0], [0, 0, 1, 0], [], []>} : vector<16x32xbf16>, vector<16x32xbf16>, vector<16x16xf32> -> vector<16x16xf32>
    %cst_98 = arith.constant dense<0xFF800000> : vector<16xf32>
    %362 = vector.multi_reduction <maximumf>, %361, %cst_98 [1] : vector<16x16xf32> to vector<16xf32>
    %363 = vector.shape_cast %362 : vector<16xf32> to vector<16x1xf32>
    %364 = vector.broadcast %363 : vector<16x1xf32> to vector<16x16xf32>
    %365 = arith.subf %361, %364 : vector<16x16xf32>
    %366 = math.exp %365 : vector<16x16xf32>
    %cst_99 = arith.constant dense<0.000000e+00> : vector<16xf32>
    %367 = vector.multi_reduction <add>, %366, %cst_99 [1] : vector<16x16xf32> to vector<16xf32>
    %368 = vector.shape_cast %367 : vector<16xf32> to vector<16x1xf32>
    %369 = vector.broadcast %368 : vector<16x1xf32> to vector<16x16xf32>
    %370 = arith.divf %366, %369 : vector<16x16xf32>
    %371 = arith.truncf %370 : vector<16x16xf32> to vector<16x16xbf16>
    %cst_100 = arith.constant dense<0.000000e+00> : vector<16x32xf32>
    %372 = tpu.matmul %371, %360, %cst_100 {dimension_numbers = #tpu.dot_dimension_numbers<[1], [0], [0], [1], [0, 0, 1, 1], [], []>} : vector<16x16xbf16>, vector<16x32xbf16>, vector<16x32xf32> -> vector<16x32xf32>
    %373 = vector.extract_strided_slice %262 {offsets = [16, 96], sizes = [16, 32], strides = [1, 1]} : vector<32x128xbf16> to vector<16x32xbf16>
    %374 = vector.extract_strided_slice %264 {offsets = [16, 96], sizes = [16, 32], strides = [1, 1]} : vector<32x128xbf16> to vector<16x32xbf16>
    %375 = vector.extract_strided_slice %266 {offsets = [16, 96], sizes = [16, 32], strides = [1, 1]} : vector<32x128xbf16> to vector<16x32xbf16>
    %cst_101 = arith.constant dense<0.000000e+00> : vector<16x16xf32>
    %376 = tpu.matmul %373, %374, %cst_101 {dimension_numbers = #tpu.dot_dimension_numbers<[1], [1], [0], [0], [0, 0, 1, 0], [], []>} : vector<16x32xbf16>, vector<16x32xbf16>, vector<16x16xf32> -> vector<16x16xf32>
    %cst_102 = arith.constant dense<0xFF800000> : vector<16xf32>
    %377 = vector.multi_reduction <maximumf>, %376, %cst_102 [1] : vector<16x16xf32> to vector<16xf32>
    %378 = vector.shape_cast %377 : vector<16xf32> to vector<16x1xf32>
    %379 = vector.broadcast %378 : vector<16x1xf32> to vector<16x16xf32>
    %380 = arith.subf %376, %379 : vector<16x16xf32>
    %381 = math.exp %380 : vector<16x16xf32>
    %cst_103 = arith.constant dense<0.000000e+00> : vector<16xf32>
    %382 = vector.multi_reduction <add>, %381, %cst_103 [1] : vector<16x16xf32> to vector<16xf32>
    %383 = vector.shape_cast %382 : vector<16xf32> to vector<16x1xf32>
    %384 = vector.broadcast %383 : vector<16x1xf32> to vector<16x16xf32>
    %385 = arith.divf %381, %384 : vector<16x16xf32>
    %386 = arith.truncf %385 : vector<16x16xf32> to vector<16x16xbf16>
    %cst_104 = arith.constant dense<0.000000e+00> : vector<16x32xf32>
    %387 = tpu.matmul %386, %375, %cst_104 {dimension_numbers = #tpu.dot_dimension_numbers<[1], [0], [0], [1], [0, 0, 1, 1], [], []>} : vector<16x16xbf16>, vector<16x32xbf16>, vector<16x32xf32> -> vector<16x32xf32>
    %388 = tpu.concatenate %342, %357, %372, %387 in 1 : vector<16x32xf32>, vector<16x32xf32>, vector<16x32xf32>, vector<16x32xf32> -> vector<16x128xf32>
    %389 = tpu.concatenate %327, %388 in 0 : vector<16x128xf32>, vector<16x128xf32> -> vector<32x128xf32>
    %390 = arith.truncf %389 : vector<32x128xf32> to vector<32x128xbf16>
    %391 = arith.index_cast %c1_i32 : i32 to index
    %c0_105 = arith.constant 0 : index
    %c0_106 = arith.constant 0 : index
    %392 = vector.load %arg4[%391, %c0_105, %c0_106] : memref<2x128x128xbf16, #tpu.memory_space<vmem>>, vector<1x128x128xbf16>
    %393 = vector.shape_cast %392 : vector<1x128x128xbf16> to vector<128x128xbf16>
    %cst_107 = arith.constant dense<0.000000e+00> : vector<32x128xf32>
    %394 = tpu.matmul %390, %393, %cst_107 {dimension_numbers = #tpu.dot_dimension_numbers<[1], [0], [0], [1], [0, 0, 1, 1], [], []>} : vector<32x128xbf16>, vector<128x128xbf16>, vector<32x128xf32> -> vector<32x128xf32>
    %395 = arith.addf %223, %394 : vector<32x128xf32>
    %396 = vector.broadcast %229 : vector<1x128xf32> to vector<32x128xf32>
    %397 = arith.addf %395, %396 : vector<32x128xf32>
    %cst_108 = arith.constant dense<0.000000e+00> : vector<32xf32>
    %398 = vector.multi_reduction <add>, %397, %cst_108 [1] : vector<32x128xf32> to vector<32xf32>
    %399 = vector.shape_cast %398 : vector<32xf32> to vector<32x1xf32>
    %cst_109 = arith.constant 1.280000e+02 : f32
    %400 = vector.broadcast %cst_109 : f32 to vector<32x1xf32>
    %401 = arith.divf %399, %400 : vector<32x1xf32>
    %402 = vector.broadcast %401 : vector<32x1xf32> to vector<32x128xf32>
    %403 = arith.subf %397, %402 : vector<32x128xf32>
    %404 = arith.mulf %403, %403 : vector<32x128xf32>
    %cst_110 = arith.constant dense<0.000000e+00> : vector<32xf32>
    %405 = vector.multi_reduction <add>, %404, %cst_110 [1] : vector<32x128xf32> to vector<32xf32>
    %406 = vector.shape_cast %405 : vector<32xf32> to vector<32x1xf32>
    %cst_111 = arith.constant 1.280000e+02 : f32
    %407 = vector.broadcast %cst_111 : f32 to vector<32x1xf32>
    %408 = arith.divf %406, %407 : vector<32x1xf32>
    %cst_112 = arith.constant 9.99999974E-6 : f32
    %409 = vector.broadcast %cst_112 : f32 to vector<32x1xf32>
    %410 = arith.addf %408, %409 : vector<32x1xf32>
    %411 = math.rsqrt %410 : vector<32x1xf32>
    %412 = vector.broadcast %411 : vector<32x1xf32> to vector<32x128xf32>
    %413 = arith.mulf %403, %412 : vector<32x128xf32>
    %414 = vector.broadcast %230 : vector<1x128xf32> to vector<32x128xf32>
    %415 = arith.mulf %413, %414 : vector<32x128xf32>
    %416 = vector.broadcast %231 : vector<1x128xf32> to vector<32x128xf32>
    %417 = arith.addf %415, %416 : vector<32x128xf32>
    %418 = arith.truncf %417 : vector<32x128xf32> to vector<32x128xbf16>
    %419 = arith.index_cast %c1_i32 : i32 to index
    %c0_113 = arith.constant 0 : index
    %c0_114 = arith.constant 0 : index
    %420 = vector.load %arg5[%419, %c0_113, %c0_114] : memref<2x128x128xbf16, #tpu.memory_space<vmem>>, vector<1x128x128xbf16>
    %421 = vector.shape_cast %420 : vector<1x128x128xbf16> to vector<128x128xbf16>
    %cst_115 = arith.constant dense<0.000000e+00> : vector<32x128xf32>
    %422 = tpu.matmul %418, %421, %cst_115 {dimension_numbers = #tpu.dot_dimension_numbers<[1], [0], [0], [1], [0, 0, 1, 1], [], []>} : vector<32x128xbf16>, vector<128x128xbf16>, vector<32x128xf32> -> vector<32x128xf32>
    %423 = vector.broadcast %232 : vector<1x128xf32> to vector<32x128xf32>
    %424 = arith.addf %422, %423 : vector<32x128xf32>
    %cst_116 = arith.constant 5.000000e-01 : f32
    %425 = vector.broadcast %cst_116 : f32 to vector<32x128xf32>
    %426 = arith.mulf %425, %424 : vector<32x128xf32>
    %cst_117 = arith.constant 4.471500e-02 : f32
    %427 = vector.broadcast %cst_117 : f32 to vector<32x128xf32>
    %428 = arith.mulf %427, %424 : vector<32x128xf32>
    %429 = arith.mulf %428, %424 : vector<32x128xf32>
    %430 = arith.mulf %429, %424 : vector<32x128xf32>
    %431 = arith.addf %424, %430 : vector<32x128xf32>
    %cst_118 = arith.constant 0.797884583 : f32
    %432 = vector.broadcast %cst_118 : f32 to vector<32x128xf32>
    %433 = arith.mulf %432, %431 : vector<32x128xf32>
    %434 = math.tanh %433 : vector<32x128xf32>
    %cst_119 = arith.constant 1.000000e+00 : f32
    %435 = vector.broadcast %cst_119 : f32 to vector<32x128xf32>
    %436 = arith.addf %435, %434 : vector<32x128xf32>
    %437 = arith.mulf %426, %436 : vector<32x128xf32>
    %438 = arith.truncf %437 : vector<32x128xf32> to vector<32x128xbf16>
    %439 = arith.index_cast %c1_i32 : i32 to index
    %c0_120 = arith.constant 0 : index
    %c0_121 = arith.constant 0 : index
    %440 = vector.load %arg6[%439, %c0_120, %c0_121] : memref<2x128x128xbf16, #tpu.memory_space<vmem>>, vector<1x128x128xbf16>
    %441 = vector.shape_cast %440 : vector<1x128x128xbf16> to vector<128x128xbf16>
    %cst_122 = arith.constant dense<0.000000e+00> : vector<32x128xf32>
    %442 = tpu.matmul %438, %441, %cst_122 {dimension_numbers = #tpu.dot_dimension_numbers<[1], [0], [0], [1], [0, 0, 1, 1], [], []>} : vector<32x128xbf16>, vector<128x128xbf16>, vector<32x128xf32> -> vector<32x128xf32>
    %443 = arith.addf %397, %442 : vector<32x128xf32>
    %444 = vector.broadcast %233 : vector<1x128xf32> to vector<32x128xf32>
    %445 = arith.addf %443, %444 : vector<32x128xf32>
    %c2_i32 = arith.constant 2 : i32
    %c0_123 = arith.constant 0 : index
    %c0_124 = arith.constant 0 : index
    %446 = vector.load %arg7[%c0_123, %c0_124] : memref<2x128xf32, #tpu.memory_space<vmem>>, vector<2x128xf32>
    %447 = vector.extract_strided_slice %446 {offsets = [0, 0], sizes = [1, 128], strides = [1, 1]} : vector<2x128xf32> to vector<1x128xf32>
    %448 = vector.extract_strided_slice %446 {offsets = [1, 0], sizes = [1, 128], strides = [1, 1]} : vector<2x128xf32> to vector<1x128xf32>
    %cst_125 = arith.constant dense<0.000000e+00> : vector<32xf32>
    %449 = vector.multi_reduction <add>, %445, %cst_125 [1] : vector<32x128xf32> to vector<32xf32>
    %450 = vector.shape_cast %449 : vector<32xf32> to vector<32x1xf32>
    %cst_126 = arith.constant 1.280000e+02 : f32
    %451 = vector.broadcast %cst_126 : f32 to vector<32x1xf32>
    %452 = arith.divf %450, %451 : vector<32x1xf32>
    %453 = vector.broadcast %452 : vector<32x1xf32> to vector<32x128xf32>
    %454 = arith.subf %445, %453 : vector<32x128xf32>
    %455 = arith.mulf %454, %454 : vector<32x128xf32>
    %cst_127 = arith.constant dense<0.000000e+00> : vector<32xf32>
    %456 = vector.multi_reduction <add>, %455, %cst_127 [1] : vector<32x128xf32> to vector<32xf32>
    %457 = vector.shape_cast %456 : vector<32xf32> to vector<32x1xf32>
    %cst_128 = arith.constant 1.280000e+02 : f32
    %458 = vector.broadcast %cst_128 : f32 to vector<32x1xf32>
    %459 = arith.divf %457, %458 : vector<32x1xf32>
    %cst_129 = arith.constant 9.99999974E-6 : f32
    %460 = vector.broadcast %cst_129 : f32 to vector<32x1xf32>
    %461 = arith.addf %459, %460 : vector<32x1xf32>
    %462 = math.rsqrt %461 : vector<32x1xf32>
    %463 = vector.broadcast %462 : vector<32x1xf32> to vector<32x128xf32>
    %464 = arith.mulf %454, %463 : vector<32x128xf32>
    %465 = vector.broadcast %447 : vector<1x128xf32> to vector<32x128xf32>
    %466 = arith.mulf %464, %465 : vector<32x128xf32>
    %467 = vector.broadcast %448 : vector<1x128xf32> to vector<32x128xf32>
    %468 = arith.addf %466, %467 : vector<32x128xf32>
    %469 = vector.shape_cast %468 : vector<32x128xf32> to vector<2x16x128xf32>
    %c0_130 = arith.constant 0 : index
    %c0_131 = arith.constant 0 : index
    %c0_132 = arith.constant 0 : index
    %470 = vector.load %arg8[%c0_130, %c0_131, %c0_132] : memref<2x16x128xf32, #tpu.memory_space<vmem>>, vector<2x16x128xf32>
    tpu.vector_store %arg8[%c0_130, %c0_131, %c0_132], %469 {strides = array<i32>} : memref<2x16x128xf32, #tpu.memory_space<vmem>>, vector<2x16x128xf32>,
    return
  }
  func.func @transform_0(%arg0: i32) -> (i32, i32, i32) {
    %c0_i32 = arith.constant 0 : i32
    %c0_i32_0 = arith.constant 0 : i32
    %c0_i32_1 = arith.constant 0 : i32
    return %arg0, %c0_i32, %c0_i32_0 : i32, i32, i32
  }
  func.func @transform_1(%arg0: i32) -> (i32, i32, i32) {
    %c0_i32 = arith.constant 0 : i32
    %c0_i32_0 = arith.constant 0 : i32
    %c0_i32_1 = arith.constant 0 : i32
    %c0_i32_2 = arith.constant 0 : i32
    return %c0_i32, %c0_i32_0, %c0_i32_1 : i32, i32, i32
  }
  func.func @transform_2(%arg0: i32) -> (i32, i32, i32) {
    %c0_i32 = arith.constant 0 : i32
    %c0_i32_0 = arith.constant 0 : i32
    %c0_i32_1 = arith.constant 0 : i32
    %c0_i32_2 = arith.constant 0 : i32
    return %c0_i32, %c0_i32_0, %c0_i32_1 : i32, i32, i32
  }
  func.func @transform_3(%arg0: i32) -> (i32, i32, i32) {
    %c0_i32 = arith.constant 0 : i32
    %c0_i32_0 = arith.constant 0 : i32
    %c0_i32_1 = arith.constant 0 : i32
    %c0_i32_2 = arith.constant 0 : i32
    return %c0_i32, %c0_i32_0, %c0_i32_1 : i32, i32, i32
  }
  func.func @transform_4(%arg0: i32) -> (i32, i32, i32) {
    %c0_i32 = arith.constant 0 : i32
    %c0_i32_0 = arith.constant 0 : i32
    %c0_i32_1 = arith.constant 0 : i32
    %c0_i32_2 = arith.constant 0 : i32
    return %c0_i32, %c0_i32_0, %c0_i32_1 : i32, i32, i32
  }
  func.func @transform_5(%arg0: i32) -> (i32, i32, i32) {
    %c0_i32 = arith.constant 0 : i32
    %c0_i32_0 = arith.constant 0 : i32
    %c0_i32_1 = arith.constant 0 : i32
    %c0_i32_2 = arith.constant 0 : i32
    return %c0_i32, %c0_i32_0, %c0_i32_1 : i32, i32, i32
  }
  func.func @transform_6(%arg0: i32) -> (i32, i32) {
    %c0_i32 = arith.constant 0 : i32
    %c0_i32_0 = arith.constant 0 : i32
    %c0_i32_1 = arith.constant 0 : i32
    return %c0_i32, %c0_i32_0 : i32, i32
  }
  func.func @transform_7(%arg0: i32) -> (i32, i32, i32) {
    %c0_i32 = arith.constant 0 : i32
    %c0_i32_0 = arith.constant 0 : i32
    %c0_i32_1 = arith.constant 0 : i32
    return %arg0, %c0_i32, %c0_i32_0 : i32, i32, i32
  }
}

</mosaic_0001>

<bundles_post_ra>
// kernel: bottleneck_forward.1
= control target key start
LH: loop header
LB: loop body
LE: loop exit
PB: predicated region body
PF: predicated region fallthrough
CT: control target
= control target key end

     0   :  { %12 = vsyncpa [#allocation3], 0  ;;  %s5879_s0 = inlined_call_operand.hbm [shape: f32[2,16,128], index: 0, kind: input, shape index: {}]   ;;  %s5880_s1 = inlined_call_operand.hbm [shape: f32[2,8,128], index: 1, kind: input, shape index: {}]   ;;  %s5881_s2 = inlined_call_operand.hbm [shape: bf16[2,128,384], index: 2, kind: input, shape index: {}]   ;;  %s5882_s3 = inlined_call_operand.hbm [shape: bf16[2,128,128], index: 3, kind: input, shape index: {}]   ;;  %s5883_s4 = inlined_call_operand.hbm [shape: bf16[2,128,128], index: 4, kind: input, shape index: {}]   ;;  %s5884_s5 = inlined_call_operand.hbm [shape: bf16[2,128,128], index: 5, kind: input, shape index: {}]   ;;  %s5885_s6 = inlined_call_operand.vmem [shape: f32[2,128], index: 6, kind: input, shape index: {}]   ;;  %s5886_s7 = inlined_call_operand.hbm [shape: f32[2,16,128], index: 7, kind: output, shape index: {}]  }
   0x1   :  { %13 = vsyncpa [#allocation6], 0 }
   0x2   :  { %14 = vsyncpa [#allocation9], 0 }
   0x3   :  { %15 = vsyncpa [#allocation12], 0 }
   0x4   :  { %16 = vsyncpa [#allocation4], 0  ;;  %s5025_s24 = smov [#allocation5]   ;;  %s5026_s26 = smov [#allocation8]  }
   0x5   :  { %s34_s25 = sshll.u32 %s5025_s24, 4  ;;  %s58_s27 = sshll.u32 %s5026_s26, 4  ;;  %s35_s25 = int_to_ptr.vmem [resolvable:$true] %s34_s25  ;;  %s5083_s27 = int_to_ptr.vmem [resolvable:$true] %s58_s27 }
   0x6   :  { %s4861_s30 = scalar_lea.hbm %s5880_s1, 256 }
   0x7   :  { %p4862_p0 = scmp.ne.s32.totalorder %s5880_s1, %s4861_s30  ;;  %p4865_p1 = scmp.lt.u32.totalorder %s4861_s30, %s5880_s1 }
   0x9   :  { %p4867_p2 = pnand %p4865_p1, %p4862_p0 }
   0xb   :  { %4870 = shalt.err (!%p4867_p2)
}
   0xc   :  { %s4871_s12 = scalar_lea.vmem %s35_s25, 256  ;;  %p4876_p4 = scmp.lt.s32.totalorder %s35_s25, %s35_s25 }
   0xd   :  { %p4872_p3 = scmp.ne.s32.totalorder %s35_s25, %s4871_s12  ;;  %p4877_p5 = scmp.lt.s32.totalorder %s4871_s12, %s4871_s12 }
   0xf   :  { %p4878_p6 = por %p4877_p5, %p4876_p4 }
  0x11   :  { %p4879_p7 = pnand %p4878_p6, %p4872_p3 }
  0x13   :  { %4882 = shalt.err (!%p4879_p7)
}
  0x14   :  { %s5027_s13 = smov 128   ;;  %s5028_s14 = smov 8  }
  0x15   :  { %40 = dma.hbm_to_vmem [thread:$0]  %s5880_s1, 256, %s35_s25, [#allocation6], %s5027_s13, %s5027_s13, %s5028_s14  }
  0x16   :  { %s4883_s19 = scalar_lea.hbm %s5882_s3, 2048 }
  0x17   :  { %p4884_p8 = scmp.ne.s32.totalorder %s5882_s3, %s4883_s19  ;;  %p4887_p9 = scmp.lt.u32.totalorder %s4883_s19, %s5882_s3 }
  0x19   :  { %p4889_p10 = pnand %p4887_p9, %p4884_p8 }
  0x1b   :  { %4892 = shalt.err (!%p4889_p10)
}
  0x1c   :  { %s4893_s24 = scalar_lea.vmem %s5083_s27, 2048  ;;  %p4898_p12 = scmp.lt.s32.totalorder %s5083_s27, %s5083_s27 }
  0x1d   :  { %p4894_p11 = scmp.ne.s32.totalorder %s5083_s27, %s4893_s24  ;;  %p4899_p13 = scmp.lt.s32.totalorder %s4893_s24, %s4893_s24 }
  0x1f   :  { %p4900_p0 = por %p4899_p13, %p4898_p12 }
  0x21   :  { %p4901_p1 = pnand %p4900_p0, %p4894_p11 }
  0x23   :  { %4904 = shalt.err (!%p4901_p1)
}
  0x24   :  { %s5029_s1 = smov 64   ;;  %s5030_s25 = smov 4  }
  0x25   :  { %64 = dma.hbm_to_vmem [thread:$0]  %s5882_s3, 2048, %s5083_s27, [#allocation9], %s5029_s1, %s5029_s1, %s5030_s25  }
  0x26   :  { %s5031_s29 = smov [#allocation2]   ;;  %s5032_s8 = smov [#allocation7]  }
  0x27   :  { %s22_s30 = sshll.u32 %s5031_s29, 4  ;;  %s46_s9 = sshll.u32 %s5032_s8, 4  ;;  %s23_s30 = int_to_ptr.vmem [resolvable:$true] %s22_s30  ;;  %s5120_s9 = int_to_ptr.vmem [resolvable:$true] %s46_s9 }
  0x28   :  { %s4905_s12 = scalar_lea.hbm %s5879_s0, 512 }
  0x29   :  { %p4906_p2 = scmp.ne.s32.totalorder %s5879_s0, %s4905_s12  ;;  %p4909_p3 = scmp.lt.u32.totalorder %s4905_s12, %s5879_s0 }
  0x2b   :  { %p4911_p4 = pnand %p4909_p3, %p4906_p2 }
  0x2d   :  { %4914 = shalt.err (!%p4911_p4)
}
  0x2e   :  { %s4915_s3 = scalar_lea.vmem %s23_s30, 512  ;;  %p4920_p6 = scmp.lt.s32.totalorder %s23_s30, %s23_s30 }
  0x2f   :  { %p4916_p5 = scmp.ne.s32.totalorder %s23_s30, %s4915_s3  ;;  %p4921_p7 = scmp.lt.s32.totalorder %s4915_s3, %s4915_s3 }
  0x31   :  { %p4922_p8 = por %p4921_p7, %p4920_p6 }
  0x33   :  { %p4923_p9 = pnand %p4922_p8, %p4916_p5 }
  0x35   :  { %4926 = shalt.err (!%p4923_p9)
}
  0x36   :  { %28 = dma.hbm_to_vmem [thread:$0]  %s5879_s0, 512, %s23_s30, [#allocation3], %s5027_s13, %s5027_s13, %s5028_s14  }
  0x37   :  { %s4927_s22 = scalar_lea.hbm %s5881_s2, 6144 }
  0x38   :  { %p4928_p10 = scmp.ne.s32.totalorder %s5881_s2, %s4927_s22  ;;  %p4931_p11 = scmp.lt.u32.totalorder %s4927_s22, %s5881_s2 }
  0x3a   :  { %p4933_p12 = pnand %p4931_p11, %p4928_p10 }
  0x3c   :  { %4936 = shalt.err (!%p4933_p12)
}
  0x3d   :  { %s4937_s29 = scalar_lea.vmem %s5120_s9, 6144  ;;  %p4942_p0 = scmp.lt.s32.totalorder %s5120_s9, %s5120_s9 }
  0x3e   :  { %p4938_p13 = scmp.ne.s32.totalorder %s5120_s9, %s4937_s29  ;;  %p4943_p1 = scmp.lt.s32.totalorder %s4937_s29, %s4937_s29 }
  0x40   :  { %p4944_p2 = por %p4943_p1, %p4942_p0 }
  0x42   :  { %p4945_p3 = pnand %p4944_p2, %p4938_p13 }
  0x44   :  { %4948 = shalt.err (!%p4945_p3)
}
  0x45   :  { %s5033_s0 = smov 192   ;;  %s5034_s30 = smov 12  }
  0x46   :  { %52 = dma.hbm_to_vmem [thread:$0]  %s5881_s2, 6144, %s5120_s9, [#allocation6], %s5033_s0, %s5033_s0, %s5034_s30  }
  0x47   :  { %s5035_s11 = smov [#allocation10]   ;;  %s5036_s15 = smov [#allocation11]  }
  0x48   :  { %s70_s12 = sshll.u32 %s5035_s11, 4  ;;  %s82_s16 = sshll.u32 %s5036_s15, 4  ;;  %s71_s12 = int_to_ptr.vmem [resolvable:$true] %s70_s12  ;;  %s5154_s16 = int_to_ptr.vmem [resolvable:$true] %s82_s16 }
  0x49   :  { %s4949_s3 = scalar_lea.hbm %s5883_s4, 2048 }
  0x4a   :  { %p4950_p4 = scmp.ne.s32.totalorder %s5883_s4, %s4949_s3  ;;  %p4953_p5 = scmp.lt.u32.totalorder %s4949_s3, %s5883_s4 }
  0x4c   :  { %p4955_p6 = pnand %p4953_p5, %p4950_p4 }
  0x4e   :  { %4958 = shalt.err (!%p4955_p6)
}
  0x4f   :  { %s4959_s2 = scalar_lea.vmem %s71_s12, 2048  ;;  %p4964_p8 = scmp.lt.s32.totalorder %s71_s12, %s71_s12 }
  0x50   :  { %p4960_p7 = scmp.ne.s32.totalorder %s71_s12, %s4959_s2  ;;  %p4965_p9 = scmp.lt.s32.totalorder %s4959_s2, %s4959_s2 }
  0x52   :  { %p4966_p10 = por %p4965_p9, %p4964_p8 }
  0x54   :  { %p4967_p11 = pnand %p4966_p10, %p4960_p7 }
  0x56   :  { %4970 = shalt.err (!%p4967_p11)
}
  0x57   :  { %76 = dma.hbm_to_vmem [thread:$0]  %s5883_s4, 2048, %s71_s12, [#allocation9], %s5029_s1, %s5029_s1, %s5030_s25  }
  0x58   :  { %s4971_s26 = scalar_lea.hbm %s5884_s5, 2048 }
  0x59   :  { %p4972_p12 = scmp.ne.s32.totalorder %s5884_s5, %s4971_s26  ;;  %p4975_p13 = scmp.lt.u32.totalorder %s4971_s26, %s5884_s5 }
  0x5b   :  { %p4977_p0 = pnand %p4975_p13, %p4972_p12 }
  0x5d   :  { %4980 = shalt.err (!%p4977_p0)
}
  0x5e   :  { %s4981_s8 = scalar_lea.vmem %s5154_s16, 2048  ;;  %p4986_p2 = scmp.lt.s32.totalorder %s5154_s16, %s5154_s16 }
  0x5f   :  { %p4982_p1 = scmp.ne.s32.totalorder %s5154_s16, %s4981_s8  ;;  %p4987_p3 = scmp.lt.s32.totalorder %s4981_s8, %s4981_s8 }
  0x61   :  { %p4988_p4 = por %p4987_p3, %p4986_p2 }
  0x63   :  { %p4989_p5 = pnand %p4988_p4, %p4982_p1 }
  0x65   :  { %4992 = shalt.err (!%p4989_p5)
}
  0x66   :  { %88 = dma.hbm_to_vmem [thread:$0]  %s5884_s5, 2048, %s5154_s16, [#allocation12], %s5029_s1, %s5029_s1, %s5030_s25  }
  0x67   :  { %5015 = dma.done.wait [#allocation3], 512  }
  0x68   :  { %5016 = vsyncadd [#allocation3], 4294966784 }
  0x69   :  { %5017 = dma.done.wait [#allocation6], 6400  }
  0x6a   :  { %5018 = vsyncadd [#allocation6], 4294960896 }
  0x6b   :  { %5019 = dma.done.wait [#allocation9], 4096  }
  0x6c   :  { %5020 = vsyncadd [#allocation9], 4294963200 }
  0x6d   :  { %5021 = dma.done.wait [#allocation12], 2048  }
  0x6e   :  { %5022 = vsyncadd [#allocation12], 4294965248  ;;  %v110_v0 = vld [vmem:[#allocation2] sm:$0xff]  ;;  %v111_v1 = vld [vmem:[#allocation2 + $0x8] sm:$0xff]  ;;  %v5037_v30 = vmov 0   ;;  %v160_v40 = vlaneseq  ;;  %vm5039_vm0 = vmmov 0  }
  0x6f   :  { %115 = vadd.xlane.f32.xlu0 %v110_v0  ;;  %v112_v2 = vld [vmem:[#allocation2 + $0x10] sm:$0xff]  ;;  %v4562_v5 = vld [vmem:[#allocation7 + $0x1c] ss:$12 sps:$4 sm:$0xff]   ;;  %v4568_v22 = vld [vmem:[#allocation7 + $0x4c] ss:$12 sps:$4 sm:$0xff]   ;;  %370 = vmatprep.mubr.bf16.mxu0 %v5037_v30  ;;  %vm450_vm1 = vcmask 261120  }
  0x70   :  { %v4559_v3 = vld [vmem:[#allocation7 + $0x4] ss:$12 sps:$4 sm:$0xff]   ;;  %v4561_v4 = vld [vmem:[#allocation7] ss:$12 sps:$4 sm:$0xff]   ;;  %v4570_v23 = vld [vmem:[#allocation7 + $0x48] ss:$12 sps:$4 sm:$0xff]  }
  0x71   :  { %338 = vmatprep.subr.bf16.mxu0 %v4559_v3  ;;  %v113_v17 = vld [vmem:[#allocation2 + $0x18] sm:$0xff]  ;;  %v4564_v19 = vld [vmem:[#allocation7 + $0x18] ss:$12 sps:$4 sm:$0xff]   ;;  %v4565_v20 = vld [vmem:[#allocation7 + $0x34] ss:$12 sps:$4 sm:$0xff]   ;;  %v5204_v44 = vshrl.u32 %v160_v40, 7 }
  0x72   :  { %339 = vmatpush1.bf16.msra.mxu0 %v4561_v4  ;;  %v4567_v21 = vld [vmem:[#allocation7 + $0x30] ss:$12 sps:$4 sm:$0xff]   ;;  %v4573_v25 = vld [vmem:[#allocation7 + $0x60] ss:$12 sps:$4 sm:$0xff]   ;;  %v4576_v27 = vld [vmem:[#allocation7 + $0x78] ss:$12 sps:$4 sm:$0xff]  }
  0x73   :  { %117 = vadd.xlane.f32.xlu0 %v111_v1  ;;  %340 = vmatprep.subr.bf16.mxu0 %v4562_v5  ;;  %v4571_v24 = vld [vmem:[#allocation7 + $0x64] ss:$12 sps:$4 sm:$0xff]   ;;  %v4574_v26 = vld [vmem:[#allocation7 + $0x7c] ss:$12 sps:$4 sm:$0xff]   ;;  %v4577_v28 = vld [vmem:[#allocation7 + $0x94] ss:$12 sps:$4 sm:$0xff]  }
  0x74   :  { %v4579_v29 = vld [vmem:[#allocation7 + $0x90] ss:$12 sps:$4 sm:$0xff]   ;;  %v4580_v31 = vld [vmem:[#allocation7 + $0xac] ss:$12 sps:$4 sm:$0xff]   ;;  %v4582_v32 = vld [vmem:[#allocation7 + $0xa8] ss:$12 sps:$4 sm:$0xff]  }
  0x75   :  { %v4583_v33 = vld [vmem:[#allocation7 + $0x8] ss:$12 sps:$4 sm:$0xff]   ;;  %v4584_v34 = vld [vmem:[#allocation7 + $0x20] ss:$12 sps:$4 sm:$0xff]   ;;  %v4585_v35 = vld [vmem:[#allocation7 + $0x38] ss:$12 sps:$4 sm:$0xff]  }
  0x76   :  { %341 = vmatpush1.bf16.msra.mxu0 %v4564_v19  ;;  %4129 = vmatprep.subr.bf16.mxu1 %v4583_v33  ;;  %v5207_v47 = vsub.s32 0, %v5204_v44  ;;  %v114_v49 = vld [vmem:[#allocation5] sm:$0xff]  ;;  %v5212_v53 = vsub.s32 1, %v5204_v44  ;;  %v5038_v3 = vmov 0.0   ;;  %vm498_vm2 = vcmask 130048   ;;  %s5040_s5 = smov 96  }
  0x77   :  { %119 = vadd.xlane.f32.xlu0 %v112_v2  ;;  %342 = vmatprep.subr.bf16.mxu0 %v4565_v20  ;;  %v4586_v62 = vld [vmem:[#allocation7 + $0x50] ss:$12 sps:$4 sm:$0xff]   ;;  %v4587_v63 = vld [vmem:[#allocation7 + $0x68] ss:$12 sps:$4 sm:$0xff]   ;;  %s5041_s25 = smov 32   ;;  %vm958_vm3 = vcmask 523264  }
  0x78   :  { %4130 = vmatpush3.bf16.msra.mxu1 %v4583_v33  ;;  %v163_v52 = vrot.slane %v114_v49, %v5207_v47  ;;  %v171_v57 = vrot.slane %v114_v49, %v5212_v53  ;;  %vm961_vm4 = vcmask 785408   ;;  %s5042_s12 = smov [#allocation13]  }
  0x79   :  { %4131 = vmatprep.subr.bf16.mxu1 %v4584_v34 }
  0x7a   :  { %343 = vmatpush1.bf16.msra.mxu0 %v4567_v21 }
  0x7b   :  { %344 = vmatprep.subr.bf16.mxu0 %v4568_v22 }
  0x7c   :  { %4132 = vmatpush3.bf16.msra.mxu1 %v4584_v34 }
  0x7d   :  { %4133 = vmatprep.subr.bf16.mxu1 %v4585_v35 }
  0x7e   :  { %345 = vmatpush1.bf16.msra.mxu0 %v4570_v23 }
  0x7f   :  { %346 = vmatprep.subr.bf16.mxu0 %v4571_v24 }
  0x80   :  { %4134 = vmatpush3.bf16.msra.mxu1 %v4585_v35 }
  0x81   :  { %4135 = vmatprep.subr.bf16.mxu1 %v4586_v62 }
  0x82   :  { %347 = vmatpush1.bf16.msra.mxu0 %v4573_v25 }
  0x83   :  { %348 = vmatprep.subr.bf16.mxu0 %v4574_v26 }
  0x84   :  { %4136 = vmatpush3.bf16.msra.mxu1 %v4586_v62 }
  0x85   :  { %4137 = vmatprep.subr.bf16.mxu1 %v4587_v63 }
  0x86   :  { %349 = vmatpush1.bf16.msra.mxu0 %v4576_v27 }
  0x87   :  { %350 = vmatprep.subr.bf16.mxu0 %v4577_v28 }
  0x88   :  { %4138 = vmatpush3.bf16.msra.mxu1 %v4587_v63 }
  0x8a   :  { %351 = vmatpush1.bf16.msra.mxu0 %v4579_v29 }
  0x8b   :  { %352 = vmatprep.subr.bf16.mxu0 %v4580_v31 }
  0x8e   :  { %353 = vmatpush1.bf16.msra.mxu0 %v4582_v32 }
  0x8f   :  { %4179 = vmatprep.subr.bf16.mxu0 %v5038_v3 }
  0xfc   :  { %v116_v6 = vpop.xlane.xlu0 %115 }
  0xfd   :  { %v124_v7 = vmul.f32 0.0078125, %v116_v6 }
  0xff   :  { %v5191_v8 = vsub.f32 %v110_v0, %v124_v7  ;;  %v4588_v0 = vld [vmem:[#allocation7 + $0x80] ss:$12 sps:$4 sm:$0xff]  }
 0x100   :  { %v118_v9 = vpop.xlane.xlu0 %117  ;;  %4139 = vmatprep.subr.bf16.mxu1 %v4588_v0 }
 0x101   :  { %v125_v10 = vmul.f32 0.0078125, %v118_v9  ;;  %v132_v11 = vmul.f32 %v5191_v8, %v5191_v8  ;;  %4140 = vmatpush3.bf16.msra.mxu1 %v4588_v0 }
 0x103   :  { %136 = vadd.xlane.f32.xlu1 %v132_v11  ;;  %v5195_v12 = vsub.f32 %v111_v1, %v125_v10  ;;  %v4589_v1 = vld [vmem:[#allocation7 + $0x98] ss:$12 sps:$4 sm:$0xff]  }
 0x104   :  { %v120_v13 = vpop.xlane.xlu0 %119  ;;  %4141 = vmatprep.subr.bf16.mxu1 %v4589_v1 }
 0x105   :  { %v133_v14 = vmul.f32 %v5195_v12, %v5195_v12  ;;  %v126_v15 = vmul.f32 0.0078125, %v120_v13  ;;  %4142 = vmatpush3.bf16.msra.mxu1 %v4589_v1 }
 0x107   :  { %138 = vadd.xlane.f32.xlu1 %v133_v14  ;;  %v5199_v16 = vsub.f32 %v112_v2, %v126_v15  ;;  %v4590_v2 = vld [vmem:[#allocation7 + $0xb0] ss:$12 sps:$4 sm:$0xff]  }
 0x108   :  { %4143 = vmatprep.subr.bf16.mxu1 %v4590_v2 }
 0x109   :  { %v134_v18 = vmul.f32 %v5199_v16, %v5199_v16  ;;  %4144 = vmatpush3.bf16.msra.mxu1 %v4590_v2 }
 0x10a   :  { %4149 = vmatprep.subr.bf16.mxu1 %v5038_v3 }
 0x10b   :  { %121 = vadd.xlane.f32.xlu1 %v113_v17  ;;  %140 = vadd.xlane.f32.xlu0 %v134_v18 }
 0x190   :  { %v137_v36 = vpop.xlane.xlu1 %136 }
 0x191   :  { %v144_v37 = vmul.f32 0.0078125, %v137_v36 }
 0x193   :  { %v148_v38 = vadd.f32 1e-05, %v144_v37 }
 0x194   :  { %v139_v39 = vpop.xlane.xlu1 %138 }
 0x195   :  { %4671 = vrsqrt.f32 %v148_v38  ;;  %v145_v41 = vmul.f32 0.0078125, %v139_v39 }
 0x197   :  { %v149_v42 = vadd.f32 1e-05, %v145_v41 }
 0x198   :  { %v122_v43 = vpop.xlane.xlu1 %121  ;;  %v141_v4 = vpop.xlane.xlu0 %140 }
 0x199   :  { %4673 = vrsqrt.f32 %v149_v42  ;;  %v127_v45 = vmul.f32 0.0078125, %v122_v43  ;;  %v146_v5 = vmul.f32 0.0078125, %v141_v4 }
 0x19b   :  { %v131_v46 = vsub.f32 %v113_v17, %v127_v45  ;;  %v150_v6 = vadd.f32 1e-05, %v146_v5 }
 0x19d   :  { %v135_v48 = vmul.f32 %v131_v46, %v131_v46  ;;  %4675 = vrsqrt.f32 %v150_v6 }
 0x19f   :  { %v4672_v50 = vpop.eup %4671  ;;  %142 = vadd.xlane.f32.xlu1 %v135_v48 }
 0x1a0   :  { %v156_v51 = vmul.f32 %v4672_v50, %v5191_v8 }
 0x1a2   :  { %v164_v56 = vmul.f32 %v163_v52, %v156_v51 }
 0x1a3   :  { %v4674_v54 = vpop.eup %4673 }
 0x1a4   :  { %v157_v55 = vmul.f32 %v4674_v54, %v5195_v12  ;;  %v172_v59 = vadd.f32 %v171_v57, %v164_v56 }
 0x1a6   :  { %v165_v58 = vmul.f32 %v163_v52, %v157_v55 }
 0x1a7   :  { %v4676_v10 = vpop.eup %4675 }
 0x1a8   :  { %v173_v60 = vadd.f32 %v171_v57, %v165_v58  ;;  %v158_v11 = vmul.f32 %v4676_v10, %v5199_v16 }
 0x1aa   :  { %v176_v61 = vpack.c.bf16 %v173_v60, %v172_v59  ;;  %v166_v14 = vmul.f32 %v163_v52, %v158_v11 }
 0x1ac   :  { %371 = vmatmul.mubr.bf16.vlgmr.msra.gmra.mrb[0].mxu0 %v176_v61  ;;  %4145 = vmatprep.mubr.bf16.mxu1 %v176_v61  ;;  %v174_v17 = vadd.f32 %v171_v57, %v166_v14 }
 0x1ad   :  { %380 = vmatprep.mubr.bf16.mxu0 %v5037_v30 }
 0x22c   :  { %v143_v7 = vpop.xlane.xlu1 %142 }
 0x22d   :  { %v147_v8 = vmul.f32 0.0078125, %v143_v7 }
 0x22f   :  { %v151_v9 = vadd.f32 1e-05, %v147_v8 }
 0x231   :  { %4677 = vrsqrt.f32 %v151_v9 }
 0x23b   :  { %v4678_v12 = vpop.eup %4677 }
 0x23c   :  { %v159_v13 = vmul.f32 %v4678_v12, %v131_v46 }
 0x23e   :  { %v167_v15 = vmul.f32 %v163_v52, %v159_v13 }
 0x240   :  { %v175_v18 = vadd.f32 %v171_v57, %v167_v15 }
 0x242   :  { %v177_v19 = vpack.c.bf16 %v175_v18, %v174_v17 }
 0x244   :  { %381 = vmatmul.mubr.bf16.gmra.mrb[4].mxu0 %v177_v19  ;;  %4146 = vmatmul.mubr.bf16.vlgmr.msra.gmra.mrb[0].mxu1 %v177_v19 }
 0x245   :  { %4151 = vmatprep.mubr.msk.bf16.mxu1 %vm5039_vm0, %v5038_v3  ;;  %4181 = vmatprep.mubr.msk.bf16.mxu0 %vm5039_vm0, %v5038_v3 }
 0x27f   :  { %v372_v20 = vpop.f32.mrb[0].mxu0 }
 0x280   :  { %v374_v21 = vpop.f32.mrb[1].mxu0  ;;  %v440_v16 = vmul.f32 0.17677669, %v372_v20 }
 0x281   :  { %v376_v22 = vpop.f32.mrb[2].mxu0 }
 0x282   :  { %v441_v23 = vmul.f32 0.17677669, %v376_v22  ;;  %v378_v24 = vpop.f32.mrb[3].mxu0 }
 0x283   :  { %v5224_v25 = vpack.c.bf16 %v378_v24, %v374_v21 }
 0x284   :  { %v5226_v26 = vpack.c.bf16 %v441_v23, %v440_v16 }
 0x285   :  { %v455_v27 = vsel %vm450_vm1, %v5224_v25, 0 }
 0x286   :  { %4150 = vmatpush3.bf16.xpose.msra.mxu1 %v455_v27 }
 0x287   :  { %4155 = vmatprep.subr.bf16.mxu1 %v5038_v3 }
 0x28d   :  { %4152 = vmatmul.mubr.msk.bf16.vlgmr.msra.gmra.mrb[4].mxu1 %vm450_vm1, %v5226_v26 }
 0x28e   :  { %4157 = vmatprep.mubr.msk.bf16.mxu1 %vm5039_vm0, %v5038_v3 }
 0x317   :  { %v382_v28 = vpop.f32.mrb[4].mxu0  ;;  %v4147_v29 = vpop.f32.mrb[0].mxu1 }
 0x318   :  { %v384_v31 = vpop.f32.mrb[5].mxu0  ;;  %v425_v32 = vpop.f32.mrb[1].mxu1  ;;  %v442_v35 = vmul.f32 0.17677669, %v382_v28 }
 0x319   :  { %v386_v33 = vpop.f32.mrb[6].mxu0  ;;  %v4148_v34 = vpop.f32.mrb[2].mxu1 }
 0x31a   :  { %v443_v36 = vmul.f32 0.17677669, %v386_v33  ;;  %v5235_v37 = vpack.c.bf16 %v4148_v34, %v4147_v29  ;;  %v388_v38 = vpop.f32.mrb[7].mxu0  ;;  %v428_v39 = vpop.f32.mrb[3].mxu1 }
 0x31b   :  { %v5237_v40 = vpack.c.bf16 %v388_v38, %v384_v31  ;;  %v5239_v41 = vpack.c.bf16 %v428_v39, %v425_v32 }
 0x31c   :  { %v5241_v42 = vpack.c.bf16 %v443_v36, %v442_v35 }
 0x31d   :  { %4156 = vmatpush3.bf16.msra.mxu1 %v5239_v41 }
 0x31e   :  { %4161 = vmatprep.subr.bf16.mxu1 %v5038_v3 }
 0x360   :  { %v491_v43 = vpop.f32.mrb[4].mxu1 }
 0x361   :  { %v4153_v45 = vpop.f32.mrb[5].mxu1  ;;  %v499_v46 = vsel %vm498_vm2, %v491_v43, -inf }
 0x362   :  { %500 = vmax.xlane.f32.xlu0 %v499_v46  ;;  %v494_v48 = vpop.f32.mrb[6].mxu1 }
 0x363   :  { %v4154_v49 = vpop.f32.mrb[7].mxu1  ;;  %v502_v50 = vsel %vm498_vm2, %v494_v48, -inf }
 0x364   :  { %503 = vmax.xlane.f32.xlu1 %v502_v50  ;;  %v968_v50 = vsel %vm450_vm1, %v5237_v40, 0 }
 0x3ef   :  { %v501_v51 = vpop.xlane.xlu0 %500 }
 0x3f0   :  { %v505_v52 = vsub.f32 %v491_v43, %v501_v51 }
 0x3f1   :  { %v504_v54 = vpop.xlane.xlu1 %503 }
 0x3f2   :  { %v507_v55 = vmul.f32 1.442695, %v505_v52  ;;  %v506_v56 = vsub.f32 %v494_v48, %v504_v54 }
 0x3f4   :  { %4679 = vpow2.f32 %v507_v55  ;;  %v509_v57 = vmul.f32 1.442695, %v506_v56 }
 0x3f6   :  { %4681 = vpow2.f32 %v509_v57 }
 0x3fe   :  { %v4680_v58 = vpop.eup %4679 }
 0x3ff   :  { %v511_v59 = vsel %vm498_vm2, %v4680_v58, 0.0 }
 0x400   :  { %v4682_v60 = vpop.eup %4681  ;;  %512 = vadd.xlane.f32.xlu0 %v511_v59 }
 0x401   :  { %v514_v61 = vsel %vm498_vm2, %v4682_v60, 0.0 }
 0x402   :  { %515 = vadd.xlane.f32.xlu1 %v514_v61 }
 0x413   :  { %567 = vrot.lane.b32.xlu1 %v5226_v26, %s5040_s5 }
 0x416   :  { %570 = vrot.lane.b32.xlu0 %v5224_v25, %s5040_s5 }
 0x48d   :  { %v513_v62 = vpop.xlane.xlu0 %512 }
 0x48e   :  { %4683 = vrcp.f32 %v513_v62 }
 0x48f   :  { %v516_v63 = vpop.xlane.xlu1 %515 }
 0x490   :  { %4685 = vrcp.f32 %v516_v63 }
 0x491   :  { %v571_v5 = vpop.permute.xlu0 %570 }
 0x492   :  { %v576_v7 = vsel %vm450_vm1, %v571_v5, 0 }
 0x493   :  { %v568_v8 = vpop.permute.xlu1 %567 }
 0x498   :  { %v4684_v0 = vpop.eup %4683 }
 0x499   :  { %v518_v2 = vmul.f32 %v4684_v0, %v4680_v58 }
 0x49a   :  { %v4686_v1 = vpop.eup %4685 }
 0x49b   :  { %v520_v4 = vmul.f32 %v4686_v1, %v4682_v60 }
 0x49d   :  { %v521_v6 = vpack.c.bf16 %v520_v4, %v518_v2 }
 0x49f   :  { %4158 = vmatmul.mubr.msk.bf16.vlgmr.msra.gmra.mrb[8].mxu1 %vm498_vm2, %v521_v6 }
 0x4a0   :  { %4162 = vmatpush3.bf16.xpose.msra.mxu1 %v576_v7  ;;  %4163 = vmatprep.mubr.msk.bf16.mxu1 %vm5039_vm0, %v5038_v3 }
 0x4a1   :  { %4167 = vmatprep.subr.bf16.mxu1 %v5038_v3 }
 0x4a7   :  { %4164 = vmatmul.mubr.msk.bf16.vlgmr.msra.gmra.mrb[12].mxu1 %vm450_vm1, %v568_v8 }
 0x4a8   :  { %4169 = vmatprep.mubr.msk.bf16.mxu1 %vm5039_vm0, %v5038_v3 }
 0x572   :  { %v5261_v9 = vpop.f32.mrb[8].mxu1 }
 0x573   :  { %v4159_v10 = vpop.f32.mrb[9].mxu1 }
 0x574   :  { %v5263_v11 = vpop.f32.mrb[10].mxu1 }
 0x575   :  { %v4160_v12 = vpop.f32.mrb[11].mxu1 }
 0x57a   :  { %v612_v13 = vpop.f32.mrb[12].mxu1 }
 0x57b   :  { %v4165_v14 = vpop.f32.mrb[13].mxu1  ;;  %v619_v15 = vsel %vm498_vm2, %v612_v13, -inf }
 0x57c   :  { %620 = vmax.xlane.f32.xlu1 %v619_v15  ;;  %v615_v17 = vpop.f32.mrb[14].mxu1 }
 0x57d   :  { %v4166_v18 = vpop.f32.mrb[15].mxu1  ;;  %v622_v19 = vsel %vm498_vm2, %v615_v17, -inf }
 0x57e   :  { %623 = vmax.xlane.f32.xlu0 %v622_v19 }
 0x58d   :  { %692 = vrot.lane.b32.xlu1 %v5224_v25, %s5029_s1 }
 0x609   :  { %v621_v20 = vpop.xlane.xlu1 %620 }
 0x60a   :  { %v625_v21 = vsub.f32 %v612_v13, %v621_v20 }
 0x60b   :  { %v624_v22 = vpop.xlane.xlu0 %623 }
 0x60c   :  { %v627_v16 = vmul.f32 1.442695, %v625_v21  ;;  %v626_v23 = vsub.f32 %v615_v17, %v624_v22 }
 0x60e   :  { %4687 = vpow2.f32 %v627_v16  ;;  %v629_v24 = vmul.f32 1.442695, %v626_v23 }
 0x610   :  { %4689 = vpow2.f32 %v629_v24 }
 0x618   :  { %v4688_v27 = vpop.eup %4687 }
 0x619   :  { %v631_v28 = vsel %vm498_vm2, %v4688_v27, 0.0 }
 0x61a   :  { %v4690_v29 = vpop.eup %4689  ;;  %632 = vadd.xlane.f32.xlu0 %v631_v28 }
 0x61b   :  { %v634_v31 = vsel %vm498_vm2, %v4690_v29, 0.0 }
 0x61c   :  { %635 = vadd.xlane.f32.xlu1 %v634_v31 }
 0x62d   :  { %690 = vrot.lane.b32.xlu1 %v5226_v26, %s5029_s1 }
 0x630   :  { %643 = vrot.lane.b32.xlu0 %v5239_v41, %s5040_s5 }
 0x631   :  { %813 = vrot.lane.b32.xlu1 %v5224_v25, %s5041_s25  ;;  %v693_v25 = vpop.permute.xlu1 %692 }
 0x632   :  { %v698_v45 = vsel %vm450_vm1, %v693_v25, 0 }
 0x634   :  { %811 = vrot.lane.b32.xlu0 %v5226_v26, %s5041_s25 }
 0x635   :  { %1082 = vrot.lane.b32.xlu1 %v5237_v40, %s5040_s5 }
 0x638   :  { %1079 = vrot.lane.b32.xlu0 %v5241_v42, %s5040_s5 }
 0x639   :  { %1204 = vrot.lane.b32.xlu1 %v5237_v40, %s5029_s1 }
 0x63c   :  { %1202 = vrot.lane.b32.xlu0 %v5241_v42, %s5029_s1 }
 0x63d   :  { %1325 = vrot.lane.b32.xlu1 %v5237_v40, %s5041_s25 }
 0x640   :  { %1323 = vrot.lane.b32.xlu0 %v5241_v42, %s5041_s25 }
 0x6a7   :  { %v633_v26 = vpop.xlane.xlu0 %632 }
 0x6a8   :  { %4691 = vrcp.f32 %v633_v26 }
 0x6a9   :  { %v636_v32 = vpop.xlane.xlu1 %635 }
 0x6aa   :  { %4693 = vrcp.f32 %v636_v32 }
 0x6ab   :  { %v644_v33 = vpop.permute.xlu0 %643 }
 0x6ac   :  { %4168 = vmatpush3.bf16.msra.mxu1 %v644_v33 }
 0x6ad   :  { %4173 = vmatprep.subr.bf16.mxu1 %v5038_v3  ;;  %v691_v43 = vpop.permute.xlu1 %690 }
 0x6af   :  { %v812_v49 = vpop.permute.xlu0 %811 }
 0x6b1   :  { %v814_v46 = vpop.permute.xlu1 %813 }
 0x6b2   :  { %v4692_v34 = vpop.eup %4691  ;;  %v819_v48 = vsel %vm450_vm1, %v814_v46, 0 }
 0x6b3   :  { %v638_v36 = vmul.f32 %v4692_v34, %v4688_v27  ;;  %v1080_v40 = vpop.permute.xlu0 %1079 }
 0x6b4   :  { %v4694_v35 = vpop.eup %4693 }
 0x6b5   :  { %v640_v38 = vmul.f32 %v4694_v35, %v4690_v29  ;;  %v1083_v51 = vpop.permute.xlu1 %1082 }
 0x6b6   :  { %v1088_v52 = vsel %vm450_vm1, %v1083_v51, 0 }
 0x6b7   :  { %v641_v39 = vpack.c.bf16 %v640_v38, %v638_v36 }
 0x6b9   :  { %4170 = vmatmul.mubr.msk.bf16.vlgmr.msra.gmra.mrb[16].mxu1 %vm498_vm2, %v641_v39  ;;  %v1205_v54 = vpop.permute.xlu1 %1204 }
 0x6ba   :  { %4174 = vmatpush3.bf16.xpose.msra.mxu1 %v698_v45  ;;  %4175 = vmatprep.mubr.msk.bf16.mxu1 %vm5039_vm0, %v5038_v3  ;;  %v1210_v55 = vsel %vm450_vm1, %v1205_v54, 0 }
 0x6bb   :  { %4185 = vmatprep.subr.bf16.mxu1 %v5038_v3 }
 0x6bd   :  { %v1326_v56 = vpop.permute.xlu1 %1325 }
 0x6be   :  { %v1331_v57 = vsel %vm450_vm1, %v1326_v56, 0 }
 0x6c1   :  { %4176 = vmatmul.mubr.msk.bf16.vlgmr.msra.gmra.mrb[20].mxu1 %vm450_vm1, %v691_v43 }
 0x6c2   :  { %4186 = vmatpush3.bf16.xpose.msra.mxu1 %v819_v48  ;;  %4187 = vmatprep.mubr.msk.bf16.mxu1 %vm5039_vm0, %v5038_v3 }
 0x6c3   :  { %4197 = vmatprep.subr.bf16.mxu1 %v5038_v3 }
 0x6c9   :  { %4188 = vmatmul.mubr.msk.bf16.vlgmr.msra.gmra.mrb[24].mxu1 %vm450_vm1, %v812_v49 }
 0x6ca   :  { %4198 = vmatpush3.bf16.xpose.msra.mxu1 %v968_v50  ;;  %4199 = vmatprep.mubr.msk.bf16.mxu1 %vm5039_vm0, %v5038_v3 }
 0x6cb   :  { %4209 = vmatprep.subr.bf16.mxu1 %v5038_v3 }
 0x6d1   :  { %4200 = vmatmul.mubr.msk.bf16.vlgmr.msra.gmra.mrb[28].mxu1 %vm450_vm1, %v5241_v42  ;;  %v1203_v42 = vpop.permute.xlu0 %1202 }
 0x6d2   :  { %4210 = vmatpush3.bf16.xpose.msra.mxu1 %v1088_v52  ;;  %4211 = vmatprep.mubr.msk.bf16.mxu1 %vm5039_vm0, %v5038_v3 }
 0x6d3   :  { %4221 = vmatprep.subr.bf16.mxu1 %v5038_v3 }
 0x6d5   :  { %v1324_v58 = vpop.permute.xlu0 %1323 }
 0x6d9   :  { %4212 = vmatmul.mubr.msk.bf16.vlgmr.msra.gmra.mrb[32].mxu1 %vm450_vm1, %v1080_v40 }
 0x6da   :  { %4222 = vmatpush3.bf16.xpose.msra.mxu1 %v1210_v55  ;;  %4223 = vmatprep.mubr.msk.bf16.mxu1 %vm5039_vm0, %v5038_v3 }
 0x6db   :  { %4233 = vmatprep.subr.bf16.mxu1 %v5038_v3 }
 0x6e1   :  { %4224 = vmatmul.mubr.msk.bf16.vlgmr.msra.gmra.mrb[36].mxu1 %vm450_vm1, %v1203_v42 }
 0x6e2   :  { %4234 = vmatpush3.bf16.xpose.msra.mxu1 %v1331_v57  ;;  %4235 = vmatprep.mubr.msk.bf16.mxu1 %vm5039_vm0, %v5038_v3 }
 0x6e9   :  { %4236 = vmatmul.mubr.msk.bf16.vlgmr.msra.gmra.mrb[40].mxu1 %vm450_vm1, %v1324_v58 }
 0x78c   :  { %v5324_v59 = vpop.f32.mrb[16].mxu1 }
 0x78d   :  { %v4171_v60 = vpop.f32.mrb[17].mxu1 }
 0x78e   :  { %v5326_v61 = vpop.f32.mrb[18].mxu1 }
 0x78f   :  { %v4499_v62 = vpack.i.bf16 %v5326_v61, %v5324_v59  ;;  %v4172_v63 = vpop.f32.mrb[19].mxu1 }
 0x794   :  { %v734_v0 = vpop.f32.mrb[20].mxu1 }
 0x795   :  { %v4177_v1 = vpop.f32.mrb[21].mxu1  ;;  %v741_v2 = vsel %vm498_vm2, %v734_v0, -inf }
 0x796   :  { %v737_v4 = vpop.f32.mrb[22].mxu1  ;;  %742 = vmax.xlane.f32.xlu1 %v741_v2 }
 0x797   :  { %v4178_v5 = vpop.f32.mrb[23].mxu1  ;;  %v744_v6 = vsel %vm498_vm2, %v737_v4, -inf }
 0x798   :  { %745 = vmax.xlane.f32.xlu0 %v744_v6 }
 0x79c   :  { %v855_v7 = vpop.f32.mrb[24].mxu1 }
 0x79d   :  { %v4189_v8 = vpop.f32.mrb[25].mxu1  ;;  %v862_v10 = vsel %vm498_vm2, %v855_v7, -inf }
 0x79e   :  { %v5333_v12 = vpop.f32.mrb[26].mxu1  ;;  %863 = vmax.xlane.f32.xlu0 %v862_v10 }
 0x79f   :  { %v4190_v13 = vpop.f32.mrb[27].mxu1  ;;  %v865_v14 = vsel %vm498_vm2, %v5333_v12, -inf }
 0x7a2   :  { %866 = vmax.xlane.f32.xlu0 %v865_v14 }
 0x7a4   :  { %v1004_v15 = vpop.f32.mrb[28].mxu1 }
 0x7a5   :  { %v4201_v17 = vpop.f32.mrb[29].mxu1  ;;  %v1011_v18 = vsel %vm498_vm2, %v1004_v15, -inf }
 0x7a6   :  { %1012 = vmax.xlane.f32.xlu1 %v1011_v18  ;;  %v5338_v19 = vpop.f32.mrb[30].mxu1 }
 0x7a7   :  { %v4202_v20 = vpop.f32.mrb[31].mxu1  ;;  %v1014_v21 = vsel %vm498_vm2, %v5338_v19, -inf }
 0x7a8   :  { %1015 = vmax.xlane.f32.xlu0 %v1014_v21 }
 0x7ac   :  { %v1124_v22 = vpop.f32.mrb[32].mxu1 }
 0x7ad   :  { %v4213_v16 = vpop.f32.mrb[33].mxu1  ;;  %v1131_v23 = vsel %vm498_vm2, %v1124_v22, -inf }
 0x7ae   :  { %1132 = vmax.xlane.f32.xlu1 %v1131_v23  ;;  %v5343_v24 = vpop.f32.mrb[34].mxu1 }
 0x7af   :  { %v4214_v27 = vpop.f32.mrb[35].mxu1  ;;  %v1134_v28 = vsel %vm498_vm2, %v5343_v24, -inf }
 0x7b0   :  { %1135 = vmax.xlane.f32.xlu0 %v1134_v28 }
 0x7b4   :  { %v5347_v29 = vpop.f32.mrb[36].mxu1 }
 0x7b5   :  { %v4225_v31 = vpop.f32.mrb[37].mxu1  ;;  %v1253_v25 = vsel %vm498_vm2, %v5347_v29, -inf }
 0x7b6   :  { %1254 = vmax.xlane.f32.xlu1 %v1253_v25  ;;  %v5351_v26 = vpop.f32.mrb[38].mxu1 }
 0x7b7   :  { %v4226_v32 = vpop.f32.mrb[39].mxu1  ;;  %v1256_v33 = vsel %vm498_vm2, %v5351_v26, -inf }
 0x7b8   :  { %1257 = vmax.xlane.f32.xlu0 %v1256_v33 }
 0x7bc   :  { %v5355_v34 = vpop.f32.mrb[40].mxu1 }
 0x7bd   :  { %v4237_v35 = vpop.f32.mrb[41].mxu1  ;;  %v1374_v36 = vsel %vm498_vm2, %v5355_v34, -inf }
 0x7be   :  { %1375 = vmax.xlane.f32.xlu1 %v1374_v36  ;;  %v5359_v38 = vpop.f32.mrb[42].mxu1 }
 0x7bf   :  { %v4238_v39 = vpop.f32.mrb[43].mxu1  ;;  %v1377_v43 = vsel %vm498_vm2, %v5359_v38, -inf }
 0x7c0   :  { %1378 = vmax.xlane.f32.xlu0 %v1377_v43 }
 0x7cf   :  { %764 = vrot.lane.b32.xlu1 %v5239_v41, %s5029_s1 }
 0x823   :  { %v743_v45 = vpop.xlane.xlu1 %742 }
 0x824   :  { %v747_v46 = vsub.f32 %v734_v0, %v743_v45 }
 0x825   :  { %v746_v48 = vpop.xlane.xlu0 %745 }
 0x826   :  { %v749_v49 = vmul.f32 1.442695, %v747_v46  ;;  %v748_v50 = vsub.f32 %v737_v4, %v746_v48 }
 0x828   :  { %4695 = vpow2.f32 %v749_v49  ;;  %v751_v51 = vmul.f32 1.442695, %v748_v50 }
 0x82a   :  { %4697 = vpow2.f32 %v751_v51 }
 0x82b   :  { %v864_v52 = vpop.xlane.xlu0 %863 }
 0x82c   :  { %v868_v54 = vsub.f32 %v855_v7, %v864_v52 }
 0x82e   :  { %v870_v40 = vmul.f32 1.442695, %v868_v54 }
 0x82f   :  { %v867_v17 = vpop.xlane.xlu0 %866 }
 0x830   :  { %4699 = vpow2.f32 %v870_v40  ;;  %v869_v18 = vsub.f32 %v5333_v12, %v867_v17 }
 0x832   :  { %v5365_v55 = vpop.eup %4695  ;;  %v872_v21 = vmul.f32 1.442695, %v869_v18 }
 0x833   :  { %v1013_v56 = vpop.xlane.xlu1 %1012  ;;  %v753_v42 = vsel %vm498_vm2, %v5365_v55, 0.0 }
 0x834   :  { %v5369_v57 = vpop.eup %4697  ;;  %v1017_v58 = vsub.f32 %v1004_v15, %v1013_v56  ;;  %754 = vadd.xlane.f32.xlu1 %v753_v42 }
 0x835   :  { %v756_v60 = vsel %vm498_vm2, %v5369_v57, 0.0  ;;  %v1016_v20 = vpop.xlane.xlu0 %1015 }
 0x836   :  { %v1019_v63 = vmul.f32 1.442695, %v1017_v58  ;;  %757 = vadd.xlane.f32.xlu0 %v756_v60 }
 0x838   :  { %4701 = vpow2.f32 %v1019_v63 }
 0x83a   :  { %v5373_v0 = vpop.eup %4699 }
 0x83b   :  { %v1133_v1 = vpop.xlane.xlu1 %1132  ;;  %v874_v2 = vsel %vm498_vm2, %v5373_v0, 0.0 }
 0x83c   :  { %v1137_v4 = vsub.f32 %v1124_v22, %v1133_v1  ;;  %875 = vadd.xlane.f32.xlu1 %v874_v2  ;;  %v1018_v22 = vsub.f32 %v5338_v19, %v1016_v20 }
 0x83d   :  { %v1136_v16 = vpop.xlane.xlu0 %1135 }
 0x83e   :  { %v1139_v5 = vmul.f32 1.442695, %v1137_v4  ;;  %v1021_v23 = vmul.f32 1.442695, %v1018_v22  ;;  %v1138_v27 = vsub.f32 %v5343_v24, %v1136_v16 }
 0x840   :  { %4703 = vpow2.f32 %v1139_v5 }
 0x841   :  { %4705 = vpow2.f32 %v872_v21 }
 0x842   :  { %v5377_v6 = vpop.eup %4701  ;;  %4707 = vpow2.f32 %v1021_v23 }
 0x843   :  { %v1023_v7 = vsel %vm498_vm2, %v5377_v6, 0.0  ;;  %v1255_v8 = vpop.xlane.xlu1 %1254 }
 0x844   :  { %1024 = vadd.xlane.f32.xlu1 %v1023_v7  ;;  %v1259_v28 = vsub.f32 %v5347_v29, %v1255_v8 }
 0x845   :  { %v1258_v31 = vpop.xlane.xlu0 %1257 }
 0x846   :  { %v1261_v25 = vmul.f32 1.442695, %v1259_v28  ;;  %v1260_v12 = vsub.f32 %v5351_v26, %v1258_v31 }
 0x848   :  { %v1263_v19 = vmul.f32 1.442695, %v1260_v12 }
 0x84a   :  { %v5381_v10 = vpop.eup %4703 }
 0x84b   :  { %v1376_v13 = vpop.xlane.xlu1 %1375  ;;  %v1143_v14 = vsel %vm498_vm2, %v5381_v10, 0.0  ;;  %v4706_v33 = vpop.eup %4705 }
 0x84c   :  { %1144 = vadd.xlane.f32.xlu1 %v1143_v14  ;;  %885 = vrot.lane.b32.xlu0 %v5239_v41, %s5041_s25  ;;  %v1141_v41 = vmul.f32 1.442695, %v1138_v27  ;;  %v877_v24 = vsel %vm498_vm2, %v4706_v33, 0.0  ;;  %v5397_v36 = vpop.eup %4707  ;;  %v1380_v39 = vsub.f32 %v5355_v34, %v1376_v13 }
 0x84d   :  { %v1379_v32 = vpop.xlane.xlu0 %1378  ;;  %v1026_v43 = vsel %vm498_vm2, %v5397_v36, 0.0 }
 0x84e   :  { %4709 = vpow2.f32 %v1141_v41  ;;  %v1381_v35 = vsub.f32 %v5359_v38, %v1379_v32  ;;  %v1382_v26 = vmul.f32 1.442695, %v1380_v39 }
 0x84f   :  { %v765_v15 = vpop.permute.xlu1 %764  ;;  %4711 = vpow2.f32 %v1261_v25 }
 0x850   :  { %4180 = vmatpush3.bf16.msra.mxu0 %v765_v15  ;;  %4713 = vpow2.f32 %v1263_v19  ;;  %v1384_v29 = vmul.f32 1.442695, %v1381_v35 }
 0x851   :  { %4191 = vmatprep.subr.bf16.mxu0 %v5038_v3 }
 0x852   :  { %4715 = vpow2.f32 %v1384_v29 }
 0x853   :  { %4717 = vpow2.f32 %v1382_v26 }
 0x858   :  { %v5402_v45 = vpop.eup %4709 }
 0x859   :  { %v1146_v38 = vsel %vm498_vm2, %v5402_v45, 0.0  ;;  %v5406_v46 = vpop.eup %4711 }
 0x85a   :  { %v1265_v34 = vsel %vm498_vm2, %v5406_v46, 0.0  ;;  %v5410_v48 = vpop.eup %4713 }
 0x85b   :  { %v1268_v49 = vsel %vm498_vm2, %v5410_v48, 0.0 }
 0x85c   :  { %v5414_v50 = vpop.eup %4715 }
 0x85d   :  { %1155 = vrot.lane.b32.xlu1 %v5235_v37, %s5040_s5  ;;  %v5416_v51 = vpop.eup %4717  ;;  %v1389_v52 = vsel %vm498_vm2, %v5414_v50, 0.0 }
 0x85e   :  { %v1386_v54 = vsel %vm498_vm2, %v5416_v51, 0.0 }
 0x86b   :  { %878 = vadd.xlane.f32.xlu0 %v877_v24 }
 0x86f   :  { %1027 = vadd.xlane.f32.xlu0 %v1026_v43 }
 0x873   :  { %1147 = vadd.xlane.f32.xlu0 %v1146_v38 }
 0x877   :  { %1266 = vadd.xlane.f32.xlu0 %v1265_v34 }
 0x87b   :  { %1269 = vadd.xlane.f32.xlu0 %v1268_v49  ;;  %v4592_v49 = vld [vmem:[#allocation8 + $0x8] sm:$0xff]  }
 0x87f   :  { %1390 = vadd.xlane.f32.xlu0 %v1389_v52  ;;  %v4593_v52 = vld [vmem:[#allocation8 + $0x10] sm:$0xff]  }
 0x881   :  { %1387 = vadd.xlane.f32.xlu1 %v1386_v54 }
 0x892   :  { %1397 = vrot.lane.b32.xlu1 %v5235_v37, %s5041_s25 }
 0x895   :  { %1276 = vrot.lane.b32.xlu0 %v5235_v37, %s5029_s1 }
 0x896   :  { %4500 = vrot.lane.b32.xlu1 %v4499_v62, %s5041_s25 }
 0x8c1   :  { %v755_v40 = vpop.xlane.xlu1 %754 }
 0x8c2   :  { %4719 = vrcp.f32 %v755_v40 }
 0x8c3   :  { %v758_v56 = vpop.xlane.xlu0 %757 }
 0x8c4   :  { %4721 = vrcp.f32 %v758_v56 }
 0x8c7   :  { %v886_v2 = vpop.permute.xlu0 %885 }
 0x8c9   :  { %v876_v59 = vpop.xlane.xlu1 %875 }
 0x8ca   :  { %4723 = vrcp.f32 %v876_v59 }
 0x8cc   :  { %v4720_v42 = vpop.eup %4719 }
 0x8cd   :  { %v760_v60 = vmul.f32 %v4720_v42, %v5365_v55 }
 0x8ce   :  { %v4722_v58 = vpop.eup %4721 }
 0x8cf   :  { %v762_v63 = vmul.f32 %v4722_v58, %v5369_v57  ;;  %v4594_v58 = vld [vmem:[#allocation8 + $0x18] sm:$0xff]  }
 0x8d1   :  { %v763_v1 = vpack.c.bf16 %v762_v63, %v760_v60  ;;  %v1025_v62 = vpop.xlane.xlu1 %1024 }
 0x8d3   :  { %4182 = vmatmul.mubr.msk.bf16.vlgmr.msra.gmra.mrb[8].mxu0 %vm498_vm2, %v763_v1  ;;  %v4595_v1 = vld [vmem:[#allocation8 + $0x20] sm:$0xff]  }
 0x8d4   :  { %4192 = vmatpush3.bf16.msra.mxu0 %v886_v2  ;;  %4193 = vmatprep.mubr.msk.bf16.mxu0 %vm5039_vm0, %v5038_v3  ;;  %v4724_v57 = vpop.eup %4723 }
 0x8d5   :  { %4203 = vmatprep.subr.bf16.mxu0 %v5038_v3  ;;  %v881_v7 = vmul.f32 %v4724_v57, %v5373_v0 }
 0x8d9   :  { %v1145_v8 = vpop.xlane.xlu1 %1144 }
 0x8dd   :  { %v1156_v22 = vpop.permute.xlu1 %1155 }
 0x8f8   :  { %v879_v61 = vpop.xlane.xlu0 %878 }
 0x8f9   :  { %4725 = vrcp.f32 %v879_v61  ;;  %v4596_v61 = vld [vmem:[#allocation8 + $0x28] sm:$0xff]  }
 0x8fc   :  { %v1028_v4 = vpop.xlane.xlu0 %1027 }
 0x8fd   :  { %4727 = vrcp.f32 %v1028_v4 }
 0x8fe   :  { %4729 = vrcp.f32 %v1025_v62 }
 0x900   :  { %v1148_v55 = vpop.xlane.xlu0 %1147 }
 0x901   :  { %4731 = vrcp.f32 %v1148_v55  ;;  %v4597_v55 = vld [vmem:[#allocation8 + $0x30] sm:$0xff]  }
 0x902   :  { %4733 = vrcp.f32 %v1145_v8  ;;  %v4598_v8 = vld [vmem:[#allocation8 + $0x38] sm:$0xff]  }
 0x903   :  { %v4726_v5 = vpop.eup %4725 }
 0x904   :  { %v883_v13 = vmul.f32 %v4726_v5, %v4706_v33  ;;  %v1267_v14 = vpop.xlane.xlu0 %1266 }
 0x906   :  { %v884_v15 = vpack.c.bf16 %v883_v13, %v881_v7 }
 0x907   :  { %v4728_v17 = vpop.eup %4727 }
 0x908   :  { %4194 = vmatmul.mubr.msk.bf16.vlgmr.msra.gmra.mrb[12].mxu0 %vm498_vm2, %v884_v15  ;;  %v4730_v18 = vpop.eup %4729  ;;  %v1032_v20 = vmul.f32 %v4728_v17, %v5397_v36  ;;  %v1270_v21 = vpop.xlane.xlu0 %1269 }
 0x909   :  { %4204 = vmatpush3.bf16.msra.mxu0 %v5235_v37  ;;  %4205 = vmatprep.mubr.msk.bf16.mxu0 %vm5039_vm0, %v5038_v3  ;;  %v1030_v0 = vmul.f32 %v4730_v18, %v5377_v6  ;;  %4735 = vrcp.f32 %v1270_v21 }
 0x90a   :  { %4215 = vmatprep.subr.bf16.mxu0 %v5038_v3  ;;  %4737 = vrcp.f32 %v1267_v14 }
 0x90b   :  { %v1033_v16 = vpack.c.bf16 %v1032_v20, %v1030_v0  ;;  %v4732_v23 = vpop.eup %4731 }
 0x90c   :  { %v4734_v27 = vpop.eup %4733  ;;  %v1152_v37 = vmul.f32 %v4732_v23, %v5402_v45  ;;  %v1391_v41 = vpop.xlane.xlu0 %1390 }
 0x90d   :  { %v1150_v6 = vmul.f32 %v4734_v27, %v5381_v10 }
 0x90e   :  { %v1388_v28 = vpop.xlane.xlu1 %1387 }
 0x90f   :  { %4739 = vrcp.f32 %v1388_v28  ;;  %v1153_v31 = vpack.c.bf16 %v1152_v37, %v1150_v6 }
 0x910   :  { %4206 = vmatmul.mubr.msk.bf16.vlgmr.msra.gmra.mrb[16].mxu0 %vm498_vm2, %v1033_v16  ;;  %4741 = vrcp.f32 %v1391_v41  ;;  %v1277_v12 = vpop.permute.xlu0 %1276 }
 0x911   :  { %4216 = vmatpush3.bf16.msra.mxu0 %v1156_v22  ;;  %4217 = vmatprep.mubr.msk.bf16.mxu0 %vm5039_vm0, %v5038_v3 }
 0x912   :  { %4227 = vmatprep.subr.bf16.mxu0 %v5038_v3  ;;  %v1398_v24 = vpop.permute.xlu1 %1397 }
 0x913   :  { %v4736_v25 = vpop.eup %4735 }
 0x914   :  { %v4738_v32 = vpop.eup %4737  ;;  %v1274_v33 = vmul.f32 %v4736_v25, %v5410_v48  ;;  %v4591_v48 = vld [vmem:[#allocation8] sm:$0xff]  }
 0x915   :  { %v1272_v19 = vmul.f32 %v4738_v32, %v5406_v46  ;;  %4245 = vmatprep.subr.bf16.mxu1 %v4591_v48 }
 0x916   :  { %4246 = vmatpush3.bf16.msra.mxu1 %v4591_v48  ;;  %v4501_v16 = vpop.permute.xlu1 %4500 }
 0x917   :  { %v1275_v35 = vpack.c.bf16 %v1274_v33, %v1272_v19  ;;  %4247 = vmatprep.subr.bf16.mxu1 %v4592_v49  ;;  %v4503_v27 = vunpack.i.h.bf16 %v4501_v16  ;;  %v4502_v37 = vunpack.i.l.bf16 %v4501_v16 }
 0x918   :  { %4218 = vmatmul.mubr.msk.bf16.vlgmr.msra.gmra.mrb[20].mxu0 %vm498_vm2, %v1153_v31 }
 0x919   :  { %4228 = vmatpush3.bf16.msra.mxu0 %v1277_v12  ;;  %4229 = vmatprep.mubr.msk.bf16.mxu0 %vm5039_vm0, %v5038_v3  ;;  %v4740_v10 = vpop.eup %4739  ;;  %v957_v31 = vsel %vm450_vm1, %v5263_v11, %v4503_v27  ;;  %v956_v25 = vsel %vm450_vm1, %v5261_v9, %v4502_v37 }
 0x91a   :  { %4239 = vmatprep.subr.bf16.mxu0 %v5038_v3  ;;  %v4742_v36 = vpop.eup %4741  ;;  %v1393_v39 = vmul.f32 %v4740_v10, %v5416_v51  ;;  %4248 = vmatpush3.bf16.msra.mxu1 %v4592_v49 }
 0x91b   :  { %v1395_v29 = vmul.f32 %v4742_v36, %v5414_v50  ;;  %4249 = vmatprep.subr.bf16.mxu1 %v4593_v52 }
 0x91d   :  { %v1396_v43 = vpack.c.bf16 %v1395_v29, %v1393_v39 }
 0x91e   :  { %4250 = vmatpush3.bf16.msra.mxu1 %v4593_v52 }
 0x91f   :  { %4251 = vmatprep.subr.bf16.mxu1 %v4594_v58 }
 0x920   :  { %4230 = vmatmul.mubr.msk.bf16.vlgmr.msra.gmra.mrb[24].mxu0 %vm498_vm2, %v1275_v35 }
 0x921   :  { %4240 = vmatpush3.bf16.msra.mxu0 %v1398_v24  ;;  %4241 = vmatprep.mubr.msk.bf16.mxu0 %vm5039_vm0, %v5038_v3 }
 0x922   :  { %4252 = vmatpush3.bf16.msra.mxu1 %v4594_v58 }
 0x923   :  { %4253 = vmatprep.subr.bf16.mxu1 %v4595_v1 }
 0x926   :  { %4254 = vmatpush3.bf16.msra.mxu1 %v4595_v1 }
 0x927   :  { %4255 = vmatprep.subr.bf16.mxu1 %v4596_v61 }
 0x928   :  { %4242 = vmatmul.mubr.msk.bf16.vlgmr.msra.gmra.mrb[28].mxu0 %vm498_vm2, %v1396_v43 }
 0x92a   :  { %4256 = vmatpush3.bf16.msra.mxu1 %v4596_v61 }
 0x92b   :  { %4257 = vmatprep.subr.bf16.mxu1 %v4597_v55 }
 0x92e   :  { %4258 = vmatpush3.bf16.msra.mxu1 %v4597_v55 }
 0x92f   :  { %4259 = vmatprep.subr.bf16.mxu1 %v4598_v8 }
 0x932   :  { %4260 = vmatpush3.bf16.msra.mxu1 %v4598_v8 }
 0x9a6   :  { %v804_v45 = vpop.f32.mrb[8].mxu0 }
 0x9a7   :  { %v4183_v26 = vpop.f32.mrb[9].mxu0 }
 0x9a8   :  { %v807_v38 = vpop.f32.mrb[10].mxu0 }
 0x9a9   :  { %v4504_v46 = vpack.i.bf16 %v807_v38, %v804_v45  ;;  %v4184_v34 = vpop.f32.mrb[11].mxu0 }
 0x9ab   :  { %4505 = vrot.lane.b32.xlu1 %v4504_v46, %s5029_s1 }
 0x9db   :  { %v925_v54 = vpop.f32.mrb[12].mxu0 }
 0x9dc   :  { %v4195_v51 = vpop.f32.mrb[13].mxu0 }
 0x9dd   :  { %v928_v50 = vpop.f32.mrb[14].mxu0 }
 0x9de   :  { %v4509_v40 = vpack.i.bf16 %v928_v50, %v925_v54  ;;  %v4196_v56 = vpop.f32.mrb[15].mxu0  ;;  %v1595_v50 = vsub.s32 2, %v5204_v44 }
 0x9df   :  { %v5485_v56 = vld [vmem:[#allocation5] sm:$0xff] }
 0x9e0   :  { %4510 = vrot.lane.b32.xlu1 %v4509_v40, %s5040_s5 }
 0x9e3   :  { %v5464_v42 = vpop.f32.mrb[16].mxu0 }
 0x9e4   :  { %v4207_v60 = vpop.f32.mrb[17].mxu0 }
 0x9e5   :  { %v1074_v63 = vpop.f32.mrb[18].mxu0  ;;  %v4856_v60 = vld [vmem:[#allocation2] sm:$0xff] }
 0x9e6   :  { %v4208_v2 = vpop.f32.mrb[19].mxu0 }
 0x9eb   :  { %v1195_v59 = vpop.f32.mrb[20].mxu0 }
 0x9ec   :  { %v4219_v62 = vpop.f32.mrb[21].mxu0 }
 0x9ed   :  { %v1198_v4 = vpop.f32.mrb[22].mxu0 }
 0x9ee   :  { %v4514_v57 = vpack.i.bf16 %v1198_v4, %v1195_v59  ;;  %v4220_v5 = vpop.f32.mrb[23].mxu0  ;;  %v4857_v59 = vld [vmem:[#allocation2 + $0x10] sm:$0xff]  ;;  %v4858_v4 = vld [vmem:[#allocation2 + $0x8] sm:$0xff] }
 0x9f0   :  { %4515 = vrot.lane.b32.xlu1 %v4514_v57, %s5041_s25 }
 0x9f3   :  { %v1316_v7 = vpop.f32.mrb[24].mxu0 }
 0x9f4   :  { %v4231_v13 = vpop.f32.mrb[25].mxu0 }
 0x9f5   :  { %v1319_v14 = vpop.f32.mrb[26].mxu0 }
 0x9f6   :  { %v4519_v15 = vpack.i.bf16 %v1319_v14, %v1316_v7  ;;  %v4232_v17 = vpop.f32.mrb[27].mxu0  ;;  %v4859_v7 = vld [vmem:[#allocation2 + $0x18] sm:$0xff]  ;;  %v4599_v14 = vld [vmem:[#allocation10] sm:$0xff]  }
 0x9f7   :  { %4265 = vmatprep.subr.bf16.mxu0 %v4599_v14 }
 0x9f8   :  { %4520 = vrot.lane.b32.xlu0 %v4519_v15, %s5029_s1  ;;  %4266 = vmatpush3.bf16.msra.mxu0 %v4599_v14 }
 0x9fb   :  { %v1437_v18 = vpop.f32.mrb[28].mxu0 }
 0x9fc   :  { %v4243_v20 = vpop.f32.mrb[29].mxu0 }
 0x9fd   :  { %v1440_v21 = vpop.f32.mrb[30].mxu0 }
 0x9fe   :  { %v4524_v0 = vpack.i.bf16 %v1440_v21, %v1437_v18  ;;  %v4244_v22 = vpop.f32.mrb[31].mxu0 }
 0xa00   :  { %4525 = vrot.lane.b32.xlu1 %v4524_v0, %s5040_s5 }
 0xa1d   :  { %v4506_v23 = vpop.permute.xlu1 %4505 }
 0xa1e   :  { %v4508_v41 = vunpack.i.h.bf16 %v4506_v23  ;;  %v4507_v28 = vunpack.i.l.bf16 %v4506_v23 }
 0xa20   :  { %v960_v33 = vsel %vm958_vm3, %v957_v31, %v4508_v41  ;;  %v959_v19 = vsel %vm958_vm3, %v956_v25, %v4507_v28 }
 0xa52   :  { %v4511_v6 = vpop.permute.xlu1 %4510 }
 0xa53   :  { %v4513_v12 = vunpack.i.h.bf16 %v4511_v6  ;;  %v4512_v32 = vunpack.i.l.bf16 %v4511_v6 }
 0xa55   :  { %v962_v35 = vsel %vm961_vm4, %v959_v19, %v4512_v32  ;;  %v963_v10 = vsel %vm961_vm4, %v960_v33, %v4513_v12  ;;  %v4600_v12 = vld [vmem:[#allocation10 + $0x8] sm:$0xff]   ;;  %v4601_v32 = vld [vmem:[#allocation10 + $0x10] sm:$0xff]   ;;  %v4602_v33 = vld [vmem:[#allocation10 + $0x18] sm:$0xff]  }
 0xa56   :  { %v1474_v24 = vpack.c.bf16 %v963_v10, %v962_v35  ;;  %4267 = vmatprep.subr.bf16.mxu0 %v4600_v12  ;;  %v4603_v19 = vld [vmem:[#allocation10 + $0x20] sm:$0xff]   ;;  %v4604_v35 = vld [vmem:[#allocation10 + $0x28] sm:$0xff]   ;;  %v4605_v10 = vld [vmem:[#allocation10 + $0x30] sm:$0xff]  }
 0xa57   :  { %4268 = vmatpush3.bf16.msra.mxu0 %v4600_v12 }
 0xa58   :  { %4261 = vmatprep.mubr.bf16.mxu1 %v1474_v24  ;;  %4269 = vmatprep.subr.bf16.mxu0 %v4601_v32  ;;  %v4606_v24 = vld [vmem:[#allocation10 + $0x38] sm:$0xff]  }
 0xa5b   :  { %4270 = vmatpush3.bf16.msra.mxu0 %v4601_v32 }
 0xa5c   :  { %4271 = vmatprep.subr.bf16.mxu0 %v4602_v33 }
 0xa5f   :  { %4272 = vmatpush3.bf16.msra.mxu0 %v4602_v33 }
 0xa60   :  { %4273 = vmatprep.subr.bf16.mxu0 %v4603_v19 }
 0xa62   :  { %v4516_v36 = vpop.permute.xlu1 %4515 }
 0xa63   :  { %v4518_v29 = vunpack.i.h.bf16 %v4516_v36  ;;  %v4517_v43 = vunpack.i.l.bf16 %v4516_v36  ;;  %4274 = vmatpush3.bf16.msra.mxu0 %v4603_v19 }
 0xa64   :  { %4275 = vmatprep.subr.bf16.mxu0 %v4604_v35 }
 0xa65   :  { %v1469_v9 = vsel %vm450_vm1, %v1074_v63, %v4518_v29  ;;  %v1468_v38 = vsel %vm450_vm1, %v5464_v42, %v4517_v43  ;;  %v1596_v42 = vrot.slane %v5485_v56, %v1595_v50 }
 0xa67   :  { %4276 = vmatpush3.bf16.msra.mxu0 %v4604_v35 }
 0xa68   :  { %4277 = vmatprep.subr.bf16.mxu0 %v4605_v10 }
 0xa6a   :  { %v4521_v39 = vpop.permute.xlu0 %4520 }
 0xa6b   :  { %v4523_v11 = vunpack.i.h.bf16 %v4521_v39  ;;  %v4522_v45 = vunpack.i.l.bf16 %v4521_v39  ;;  %4278 = vmatpush3.bf16.msra.mxu0 %v4605_v10 }
 0xa6c   :  { %4279 = vmatprep.subr.bf16.mxu0 %v4606_v24 }
 0xa6d   :  { %v1471_v48 = vsel %vm958_vm3, %v1469_v9, %v4523_v11  ;;  %v1470_v49 = vsel %vm958_vm3, %v1468_v38, %v4522_v45 }
 0xa6f   :  { %4280 = vmatpush3.bf16.msra.mxu0 %v4606_v24 }
 0xa72   :  { %v4526_v26 = vpop.permute.xlu1 %4525 }
 0xa73   :  { %v4528_v46 = vunpack.i.h.bf16 %v4526_v26  ;;  %v4527_v34 = vunpack.i.l.bf16 %v4526_v26 }
 0xa75   :  { %v1473_v52 = vsel %vm961_vm4, %v1471_v48, %v4528_v46  ;;  %v1472_v54 = vsel %vm961_vm4, %v1470_v49, %v4527_v34  ;;  %v1647_v48 = vsub.s32 3, %v5204_v44 }
 0xa76   :  { %v1475_v51 = vpack.c.bf16 %v1473_v52, %v1472_v54  ;;  %v1655_v54 = vsub.s32 4, %v5204_v44 }
 0xa77   :  { %v1648_v52 = vrot.slane %v5485_v56, %v1647_v48 }
 0xa78   :  { %4262 = vmatmul.mubr.bf16.vlgmr.msra.gmra.mrb[44].mxu1 %v1475_v51 }
 0xb4b   :  { %v4263_v40 = vpop.f32.mrb[44].mxu1 }
 0xb4c   :  { %v1574_v58 = vpop.f32.mrb[45].mxu1  ;;  %v1591_v61 = vadd.f32 %v4857_v59, %v4263_v40 }
 0xb4d   :  { %v1589_v63 = vadd.f32 %v4856_v60, %v1574_v58  ;;  %v4264_v1 = vpop.f32.mrb[46].mxu1 }
 0xb4e   :  { %v1577_v2 = vpop.f32.mrb[47].mxu1  ;;  %v5495_v5 = vadd.f32 %v1596_v42, %v1591_v61  ;;  %v1592_v8 = vadd.f32 %v4859_v7, %v4264_v1 }
 0xb4f   :  { %v5490_v62 = vadd.f32 %v1596_v42, %v1589_v63  ;;  %v1590_v55 = vadd.f32 %v4858_v4, %v1577_v2  ;;  %v1656_v63 = vrot.slane %v5485_v56, %v1655_v54 }
 0xb50   :  { %v5499_v13 = vadd.f32 %v1596_v42, %v1592_v8 }
 0xb51   :  { %v5492_v57 = vadd.f32 %v1596_v42, %v1590_v55  ;;  %1601 = vadd.xlane.f32.xlu0 %v5490_v62 }
 0xb53   :  { %1603 = vadd.xlane.f32.xlu1 %v5492_v57 }
 0xb55   :  { %1605 = vadd.xlane.f32.xlu0 %v5495_v5 }
 0xb59   :  { %1607 = vadd.xlane.f32.xlu0 %v5499_v13 }
 0xbde   :  { %v1602_v15 = vpop.xlane.xlu0 %1601 }
 0xbdf   :  { %v1609_v17 = vmul.f32 0.0078125, %v1602_v15 }
 0xbe0   :  { %v1604_v18 = vpop.xlane.xlu1 %1603 }
 0xbe1   :  { %v1613_v20 = vsub.f32 %v5490_v62, %v1609_v17  ;;  %v1610_v21 = vmul.f32 0.0078125, %v1604_v18 }
 0xbe2   :  { %v1606_v0 = vpop.xlane.xlu0 %1605 }
 0xbe3   :  { %v1614_v22 = vsub.f32 %v5492_v57, %v1610_v21  ;;  %v1611_v16 = vmul.f32 0.0078125, %v1606_v0  ;;  %v1617_v23 = vmul.f32 %v1613_v20, %v1613_v20  ;;  %v4607_v21 = vld [vmem:[#allocation11] sm:$0xff]   ;;  %v4608_v0 = vld [vmem:[#allocation11 + $0x8] sm:$0xff]  }
 0xbe4   :  { %4285 = vmatprep.subr.bf16.mxu1 %v4607_v21 }
 0xbe5   :  { %v1615_v27 = vsub.f32 %v5495_v5, %v1611_v16  ;;  %1621 = vadd.xlane.f32.xlu0 %v1617_v23  ;;  %v1618_v37 = vmul.f32 %v1614_v22, %v1614_v22  ;;  %4286 = vmatpush3.bf16.msra.mxu1 %v4607_v21  ;;  %v4610_v16 = vld [vmem:[#allocation11 + $0x18] sm:$0xff]   ;;  %v4611_v23 = vld [vmem:[#allocation11 + $0x20] sm:$0xff]  }
 0xbe6   :  { %v1608_v41 = vpop.xlane.xlu0 %1607  ;;  %4287 = vmatprep.subr.bf16.mxu1 %v4608_v0 }
 0xbe7   :  { %v1612_v28 = vmul.f32 0.0078125, %v1608_v41  ;;  %1623 = vadd.xlane.f32.xlu1 %v1618_v37  ;;  %v1619_v6 = vmul.f32 %v1615_v27, %v1615_v27  ;;  %v4613_v37 = vld [vmem:[#allocation11 + $0x30] sm:$0xff]   ;;  %v4614_v41 = vld [vmem:[#allocation11 + $0x38] sm:$0xff]  }
 0xbe9   :  { %v1616_v31 = vsub.f32 %v5499_v13, %v1612_v28  ;;  %1625 = vadd.xlane.f32.xlu0 %v1619_v6  ;;  %4288 = vmatpush3.bf16.msra.mxu1 %v4608_v0  ;;  %v1681_v28 = vsub.s32 5, %v5204_v44 }
 0xbeb   :  { %v1620_v25 = vmul.f32 %v1616_v31, %v1616_v31  ;;  %v1682_v6 = vrot.slane %v5485_v56, %v1681_v28 }
 0xbed   :  { %1627 = vadd.xlane.f32.xlu1 %v1620_v25 }
 0xc72   :  { %v1622_v36 = vpop.xlane.xlu0 %1621 }
 0xc73   :  { %v1629_v39 = vmul.f32 0.0078125, %v1622_v36 }
 0xc74   :  { %v1624_v29 = vpop.xlane.xlu1 %1623 }
 0xc75   :  { %v1633_v43 = vadd.f32 1e-05, %v1629_v39  ;;  %v1630_v11 = vmul.f32 0.0078125, %v1624_v29 }
 0xc76   :  { %v1626_v45 = vpop.xlane.xlu0 %1625 }
 0xc77   :  { %4743 = vrsqrt.f32 %v1633_v43  ;;  %v1634_v26 = vadd.f32 1e-05, %v1630_v11  ;;  %v1631_v9 = vmul.f32 0.0078125, %v1626_v45 }
 0xc79   :  { %4745 = vrsqrt.f32 %v1634_v26  ;;  %v1635_v38 = vadd.f32 1e-05, %v1631_v9 }
 0xc7a   :  { %v1628_v46 = vpop.xlane.xlu1 %1627 }
 0xc7b   :  { %4747 = vrsqrt.f32 %v1635_v38  ;;  %v1632_v34 = vmul.f32 0.0078125, %v1628_v46 }
 0xc7d   :  { %v1636_v49 = vadd.f32 1e-05, %v1632_v34 }
 0xc7f   :  { %4749 = vrsqrt.f32 %v1636_v49 }
 0xc81   :  { %v4744_v51 = vpop.eup %4743 }
 0xc82   :  { %v1641_v40 = vmul.f32 %v4744_v51, %v1613_v20 }
 0xc83   :  { %v4746_v42 = vpop.eup %4745 }
 0xc84   :  { %v1642_v58 = vmul.f32 %v4746_v42, %v1614_v22  ;;  %v1649_v60 = vmul.f32 %v1648_v52, %v1641_v40  ;;  %v4609_v22 = vld [vmem:[#allocation11 + $0x10] sm:$0xff]  }
 0xc85   :  { %v4748_v1 = vpop.eup %4747  ;;  %4289 = vmatprep.subr.bf16.mxu1 %v4609_v22 }
 0xc86   :  { %v1643_v2 = vmul.f32 %v4748_v1, %v1615_v27  ;;  %v1650_v59 = vmul.f32 %v1648_v52, %v1642_v58  ;;  %v1657_v61 = vadd.f32 %v1656_v63, %v1649_v60  ;;  %4290 = vmatpush3.bf16.msra.mxu1 %v4609_v22  ;;  %v4612_v27 = vld [vmem:[#allocation11 + $0x28] sm:$0xff]  }
 0xc87   :  { %4291 = vmatprep.subr.bf16.mxu1 %v4610_v16 }
 0xc88   :  { %v1658_v4 = vadd.f32 %v1656_v63, %v1650_v59  ;;  %v1651_v14 = vmul.f32 %v1648_v52, %v1643_v2 }
 0xc89   :  { %v4750_v55 = vpop.eup %4749 }
 0xc8a   :  { %v1644_v7 = vmul.f32 %v4750_v55, %v1616_v31  ;;  %v1661_v8 = vpack.c.bf16 %v1658_v4, %v1657_v61  ;;  %v1659_v17 = vadd.f32 %v1656_v63, %v1651_v14  ;;  %4292 = vmatpush3.bf16.msra.mxu1 %v4610_v16 }
 0xc8b   :  { %4293 = vmatprep.subr.bf16.mxu1 %v4611_v23 }
 0xc8c   :  { %4281 = vmatprep.mubr.bf16.mxu0 %v1661_v8  ;;  %v1652_v15 = vmul.f32 %v1648_v52, %v1644_v7 }
 0xc8e   :  { %v1660_v18 = vadd.f32 %v1656_v63, %v1652_v15  ;;  %4294 = vmatpush3.bf16.msra.mxu1 %v4611_v23 }
 0xc8f   :  { %4295 = vmatprep.subr.bf16.mxu1 %v4612_v27 }
 0xc90   :  { %v1662_v20 = vpack.c.bf16 %v1660_v18, %v1659_v17 }
 0xc92   :  { %4282 = vmatmul.mubr.bf16.vlgmr.msra.gmra.mrb[32].mxu0 %v1662_v20  ;;  %4296 = vmatpush3.bf16.msra.mxu1 %v4612_v27  ;;  %v1937_v27 = vsub.s32 6, %v5204_v44 }
 0xc93   :  { %2200 = vmatprep.mubr.bf16.mxu0 %v5037_v30  ;;  %4297 = vmatprep.subr.bf16.mxu1 %v4613_v37 }
 0xc96   :  { %4298 = vmatpush3.bf16.msra.mxu1 %v4613_v37  ;;  %v1938_v37 = vrot.slane %v5485_v56, %v1937_v27  ;;  %v4615_v56 = vld [vmem:[#allocation7 + $0xc0] ss:$12 sps:$4 sm:$0xff]  }
 0xc97   :  { %4299 = vmatprep.subr.bf16.mxu1 %v4614_v41 }
 0xc9a   :  { %4300 = vmatpush3.bf16.msra.mxu1 %v4614_v41 }
 0xd65   :  { %v4283_v31 = vpop.f32.mrb[32].mxu0 }
 0xd66   :  { %v1774_v25 = vadd.f32 %v4283_v31, %v1682_v6  ;;  %v1765_v12 = vpop.f32.mrb[33].mxu0 }
 0xd67   :  { %v1766_v32 = vadd.f32 %v1765_v12, %v1682_v6  ;;  %v4284_v33 = vpop.f32.mrb[34].mxu0 }
 0xd68   :  { %v1786_v19 = vmul.f32 0.044715, %v1774_v25  ;;  %v1777_v35 = vadd.f32 %v4284_v33, %v1682_v6  ;;  %v1768_v10 = vpop.f32.mrb[35].mxu0  ;;  %v1782_v7 = vmul.f32 0.5, %v1774_v25 }
 0xd69   :  { %v1784_v24 = vmul.f32 0.044715, %v1766_v32  ;;  %v1769_v36 = vadd.f32 %v1768_v10, %v1682_v6  ;;  %v1780_v15 = vmul.f32 0.5, %v1766_v32 }
 0xd6a   :  { %v1790_v39 = vmul.f32 %v1786_v19, %v1774_v25  ;;  %v1787_v29 = vmul.f32 0.044715, %v1777_v35  ;;  %v1783_v8 = vmul.f32 0.5, %v1777_v35 }
 0xd6b   :  { %v1788_v43 = vmul.f32 %v1784_v24, %v1766_v32  ;;  %v1785_v11 = vmul.f32 0.044715, %v1769_v36  ;;  %v1781_v17 = vmul.f32 0.5, %v1769_v36 }
 0xd6c   :  { %v1794_v45 = vmul.f32 %v1790_v39, %v1774_v25  ;;  %v1791_v26 = vmul.f32 %v1787_v29, %v1777_v35  ;;  %v4618_v39 = vld [vmem:[#allocation7 + $0xd8] ss:$12 sps:$4 sm:$0xff]  }
 0xd6d   :  { %v1792_v9 = vmul.f32 %v1788_v43, %v1766_v32  ;;  %v1789_v38 = vmul.f32 %v1785_v11, %v1769_v36 }
 0xd6e   :  { %v1798_v46 = vadd.f32 %v1794_v45, %v1774_v25  ;;  %v1795_v34 = vmul.f32 %v1791_v26, %v1777_v35 }
 0xd6f   :  { %v1793_v49 = vmul.f32 %v1789_v38, %v1769_v36  ;;  %v1796_v52 = vadd.f32 %v1792_v9, %v1766_v32  ;;  %v4623_v38 = vld [vmem:[#allocation7 + $0xf4] ss:$12 sps:$4 sm:$0xff]  }
 0xd70   :  { %v1802_v51 = vmul.f32 0.7978846, %v1798_v46  ;;  %v1799_v40 = vadd.f32 %v1795_v34, %v1777_v35  ;;  %v4621_v46 = vld [vmem:[#allocation7 + $0xf0] ss:$12 sps:$4 sm:$0xff]   ;;  %v4626_v34 = vld [vmem:[#allocation7 + $0x10c] ss:$12 sps:$4 sm:$0xff]  }
 0xd71   :  { %v1797_v42 = vadd.f32 %v1793_v49, %v1769_v36  ;;  %v1800_v58 = vmul.f32 0.7978846, %v1796_v52  ;;  %v4624_v49 = vld [vmem:[#allocation7 + $0x108] ss:$12 sps:$4 sm:$0xff]   ;;  %v4629_v52 = vld [vmem:[#allocation7 + $0x124] ss:$12 sps:$4 sm:$0xff]  }
 0xd72   :  { %4751 = vtanh.f32 %v1802_v51  ;;  %v1803_v60 = vmul.f32 0.7978846, %v1799_v40  ;;  %v4627_v51 = vld [vmem:[#allocation7 + $0x120] ss:$12 sps:$4 sm:$0xff]   ;;  %v4632_v40 = vld [vmem:[#allocation7 + $0x13c] ss:$12 sps:$4 sm:$0xff]  }
 0xd73   :  { %v1801_v63 = vmul.f32 0.7978846, %v1797_v42  ;;  %4753 = vtanh.f32 %v1800_v58  ;;  %v4630_v42 = vld [vmem:[#allocation7 + $0x138] ss:$12 sps:$4 sm:$0xff]   ;;  %v4635_v58 = vld [vmem:[#allocation7 + $0x154] ss:$12 sps:$4 sm:$0xff]  }
 0xd74   :  { %4755 = vtanh.f32 %v1803_v60  ;;  %v4633_v60 = vld [vmem:[#allocation7 + $0x150] ss:$12 sps:$4 sm:$0xff]  }
 0xd75   :  { %4757 = vtanh.f32 %v1801_v63  ;;  %v4638_v63 = vld [vmem:[#allocation7 + $0x16c] ss:$12 sps:$4 sm:$0xff]  }
 0xd7c   :  { %v4752_v1 = vpop.eup %4751 }
 0xd7d   :  { %v4754_v2 = vpop.eup %4753  ;;  %v1810_v59 = vadd.f32 1.0, %v4752_v1  ;;  %v4636_v1 = vld [vmem:[#allocation7 + $0x168] ss:$12 sps:$4 sm:$0xff]  }
 0xd7e   :  { %v4756_v61 = vpop.eup %4755  ;;  %v1808_v4 = vadd.f32 1.0, %v4754_v2  ;;  %v4639_v2 = vld [vmem:[#allocation7 + $0xc8] ss:$12 sps:$4 sm:$0xff]  }
 0xd7f   :  { %v4758_v55 = vpop.eup %4757  ;;  %v1811_v14 = vadd.f32 1.0, %v4756_v61  ;;  %v1814_v20 = vmul.f32 %v1810_v59, %v1782_v7  ;;  %v4640_v59 = vld [vmem:[#allocation7 + $0xe0] ss:$12 sps:$4 sm:$0xff]   ;;  %4305 = vmatprep.subr.bf16.mxu1 %v4639_v2 }
 0xd80   :  { %v1809_v18 = vadd.f32 1.0, %v4758_v55  ;;  %v1812_v0 = vmul.f32 %v1808_v4, %v1780_v15 }
 0xd81   :  { %v1815_v21 = vmul.f32 %v1811_v14, %v1783_v8 }
 0xd82   :  { %v1813_v22 = vmul.f32 %v1809_v18, %v1781_v17 }
 0xd83   :  { %v1817_v16 = vpack.c.bf16 %v1815_v21, %v1814_v20 }
 0xd84   :  { %v1816_v23 = vpack.c.bf16 %v1813_v22, %v1812_v0 }
 0xd86   :  { %4301 = vmatprep.mubr.bf16.mxu1 %v1816_v23  ;;  %v1944_v23 = vld [vmem:[#allocation5 + $0x8] sm:$0xff] }
 0xd87   :  { %4302 = vmatmul.mubr.bf16.vlgmr.msra.gmra.mrb[48].mxu1 %v1817_v16 }
 0xd88   :  { %4306 = vmatpush3.bf16.msra.mxu1 %v4639_v2 }
 0xd89   :  { %4307 = vmatprep.subr.bf16.mxu1 %v4640_v59 }
 0xd8c   :  { %4308 = vmatpush3.bf16.msra.mxu1 %v4640_v59 }
 0xe5a   :  { %v4303_v41 = vpop.f32.mrb[48].mxu1 }
 0xe5b   :  { %v1933_v6 = vadd.f32 %v4303_v41, %v5495_v5  ;;  %v1916_v31 = vpop.f32.mrb[49].mxu1  ;;  %v4620_v5 = vld [vmem:[#allocation7 + $0xdc] ss:$12 sps:$4 sm:$0xff]  }
 0xe5c   :  { %v1931_v25 = vadd.f32 %v1916_v31, %v5490_v62  ;;  %v4304_v12 = vpop.f32.mrb[50].mxu1  ;;  %v4617_v62 = vld [vmem:[#allocation7 + $0xc4] ss:$12 sps:$4 sm:$0xff]  }
 0xe5d   :  { %v5525_v32 = vadd.f32 %v1938_v37, %v1933_v6  ;;  %v1934_v33 = vadd.f32 %v4304_v12, %v5499_v13  ;;  %v1919_v19 = vpop.f32.mrb[51].mxu1  ;;  %2168 = vmatprep.subr.bf16.mxu0 %v4617_v62 }
 0xe5e   :  { %v5528_v35 = vadd.f32 %v1938_v37, %v1931_v25  ;;  %v1932_v10 = vadd.f32 %v1919_v19, %v5492_v57  ;;  %2169 = vmatpush1.bf16.msra.mxu0 %v4615_v56 }
 0xe5f   :  { %v5531_v24 = vadd.f32 %v1938_v37, %v1934_v33  ;;  %2170 = vmatprep.subr.bf16.mxu0 %v4620_v5  ;;  %v2000_v33 = vrot.slane %v1944_v23, %v5212_v53  ;;  %v4641_v5 = vld [vmem:[#allocation7 + $0xf8] ss:$12 sps:$4 sm:$0xff]  }
 0xe60   :  { %v5533_v36 = vadd.f32 %v1938_v37, %v1932_v10  ;;  %1945 = vadd.xlane.f32.xlu0 %v5528_v35  ;;  %v1992_v37 = vrot.slane %v1944_v23, %v5207_v47  ;;  %4309 = vmatprep.subr.bf16.mxu1 %v4641_v5 }
 0xe61   :  { %4310 = vmatpush3.bf16.msra.mxu1 %v4641_v5 }
 0xe62   :  { %1947 = vadd.xlane.f32.xlu1 %v5533_v36  ;;  %2171 = vmatpush1.bf16.msra.mxu0 %v4618_v39  ;;  %v4642_v39 = vld [vmem:[#allocation7 + $0x110] ss:$12 sps:$4 sm:$0xff]  }
 0xe63   :  { %2172 = vmatprep.subr.bf16.mxu0 %v4623_v38  ;;  %4311 = vmatprep.subr.bf16.mxu1 %v4642_v39 }
 0xe65   :  { %4312 = vmatpush3.bf16.msra.mxu1 %v4642_v39 }
 0xe66   :  { %2173 = vmatpush1.bf16.msra.mxu0 %v4621_v46 }
 0xe67   :  { %2174 = vmatprep.subr.bf16.mxu0 %v4626_v34 }
 0xe6a   :  { %2175 = vmatpush1.bf16.msra.mxu0 %v4624_v49 }
 0xe6b   :  { %2176 = vmatprep.subr.bf16.mxu0 %v4629_v52 }
 0xe6e   :  { %2177 = vmatpush1.bf16.msra.mxu0 %v4627_v51 }
 0xe6f   :  { %2178 = vmatprep.subr.bf16.mxu0 %v4632_v40 }
 0xe72   :  { %2179 = vmatpush1.bf16.msra.mxu0 %v4630_v42 }
 0xe73   :  { %2180 = vmatprep.subr.bf16.mxu0 %v4635_v58 }
 0xe76   :  { %2181 = vmatpush1.bf16.msra.mxu0 %v4633_v60 }
 0xe77   :  { %2182 = vmatprep.subr.bf16.mxu0 %v4638_v63 }
 0xe7a   :  { %2183 = vmatpush1.bf16.msra.mxu0 %v4636_v1 }
 0xe7b   :  { %4325 = vmatprep.subr.bf16.mxu0 %v5038_v3 }
 0xeed   :  { %v1946_v13 = vpop.xlane.xlu0 %1945 }
 0xeee   :  { %v1953_v29 = vmul.f32 0.0078125, %v1946_v13  ;;  %v4643_v13 = vld [vmem:[#allocation7 + $0x128] ss:$12 sps:$4 sm:$0xff]  }
 0xeef   :  { %v1948_v43 = vpop.xlane.xlu1 %1947  ;;  %4313 = vmatprep.subr.bf16.mxu1 %v4643_v13 }
 0xef0   :  { %v1957_v57 = vsub.f32 %v5528_v35, %v1953_v29  ;;  %v1954_v11 = vmul.f32 0.0078125, %v1948_v43  ;;  %v4644_v29 = vld [vmem:[#allocation7 + $0x140] ss:$12 sps:$4 sm:$0xff]   ;;  %4314 = vmatpush3.bf16.msra.mxu1 %v4643_v13  ;;  %v4645_v43 = vld [vmem:[#allocation7 + $0x158] ss:$12 sps:$4 sm:$0xff]  }
 0xef1   :  { %4315 = vmatprep.subr.bf16.mxu1 %v4644_v29 }
 0xef2   :  { %v1958_v45 = vsub.f32 %v5533_v36, %v1954_v11  ;;  %v1961_v26 = vmul.f32 %v1957_v57, %v1957_v57 }
 0xef4   :  { %1965 = vadd.xlane.f32.xlu0 %v1961_v26  ;;  %v1962_v9 = vmul.f32 %v1958_v45, %v1958_v45  ;;  %4316 = vmatpush3.bf16.msra.mxu1 %v4644_v29 }
 0xef5   :  { %4317 = vmatprep.subr.bf16.mxu1 %v4645_v43 }
 0xef6   :  { %1967 = vadd.xlane.f32.xlu1 %v1962_v9 }
 0xef8   :  { %1949 = vadd.xlane.f32.xlu0 %v5525_v32  ;;  %4318 = vmatpush3.bf16.msra.mxu1 %v4645_v43 }
 0xefa   :  { %1951 = vadd.xlane.f32.xlu1 %v5531_v24 }
 0xf81   :  { %v1966_v61 = vpop.xlane.xlu0 %1965 }
 0xf82   :  { %v1973_v4 = vmul.f32 0.0078125, %v1966_v61 }
 0xf83   :  { %v1968_v55 = vpop.xlane.xlu1 %1967 }
 0xf84   :  { %v1977_v7 = vadd.f32 1e-05, %v1973_v4  ;;  %v1974_v8 = vmul.f32 0.0078125, %v1968_v55 }
 0xf85   :  { %v1950_v14 = vpop.xlane.xlu0 %1949 }
 0xf86   :  { %4759 = vrsqrt.f32 %v1977_v7  ;;  %v1978_v15 = vadd.f32 1e-05, %v1974_v8  ;;  %v1955_v17 = vmul.f32 0.0078125, %v1950_v14 }
 0xf87   :  { %v1952_v18 = vpop.xlane.xlu1 %1951 }
 0xf88   :  { %4761 = vrsqrt.f32 %v1978_v15  ;;  %v1959_v20 = vsub.f32 %v5525_v32, %v1955_v17  ;;  %v1956_v21 = vmul.f32 0.0078125, %v1952_v18 }
 0xf8a   :  { %v1960_v0 = vsub.f32 %v5531_v24, %v1956_v21  ;;  %v1963_v22 = vmul.f32 %v1959_v20, %v1959_v20 }
 0xf8c   :  { %1969 = vadd.xlane.f32.xlu0 %v1963_v22  ;;  %v1964_v16 = vmul.f32 %v1960_v0, %v1960_v0 }
 0xf8e   :  { %1971 = vadd.xlane.f32.xlu1 %v1964_v16 }
 0xf90   :  { %v4760_v41 = vpop.eup %4759 }
 0xf91   :  { %v1985_v6 = vmul.f32 %v4760_v41, %v1957_v57  ;;  %v4646_v57 = vld [vmem:[#allocation7 + $0x170] ss:$12 sps:$4 sm:$0xff]  }
 0xf92   :  { %v4762_v31 = vpop.eup %4761  ;;  %4319 = vmatprep.subr.bf16.mxu1 %v4646_v57 }
 0xf93   :  { %v1986_v25 = vmul.f32 %v4762_v31, %v1958_v45  ;;  %v1993_v12 = vmul.f32 %v1992_v37, %v1985_v6  ;;  %4320 = vmatpush3.bf16.msra.mxu1 %v4646_v57 }
 0xf94   :  { %4343 = vmatprep.subr.bf16.mxu1 %v5038_v3 }
 0xf95   :  { %v1994_v19 = vmul.f32 %v1992_v37, %v1986_v25  ;;  %v2001_v10 = vadd.f32 %v2000_v33, %v1993_v12 }
 0xf97   :  { %v2002_v56 = vadd.f32 %v2000_v33, %v1994_v19 }
 0xf99   :  { %v2005_v62 = vpack.c.bf16 %v2002_v56, %v2001_v10 }
 0xf9b   :  { %2201 = vmatmul.mubr.bf16.vlgmr.msra.gmra.mrb[36].mxu0 %v2005_v62  ;;  %4321 = vmatprep.mubr.bf16.mxu1 %v2005_v62 }
 0xf9c   :  { %2210 = vmatprep.mubr.bf16.mxu0 %v5037_v30 }
0x1019   :  { %v1970_v11 = vpop.xlane.xlu0 %1969 }
0x101a   :  { %v1975_v30 = vmul.f32 0.0078125, %v1970_v11 }
0x101b   :  { %v1972_v45 = vpop.xlane.xlu1 %1971 }
0x101c   :  { %v1979_v26 = vadd.f32 1e-05, %v1975_v30  ;;  %v1976_v9 = vmul.f32 0.0078125, %v1972_v45 }
0x101e   :  { %4763 = vrsqrt.f32 %v1979_v26  ;;  %v1980_v38 = vadd.f32 1e-05, %v1976_v9 }
0x1020   :  { %4765 = vrsqrt.f32 %v1980_v38 }
0x1028   :  { %v4764_v46 = vpop.eup %4763 }
0x1029   :  { %v1987_v34 = vmul.f32 %v4764_v46, %v1959_v20 }
0x102a   :  { %v4766_v49 = vpop.eup %4765 }
0x102b   :  { %v1988_v52 = vmul.f32 %v4766_v49, %v1960_v0  ;;  %v1995_v51 = vmul.f32 %v1992_v37, %v1987_v34 }
0x102d   :  { %v1996_v40 = vmul.f32 %v1992_v37, %v1988_v52  ;;  %v2003_v42 = vadd.f32 %v2000_v33, %v1995_v51 }
0x102f   :  { %v2004_v58 = vadd.f32 %v2000_v33, %v1996_v40 }
0x1031   :  { %v2006_v60 = vpack.c.bf16 %v2004_v58, %v2003_v42 }
0x1033   :  { %2211 = vmatmul.mubr.bf16.gmra.mrb[40].mxu0 %v2006_v60  ;;  %4322 = vmatmul.mubr.bf16.vlgmr.msra.gmra.mrb[52].mxu1 %v2006_v60 }
0x1034   :  { %4327 = vmatprep.mubr.msk.bf16.mxu0 %vm5039_vm0, %v5038_v3  ;;  %4345 = vmatprep.mubr.msk.bf16.mxu1 %vm5039_vm0, %v5038_v3 }
0x106e   :  { %v2202_v63 = vpop.f32.mrb[36].mxu0 }
0x106f   :  { %v2204_v1 = vpop.f32.mrb[37].mxu0  ;;  %v2270_v59 = vmul.f32 0.17677669, %v2202_v63 }
0x1070   :  { %v2206_v2 = vpop.f32.mrb[38].mxu0 }
0x1071   :  { %v2271_v61 = vmul.f32 0.17677669, %v2206_v2  ;;  %v2208_v4 = vpop.f32.mrb[39].mxu0 }
0x1072   :  { %v2276_v55 = vpack.c.bf16 %v2208_v4, %v2204_v1 }
0x1073   :  { %v2274_v7 = vpack.c.bf16 %v2271_v61, %v2270_v59 }
0x1074   :  { %v2284_v8 = vsel %vm450_vm1, %v2276_v55, 0 }
0x1075   :  { %4326 = vmatpush3.bf16.xpose.msra.mxu0 %v2284_v8 }
0x1076   :  { %4331 = vmatprep.subr.bf16.mxu0 %v5038_v3 }
0x107c   :  { %4328 = vmatmul.mubr.msk.bf16.vlgmr.msra.gmra.mrb[44].mxu0 %vm450_vm1, %v2274_v7 }
0x107d   :  { %4333 = vmatprep.mubr.msk.bf16.mxu0 %vm5039_vm0, %v5038_v3 }
0x1106   :  { %v2212_v14 = vpop.f32.mrb[40].mxu0  ;;  %v4323_v15 = vpop.f32.mrb[52].mxu1 }
0x1107   :  { %v2214_v17 = vpop.f32.mrb[41].mxu0  ;;  %v2255_v18 = vpop.f32.mrb[53].mxu1  ;;  %v2272_v0 = vmul.f32 0.17677669, %v2212_v14 }
0x1108   :  { %v2216_v20 = vpop.f32.mrb[42].mxu0  ;;  %v4324_v21 = vpop.f32.mrb[54].mxu1 }
0x1109   :  { %v2273_v22 = vmul.f32 0.17677669, %v2216_v20  ;;  %v5557_v16 = vpack.c.bf16 %v4324_v21, %v4323_v15  ;;  %v2218_v23 = vpop.f32.mrb[43].mxu0  ;;  %v2258_v37 = vpop.f32.mrb[55].mxu1 }
0x110a   :  { %v5559_v41 = vpack.c.bf16 %v2218_v23, %v2214_v17  ;;  %v5561_v6 = vpack.c.bf16 %v2258_v37, %v2255_v18 }
0x110b   :  { %v5563_v31 = vpack.c.bf16 %v2273_v22, %v2272_v0 }
0x110c   :  { %4332 = vmatpush3.bf16.msra.mxu0 %v5561_v6  ;;  %v2794_v61 = vsel %vm450_vm1, %v5559_v41, 0 }
0x110d   :  { %4337 = vmatprep.subr.bf16.mxu0 %v5038_v3 }
0x114f   :  { %v2320_v25 = vpop.f32.mrb[44].mxu0 }
0x1150   :  { %v4329_v12 = vpop.f32.mrb[45].mxu0  ;;  %v2327_v33 = vsel %vm498_vm2, %v2320_v25, -inf }
0x1151   :  { %2328 = vmax.xlane.f32.xlu0 %v2327_v33  ;;  %v2323_v19 = vpop.f32.mrb[46].mxu0 }
0x1152   :  { %v4330_v10 = vpop.f32.mrb[47].mxu0  ;;  %v2330_v56 = vsel %vm498_vm2, %v2323_v19, -inf }
0x1153   :  { %2331 = vmax.xlane.f32.xlu1 %v2330_v56 }
0x11de   :  { %v2329_v62 = vpop.xlane.xlu0 %2328 }
0x11df   :  { %v2333_v5 = vsub.f32 %v2320_v25, %v2329_v62 }
0x11e0   :  { %v2332_v39 = vpop.xlane.xlu1 %2331 }
0x11e1   :  { %v2335_v13 = vmul.f32 1.442695, %v2333_v5  ;;  %v2334_v29 = vsub.f32 %v2323_v19, %v2332_v39 }
0x11e3   :  { %4767 = vpow2.f32 %v2335_v13  ;;  %v2337_v43 = vmul.f32 1.442695, %v2334_v29 }
0x11e5   :  { %4769 = vpow2.f32 %v2337_v43 }
0x11ed   :  { %v4768_v57 = vpop.eup %4767 }
0x11ee   :  { %v2339_v11 = vsel %vm498_vm2, %v4768_v57, 0.0 }
0x11ef   :  { %v4770_v30 = vpop.eup %4769  ;;  %2340 = vadd.xlane.f32.xlu0 %v2339_v11 }
0x11f0   :  { %v2342_v45 = vsel %vm498_vm2, %v4770_v30, 0.0 }
0x11f1   :  { %2343 = vadd.xlane.f32.xlu1 %v2342_v45 }
0x1202   :  { %2395 = vrot.lane.b32.xlu1 %v2274_v7, %s5040_s5 }
0x1205   :  { %2398 = vrot.lane.b32.xlu0 %v2276_v55, %s5040_s5 }
0x1206   :  { %2520 = vrot.lane.b32.xlu1 %v2276_v55, %s5029_s1 }
0x1209   :  { %2641 = vrot.lane.b32.xlu0 %v2276_v55, %s5041_s25 }
0x120a   :  { %2518 = vrot.lane.b32.xlu1 %v2274_v7, %s5029_s1 }
0x120d   :  { %2908 = vrot.lane.b32.xlu0 %v5559_v41, %s5040_s5 }
0x120e   :  { %2639 = vrot.lane.b32.xlu1 %v2274_v7, %s5041_s25 }
0x1211   :  { %3030 = vrot.lane.b32.xlu0 %v5559_v41, %s5029_s1 }
0x1212   :  { %2905 = vrot.lane.b32.xlu1 %v5563_v31, %s5040_s5 }
0x1215   :  { %3151 = vrot.lane.b32.xlu0 %v5559_v41, %s5041_s25 }
0x1216   :  { %3028 = vrot.lane.b32.xlu1 %v5563_v31, %s5029_s1 }
0x121a   :  { %3149 = vrot.lane.b32.xlu1 %v5563_v31, %s5041_s25 }
0x127c   :  { %v2341_v26 = vpop.xlane.xlu0 %2340 }
0x127d   :  { %4771 = vrcp.f32 %v2341_v26 }
0x127e   :  { %v2344_v9 = vpop.xlane.xlu1 %2343 }
0x127f   :  { %4773 = vrcp.f32 %v2344_v9 }
0x1280   :  { %v2399_v52 = vpop.permute.xlu0 %2398 }
0x1281   :  { %v2404_v42 = vsel %vm450_vm1, %v2399_v52, 0 }
0x1282   :  { %v2396_v40 = vpop.permute.xlu1 %2395 }
0x1284   :  { %v2642_v63 = vpop.permute.xlu0 %2641 }
0x1285   :  { %v2647_v2 = vsel %vm450_vm1, %v2642_v63, 0 }
0x1286   :  { %v2521_v58 = vpop.permute.xlu1 %2520 }
0x1287   :  { %v4772_v38 = vpop.eup %4771  ;;  %v2526_v60 = vsel %vm450_vm1, %v2521_v58, 0 }
0x1288   :  { %v2346_v34 = vmul.f32 %v4772_v38, %v4768_v57  ;;  %v2909_v4 = vpop.permute.xlu0 %2908 }
0x1289   :  { %v4774_v46 = vpop.eup %4773  ;;  %v2914_v55 = vsel %vm450_vm1, %v2909_v4, 0 }
0x128a   :  { %v2348_v49 = vmul.f32 %v4774_v46, %v4770_v30  ;;  %v2519_v1 = vpop.permute.xlu1 %2518 }
0x128c   :  { %v2349_v51 = vpack.c.bf16 %v2348_v49, %v2346_v34  ;;  %v3031_v7 = vpop.permute.xlu0 %3030 }
0x128d   :  { %v3036_v14 = vsel %vm450_vm1, %v3031_v7, 0 }
0x128e   :  { %4334 = vmatmul.mubr.msk.bf16.vlgmr.msra.gmra.mrb[48].mxu0 %vm498_vm2, %v2349_v51  ;;  %v2640_v59 = vpop.permute.xlu1 %2639 }
0x128f   :  { %4338 = vmatpush3.bf16.xpose.msra.mxu0 %v2404_v42  ;;  %4339 = vmatprep.mubr.msk.bf16.mxu0 %vm5039_vm0, %v5038_v3 }
0x1290   :  { %4349 = vmatprep.subr.bf16.mxu0 %v5038_v3  ;;  %v3152_v15 = vpop.permute.xlu0 %3151 }
0x1291   :  { %v3157_v18 = vsel %vm450_vm1, %v3152_v15, 0 }
0x1292   :  { %v2906_v8 = vpop.permute.xlu1 %2905 }
0x1296   :  { %4340 = vmatmul.mubr.msk.bf16.vlgmr.msra.gmra.mrb[52].mxu0 %vm450_vm1, %v2396_v40  ;;  %v3029_v17 = vpop.permute.xlu1 %3028 }
0x1297   :  { %4350 = vmatpush3.bf16.xpose.msra.mxu0 %v2526_v60  ;;  %4351 = vmatprep.mubr.msk.bf16.mxu0 %vm5039_vm0, %v5038_v3 }
0x1298   :  { %4361 = vmatprep.subr.bf16.mxu0 %v5038_v3 }
0x129a   :  { %v3150_v20 = vpop.permute.xlu1 %3149 }
0x129e   :  { %4352 = vmatmul.mubr.msk.bf16.vlgmr.msra.gmra.mrb[56].mxu0 %vm450_vm1, %v2519_v1 }
0x129f   :  { %4362 = vmatpush3.bf16.xpose.msra.mxu0 %v2647_v2  ;;  %4363 = vmatprep.mubr.msk.bf16.mxu0 %vm5039_vm0, %v5038_v3 }
0x12a0   :  { %4373 = vmatprep.subr.bf16.mxu0 %v5038_v3 }
0x12a6   :  { %4364 = vmatmul.mubr.msk.bf16.vlgmr.msra.gmra.mrb[60].mxu0 %vm450_vm1, %v2640_v59 }
0x12a7   :  { %4374 = vmatpush3.bf16.xpose.msra.mxu0 %v2794_v61  ;;  %4375 = vmatprep.mubr.msk.bf16.mxu0 %vm5039_vm0, %v5038_v3 }
0x12a8   :  { %4385 = vmatprep.subr.bf16.mxu0 %v5038_v3 }
0x12ae   :  { %4376 = vmatmul.mubr.msk.bf16.vlgmr.msra.gmra.mrb[64].mxu0 %vm450_vm1, %v5563_v31 }
0x12af   :  { %4386 = vmatpush3.bf16.xpose.msra.mxu0 %v2914_v55  ;;  %4387 = vmatprep.mubr.msk.bf16.mxu0 %vm5039_vm0, %v5038_v3 }
0x12b0   :  { %4397 = vmatprep.subr.bf16.mxu0 %v5038_v3 }
0x12b6   :  { %4388 = vmatmul.mubr.msk.bf16.vlgmr.msra.gmra.mrb[68].mxu0 %vm450_vm1, %v2906_v8 }
0x12b7   :  { %4398 = vmatpush3.bf16.xpose.msra.mxu0 %v3036_v14  ;;  %4399 = vmatprep.mubr.msk.bf16.mxu0 %vm5039_vm0, %v5038_v3 }
0x12b8   :  { %4409 = vmatprep.subr.bf16.mxu0 %v5038_v3 }
0x12be   :  { %4400 = vmatmul.mubr.msk.bf16.vlgmr.msra.gmra.mrb[72].mxu0 %vm450_vm1, %v3029_v17 }
0x12bf   :  { %4410 = vmatpush3.bf16.xpose.msra.mxu0 %v3157_v18  ;;  %4411 = vmatprep.mubr.msk.bf16.mxu0 %vm5039_vm0, %v5038_v3 }
0x12c6   :  { %4412 = vmatmul.mubr.msk.bf16.vlgmr.msra.gmra.mrb[76].mxu0 %vm450_vm1, %v3150_v20 }
0x1361   :  { %v5626_v21 = vpop.f32.mrb[48].mxu0 }
0x1362   :  { %v4335_v0 = vpop.f32.mrb[49].mxu0 }
0x1363   :  { %v5628_v22 = vpop.f32.mrb[50].mxu0 }
0x1364   :  { %v4336_v23 = vpop.f32.mrb[51].mxu0 }
0x1369   :  { %v2440_v37 = vpop.f32.mrb[52].mxu0 }
0x136a   :  { %v4341_v41 = vpop.f32.mrb[53].mxu0  ;;  %v2447_v31 = vsel %vm498_vm2, %v2440_v37, -inf }
0x136b   :  { %v2443_v25 = vpop.f32.mrb[54].mxu0  ;;  %2448 = vmax.xlane.f32.xlu0 %v2447_v31 }
0x136c   :  { %v4342_v12 = vpop.f32.mrb[55].mxu0  ;;  %v2450_v33 = vsel %vm498_vm2, %v2443_v25, -inf }
0x136d   :  { %2451 = vmax.xlane.f32.xlu1 %v2450_v33 }
0x1371   :  { %v2562_v19 = vpop.f32.mrb[56].mxu0 }
0x1372   :  { %v4353_v10 = vpop.f32.mrb[57].mxu0  ;;  %v2569_v56 = vsel %vm498_vm2, %v2562_v19, -inf }
0x1373   :  { %v2565_v62 = vpop.f32.mrb[58].mxu0  ;;  %2570 = vmax.xlane.f32.xlu0 %v2569_v56 }
0x1374   :  { %v4354_v5 = vpop.f32.mrb[59].mxu0  ;;  %v2572_v39 = vsel %vm498_vm2, %v2565_v62, -inf }
0x1377   :  { %2573 = vmax.xlane.f32.xlu0 %v2572_v39 }
0x1379   :  { %v5634_v13 = vpop.f32.mrb[60].mxu0 }
0x137a   :  { %v4365_v29 = vpop.f32.mrb[61].mxu0  ;;  %v2690_v43 = vsel %vm498_vm2, %v5634_v13, -inf }
0x137b   :  { %v5638_v57 = vpop.f32.mrb[62].mxu0  ;;  %2691 = vmax.xlane.f32.xlu0 %v2690_v43 }
0x137c   :  { %v4366_v11 = vpop.f32.mrb[63].mxu0  ;;  %v2693_v30 = vsel %vm498_vm2, %v5638_v57, -inf }
0x137d   :  { %2694 = vmax.xlane.f32.xlu1 %v2693_v30 }
0x1381   :  { %v5642_v45 = vpop.f32.mrb[64].mxu0 }
0x1382   :  { %v4377_v26 = vpop.f32.mrb[65].mxu0  ;;  %v2837_v9 = vsel %vm498_vm2, %v5642_v45, -inf }
0x1383   :  { %2838 = vmax.xlane.f32.xlu0 %v2837_v9  ;;  %v5646_v38 = vpop.f32.mrb[66].mxu0 }
0x1384   :  { %v4378_v46 = vpop.f32.mrb[67].mxu0  ;;  %v2840_v34 = vsel %vm498_vm2, %v5646_v38, -inf }
0x1385   :  { %2841 = vmax.xlane.f32.xlu1 %v2840_v34 }
0x1389   :  { %v5650_v49 = vpop.f32.mrb[68].mxu0 }
0x138a   :  { %v4389_v52 = vpop.f32.mrb[69].mxu0  ;;  %v2957_v51 = vsel %vm498_vm2, %v5650_v49, -inf }
0x138b   :  { %2958 = vmax.xlane.f32.xlu0 %v2957_v51  ;;  %v5654_v40 = vpop.f32.mrb[70].mxu0 }
0x138c   :  { %v4390_v42 = vpop.f32.mrb[71].mxu0  ;;  %v2960_v58 = vsel %vm498_vm2, %v5654_v40, -inf }
0x138d   :  { %2961 = vmax.xlane.f32.xlu1 %v2960_v58 }
0x1391   :  { %v5658_v60 = vpop.f32.mrb[72].mxu0 }
0x1392   :  { %v4401_v63 = vpop.f32.mrb[73].mxu0  ;;  %v3079_v1 = vsel %vm498_vm2, %v5658_v60, -inf }
0x1393   :  { %3080 = vmax.xlane.f32.xlu0 %v3079_v1  ;;  %v5662_v2 = vpop.f32.mrb[74].mxu0 }
0x1394   :  { %v4402_v59 = vpop.f32.mrb[75].mxu0  ;;  %v3082_v61 = vsel %vm498_vm2, %v5662_v2, -inf }
0x1395   :  { %3083 = vmax.xlane.f32.xlu1 %v3082_v61 }
0x1399   :  { %v5666_v4 = vpop.f32.mrb[76].mxu0 }
0x139a   :  { %v4413_v55 = vpop.f32.mrb[77].mxu0  ;;  %v3200_v7 = vsel %vm498_vm2, %v5666_v4, -inf }
0x139b   :  { %3201 = vmax.xlane.f32.xlu0 %v3200_v7  ;;  %v5670_v8 = vpop.f32.mrb[78].mxu0 }
0x139c   :  { %v4414_v14 = vpop.f32.mrb[79].mxu0  ;;  %v3203_v15 = vsel %vm498_vm2, %v5670_v8, -inf }
0x139d   :  { %3204 = vmax.xlane.f32.xlu1 %v3203_v15 }
0x13ae   :  { %2592 = vrot.lane.b32.xlu1 %v5561_v6, %s5029_s1 }
0x13b1   :  { %2471 = vrot.lane.b32.xlu0 %v5561_v6, %s5040_s5 }
0x13f8   :  { %v2449_v17 = vpop.xlane.xlu0 %2448 }
0x13f9   :  { %v2453_v18 = vsub.f32 %v2440_v37, %v2449_v17 }
0x13fa   :  { %v2452_v20 = vpop.xlane.xlu1 %2451 }
0x13fb   :  { %v2455_v0 = vmul.f32 1.442695, %v2453_v18  ;;  %v2454_v23 = vsub.f32 %v2443_v25, %v2452_v20 }
0x13fd   :  { %4775 = vpow2.f32 %v2455_v0  ;;  %v2457_v41 = vmul.f32 1.442695, %v2454_v23 }
0x13ff   :  { %4777 = vpow2.f32 %v2457_v41 }
0x1400   :  { %v2571_v31 = vpop.xlane.xlu0 %2570 }
0x1401   :  { %v2575_v12 = vsub.f32 %v2562_v19, %v2571_v31 }
0x1403   :  { %v2577_v33 = vmul.f32 1.442695, %v2575_v12 }
0x1404   :  { %v2574_v10 = vpop.xlane.xlu0 %2573 }
0x1405   :  { %4779 = vpow2.f32 %v2577_v33  ;;  %v2576_v56 = vsub.f32 %v2565_v62, %v2574_v10 }
0x1407   :  { %v5678_v5 = vpop.eup %4775  ;;  %v2579_v39 = vmul.f32 1.442695, %v2576_v56 }
0x1408   :  { %v2692_v29 = vpop.xlane.xlu0 %2691  ;;  %v2459_v43 = vsel %vm498_vm2, %v5678_v5, 0.0 }
0x1409   :  { %v5682_v37 = vpop.eup %4777  ;;  %4781 = vpow2.f32 %v2579_v39  ;;  %v2696_v25 = vsub.f32 %v5634_v13, %v2692_v29  ;;  %2460 = vadd.xlane.f32.xlu0 %v2459_v43 }
0x140a   :  { %v2695_v11 = vpop.xlane.xlu1 %2694  ;;  %v2462_v19 = vsel %vm498_vm2, %v5682_v37, 0.0 }
0x140b   :  { %v2698_v30 = vmul.f32 1.442695, %v2696_v25  ;;  %v2697_v62 = vsub.f32 %v5638_v57, %v2695_v11  ;;  %2463 = vadd.xlane.f32.xlu1 %v2462_v19 }
0x140d   :  { %4783 = vpow2.f32 %v2698_v30  ;;  %v2700_v26 = vmul.f32 1.442695, %v2697_v62 }
0x140f   :  { %v5688_v9 = vpop.eup %4779  ;;  %4785 = vpow2.f32 %v2700_v26 }
0x1410   :  { %v2839_v46 = vpop.xlane.xlu0 %2838  ;;  %v2581_v34 = vsel %vm498_vm2, %v5688_v9, 0.0 }
0x1411   :  { %v2843_v13 = vsub.f32 %v5642_v45, %v2839_v46  ;;  %2582 = vadd.xlane.f32.xlu0 %v2581_v34 }
0x1412   :  { %v2842_v52 = vpop.xlane.xlu1 %2841 }
0x1413   :  { %v5693_v51 = vpop.eup %4781  ;;  %v2845_v42 = vmul.f32 1.442695, %v2843_v13  ;;  %v2844_v58 = vsub.f32 %v5646_v38, %v2842_v52 }
0x1414   :  { %v2584_v57 = vsel %vm498_vm2, %v5693_v51, 0.0 }
0x1415   :  { %4787 = vpow2.f32 %v2845_v42  ;;  %v2847_v63 = vmul.f32 1.442695, %v2844_v58  ;;  %2585 = vadd.xlane.f32.xlu1 %v2584_v57 }
0x1417   :  { %v5698_v1 = vpop.eup %4783  ;;  %4789 = vpow2.f32 %v2847_v63 }
0x1418   :  { %v2959_v59 = vpop.xlane.xlu0 %2958  ;;  %v2702_v45 = vsel %vm498_vm2, %v5698_v1, 0.0 }
0x1419   :  { %v5702_v61 = vpop.eup %4785  ;;  %v2963_v55 = vsub.f32 %v5650_v49, %v2959_v59  ;;  %2703 = vadd.xlane.f32.xlu0 %v2702_v45 }
0x141a   :  { %v2962_v7 = vpop.xlane.xlu1 %2961  ;;  %v2705_v38 = vsel %vm498_vm2, %v5702_v61, 0.0 }
0x141b   :  { %v2965_v14 = vmul.f32 1.442695, %v2963_v55  ;;  %v2964_v15 = vsub.f32 %v5654_v40, %v2962_v7  ;;  %2706 = vadd.xlane.f32.xlu1 %v2705_v38 }
0x141d   :  { %4791 = vpow2.f32 %v2965_v14  ;;  %v2967_v17 = vmul.f32 1.442695, %v2964_v15 }
0x141f   :  { %v5708_v18 = vpop.eup %4787  ;;  %4793 = vpow2.f32 %v2967_v17 }
0x1420   :  { %v2849_v20 = vsel %vm498_vm2, %v5708_v18, 0.0  ;;  %v3081_v40 = vpop.xlane.xlu0 %3080 }
0x1421   :  { %v5712_v0 = vpop.eup %4789  ;;  %2850 = vadd.xlane.f32.xlu0 %v2849_v20  ;;  %v3085_v34 = vsub.f32 %v5658_v60, %v3081_v40 }
0x1422   :  { %v3084_v49 = vpop.xlane.xlu1 %3083  ;;  %v2852_v23 = vsel %vm498_vm2, %v5712_v0, 0.0 }
0x1423   :  { %v3086_v41 = vsub.f32 %v5662_v2, %v3084_v49  ;;  %2853 = vadd.xlane.f32.xlu1 %v2852_v23  ;;  %v3087_v13 = vmul.f32 1.442695, %v3085_v34 }
0x1425   :  { %v3089_v31 = vmul.f32 1.442695, %v3086_v41 }
0x1427   :  { %v5717_v12 = vpop.eup %4791  ;;  %4795 = vpow2.f32 %v3089_v31 }
0x1428   :  { %v3202_v33 = vpop.xlane.xlu0 %3201  ;;  %v2969_v10 = vsel %vm498_vm2, %v5717_v12, 0.0 }
0x1429   :  { %v5721_v56 = vpop.eup %4793  ;;  %v3206_v39 = vsub.f32 %v5666_v4, %v3202_v33  ;;  %2970 = vadd.xlane.f32.xlu1 %v2969_v10 }
0x142a   :  { %v3205_v29 = vpop.xlane.xlu1 %3204  ;;  %v2972_v11 = vsel %vm498_vm2, %v5721_v56, 0.0 }
0x142b   :  { %v3208_v43 = vmul.f32 1.442695, %v3206_v39  ;;  %v3207_v25 = vsub.f32 %v5670_v8, %v3205_v29 }
0x142c   :  { %v2472_v2 = vpop.permute.xlu0 %2471 }
0x142d   :  { %4797 = vpow2.f32 %v3208_v43  ;;  %v3210_v19 = vmul.f32 1.442695, %v3207_v25  ;;  %4344 = vmatpush3.bf16.msra.mxu1 %v2472_v2  ;;  %2973 = vadd.xlane.f32.xlu1 %v2972_v11 }
0x142e   :  { %4355 = vmatprep.subr.bf16.mxu1 %v5038_v3  ;;  %v2593_v42 = vpop.permute.xlu1 %2592 }
0x142f   :  { %4799 = vpow2.f32 %v3210_v19 }
0x1430   :  { %4801 = vpow2.f32 %v3087_v13 }
0x1431   :  { %v5728_v30 = vpop.eup %4795 }
0x1432   :  { %v3094_v4 = vsel %vm498_vm2, %v5728_v30, 0.0 }
0x1433   :  { %3095 = vadd.xlane.f32.xlu1 %v3094_v4 }
0x1437   :  { %v5732_v62 = vpop.eup %4797  ;;  %2713 = vrot.lane.b32.xlu0 %v5561_v6, %s5041_s25 }
0x1438   :  { %v3212_v8 = vsel %vm498_vm2, %v5732_v62, 0.0 }
0x1439   :  { %v5738_v26 = vpop.eup %4799  ;;  %3213 = vadd.xlane.f32.xlu1 %v3212_v8 }
0x143a   :  { %v3215_v46 = vsel %vm498_vm2, %v5738_v26, 0.0  ;;  %v5745_v52 = vpop.eup %4801 }
0x143b   :  { %v3091_v6 = vsel %vm498_vm2, %v5745_v52, 0.0 }
0x143d   :  { %3216 = vadd.xlane.f32.xlu1 %v3215_v46 }
0x144e   :  { %2981 = vrot.lane.b32.xlu1 %v5557_v16, %s5040_s5 }
0x1456   :  { %3092 = vadd.xlane.f32.xlu0 %v3091_v6 }
0x146c   :  { %3102 = vrot.lane.b32.xlu0 %v5557_v16, %s5029_s1 }
0x1470   :  { %3223 = vrot.lane.b32.xlu0 %v5557_v16, %s5041_s25 }
0x1496   :  { %v2461_v58 = vpop.xlane.xlu0 %2460 }
0x1497   :  { %4803 = vrcp.f32 %v2461_v58 }
0x1498   :  { %v2464_v60 = vpop.xlane.xlu1 %2463 }
0x1499   :  { %4805 = vrcp.f32 %v2464_v60 }
0x149e   :  { %v2583_v57 = vpop.xlane.xlu0 %2582 }
0x149f   :  { %4807 = vrcp.f32 %v2583_v57 }
0x14a1   :  { %v4804_v63 = vpop.eup %4803 }
0x14a2   :  { %v2586_v59 = vpop.xlane.xlu1 %2585  ;;  %v2466_v55 = vmul.f32 %v4804_v63, %v5678_v5 }
0x14a3   :  { %v4806_v45 = vpop.eup %4805  ;;  %4809 = vrcp.f32 %v2586_v59 }
0x14a4   :  { %v2468_v7 = vmul.f32 %v4806_v45, %v5682_v37 }
0x14a6   :  { %v2704_v38 = vpop.xlane.xlu0 %2703  ;;  %v2469_v14 = vpack.c.bf16 %v2468_v7, %v2466_v55 }
0x14a7   :  { %4811 = vrcp.f32 %v2704_v38 }
0x14a8   :  { %4346 = vmatmul.mubr.msk.bf16.vlgmr.msra.gmra.mrb[56].mxu1 %vm498_vm2, %v2469_v14  ;;  %v2707_v15 = vpop.xlane.xlu1 %2706 }
0x14a9   :  { %4356 = vmatpush3.bf16.msra.mxu1 %v2593_v42  ;;  %4813 = vrcp.f32 %v2707_v15  ;;  %4357 = vmatprep.mubr.msk.bf16.mxu1 %vm5039_vm0, %v5038_v3  ;;  %v4808_v17 = vpop.eup %4807 }
0x14aa   :  { %4367 = vmatprep.subr.bf16.mxu1 %v5038_v3  ;;  %v2588_v49 = vmul.f32 %v4808_v17, %v5688_v9 }
0x14ad   :  { %v4810_v20 = vpop.eup %4809 }
0x14ae   :  { %v2590_v5 = vmul.f32 %v4810_v20, %v5693_v51  ;;  %v2851_v37 = vpop.xlane.xlu0 %2850 }
0x14af   :  { %4815 = vrcp.f32 %v2851_v37 }
0x14b0   :  { %v2854_v23 = vpop.xlane.xlu1 %2853  ;;  %v2591_v41 = vpack.c.bf16 %v2590_v5, %v2588_v49 }
0x14b1   :  { %4817 = vrcp.f32 %v2854_v23  ;;  %v4812_v40 = vpop.eup %4811 }
0x14b2   :  { %v2714_v31 = vpop.permute.xlu0 %2713  ;;  %4358 = vmatmul.mubr.msk.bf16.vlgmr.msra.gmra.mrb[60].mxu1 %vm498_vm2, %v2591_v41  ;;  %v2709_v9 = vmul.f32 %v4812_v40, %v5698_v1 }
0x14b3   :  { %v4814_v33 = vpop.eup %4813  ;;  %4368 = vmatpush3.bf16.msra.mxu1 %v2714_v31  ;;  %4369 = vmatprep.mubr.msk.bf16.mxu1 %vm5039_vm0, %v5038_v3 }
0x14b4   :  { %v2711_v10 = vmul.f32 %v4814_v33, %v5702_v61  ;;  %4379 = vmatprep.subr.bf16.mxu1 %v5038_v3 }
0x14b6   :  { %v2971_v51 = vpop.xlane.xlu1 %2970  ;;  %v2712_v39 = vpack.c.bf16 %v2711_v10, %v2709_v9  ;;  %v4647_v9 = vld [vmem:[#allocation8 + $0x40] sm:$0xff]  }
0x14b7   :  { %4421 = vmatprep.subr.bf16.mxu0 %v4647_v9 }
0x14b8   :  { %4422 = vmatpush3.bf16.msra.mxu0 %v4647_v9 }
0x14b9   :  { %v4816_v29 = vpop.eup %4815 }
0x14ba   :  { %4370 = vmatmul.mubr.msk.bf16.vlgmr.msra.gmra.mrb[64].mxu1 %vm498_vm2, %v2712_v39  ;;  %v2974_v2 = vpop.xlane.xlu1 %2973  ;;  %v2856_v61 = vmul.f32 %v4816_v29, %v5708_v18  ;;  %v4649_v39 = vld [vmem:[#allocation8 + $0x50] sm:$0xff]  }
0x14bb   :  { %v4818_v43 = vpop.eup %4817  ;;  %4380 = vmatpush3.bf16.msra.mxu1 %v5557_v16  ;;  %4381 = vmatprep.mubr.msk.bf16.mxu1 %vm5039_vm0, %v5038_v3  ;;  %4819 = vrcp.f32 %v2974_v2  ;;  %v4650_v2 = vld [vmem:[#allocation8 + $0x58] sm:$0xff]  }
0x14bc   :  { %v2858_v25 = vmul.f32 %v4818_v43, %v5712_v0  ;;  %4391 = vmatprep.subr.bf16.mxu1 %v5038_v3  ;;  %4821 = vrcp.f32 %v2971_v51  ;;  %v4648_v51 = vld [vmem:[#allocation8 + $0x48] sm:$0xff]  }
0x14bd   :  { %4423 = vmatprep.subr.bf16.mxu0 %v4648_v51 }
0x14be   :  { %v2859_v1 = vpack.c.bf16 %v2858_v25, %v2856_v61  ;;  %4424 = vmatpush3.bf16.msra.mxu0 %v4648_v51 }
0x14bf   :  { %4425 = vmatprep.subr.bf16.mxu0 %v4649_v39 }
0x14c0   :  { %v3096_v11 = vpop.xlane.xlu1 %3095 }
0x14c1   :  { %4823 = vrcp.f32 %v3096_v11  ;;  %v4651_v11 = vld [vmem:[#allocation8 + $0x60] sm:$0xff]  }
0x14c2   :  { %4382 = vmatmul.mubr.msk.bf16.vlgmr.msra.gmra.mrb[68].mxu1 %vm498_vm2, %v2859_v1  ;;  %4426 = vmatpush3.bf16.msra.mxu0 %v4649_v39 }
0x14c3   :  { %4393 = vmatprep.mubr.msk.bf16.mxu1 %vm5039_vm0, %v5038_v3  ;;  %4427 = vmatprep.subr.bf16.mxu0 %v4650_v2 }
0x14c5   :  { %v4820_v19 = vpop.eup %4819 }
0x14c6   :  { %v3214_v16 = vpop.xlane.xlu1 %3213  ;;  %v4822_v8 = vpop.eup %4821  ;;  %v2978_v0 = vmul.f32 %v4820_v19, %v5721_v56  ;;  %4428 = vmatpush3.bf16.msra.mxu0 %v4650_v2  ;;  %v4653_v19 = vld [vmem:[#allocation8 + $0x70] sm:$0xff]   ;;  %v5818_v2 = vld [vmem:[#allocation5 + $0x8] sm:$0xff] }
0x14c7   :  { %v2976_v46 = vmul.f32 %v4822_v8, %v5717_v12  ;;  %4429 = vmatprep.subr.bf16.mxu0 %v4651_v11  ;;  %v4654_v8 = vld [vmem:[#allocation8 + $0x78] sm:$0xff]  }
0x14c9   :  { %v2979_v18 = vpack.c.bf16 %v2978_v0, %v2976_v46 }
0x14ca   :  { %v3217_v4 = vpop.xlane.xlu1 %3216  ;;  %4430 = vmatpush3.bf16.msra.mxu0 %v4651_v11 }
0x14cb   :  { %v4824_v12 = vpop.eup %4823 }
0x14cc   :  { %v3100_v42 = vmul.f32 %v4824_v12, %v5728_v30 }
0x14ce   :  { %v2982_v34 = vpop.permute.xlu1 %2981 }
0x14cf   :  { %4392 = vmatpush3.bf16.msra.mxu1 %v2982_v34 }
0x14d0   :  { %4403 = vmatprep.subr.bf16.mxu1 %v5038_v3 }
0x14d2   :  { %4394 = vmatmul.mubr.msk.bf16.vlgmr.msra.gmra.mrb[72].mxu1 %vm498_vm2, %v2979_v18 }
0x14d3   :  { %4405 = vmatprep.mubr.msk.bf16.mxu1 %vm5039_vm0, %v5038_v3 }
0x14e3   :  { %v3093_v13 = vpop.xlane.xlu0 %3092 }
0x14e4   :  { %4825 = vrcp.f32 %v3093_v13 }
0x14e5   :  { %4827 = vrcp.f32 %v3217_v4 }
0x14e6   :  { %4829 = vrcp.f32 %v3214_v16  ;;  %v4652_v16 = vld [vmem:[#allocation8 + $0x68] sm:$0xff]  }
0x14e7   :  { %v3103_v6 = vpop.permute.xlu0 %3102  ;;  %4431 = vmatprep.subr.bf16.mxu0 %v4652_v16 }
0x14e8   :  { %4404 = vmatpush3.bf16.msra.mxu1 %v3103_v6  ;;  %4432 = vmatpush3.bf16.msra.mxu0 %v4652_v16 }
0x14e9   :  { %4415 = vmatprep.subr.bf16.mxu1 %v5038_v3  ;;  %4433 = vmatprep.subr.bf16.mxu0 %v4653_v19 }
0x14eb   :  { %v3224_v63 = vpop.permute.xlu0 %3223 }
0x14ec   :  { %4434 = vmatpush3.bf16.msra.mxu0 %v4653_v19 }
0x14ed   :  { %4435 = vmatprep.subr.bf16.mxu0 %v4654_v8 }
0x14ee   :  { %v4826_v56 = vpop.eup %4825 }
0x14ef   :  { %v3098_v58 = vmul.f32 %v4826_v56, %v5745_v52  ;;  %v4828_v57 = vpop.eup %4827 }
0x14f0   :  { %v4830_v59 = vpop.eup %4829  ;;  %v3221_v45 = vmul.f32 %v4828_v57, %v5738_v26  ;;  %4436 = vmatpush3.bf16.msra.mxu0 %v4654_v8 }
0x14f1   :  { %v3101_v60 = vpack.c.bf16 %v3100_v42, %v3098_v58  ;;  %v3219_v55 = vmul.f32 %v4830_v59, %v5732_v62 }
0x14f3   :  { %4406 = vmatmul.mubr.msk.bf16.vlgmr.msra.gmra.mrb[76].mxu1 %vm498_vm2, %v3101_v60  ;;  %v3222_v7 = vpack.c.bf16 %v3221_v45, %v3219_v55 }
0x14f4   :  { %4416 = vmatpush3.bf16.msra.mxu1 %v3224_v63  ;;  %4417 = vmatprep.mubr.msk.bf16.mxu1 %vm5039_vm0, %v5038_v3 }
0x14fb   :  { %4418 = vmatmul.mubr.msk.bf16.vlgmr.msra.gmra.mrb[80].mxu1 %vm498_vm2, %v3222_v7 }
0x157b   :  { %v2511_v30 = vpop.f32.mrb[56].mxu1 }
0x157c   :  { %v4347_v38 = vpop.f32.mrb[57].mxu1 }
0x157d   :  { %v2514_v52 = vpop.f32.mrb[58].mxu1 }
0x157e   :  { %v4529_v14 = vpack.i.bf16 %v2514_v52, %v2511_v30  ;;  %v4348_v15 = vpop.f32.mrb[59].mxu1 }
0x1580   :  { %4530 = vrot.lane.b32.xlu0 %v4529_v14, %s5041_s25 }
0x1585   :  { %v2632_v17 = vpop.f32.mrb[60].mxu1 }
0x1586   :  { %v4359_v20 = vpop.f32.mrb[61].mxu1 }
0x1587   :  { %v2635_v49 = vpop.f32.mrb[62].mxu1 }
0x1588   :  { %v4534_v5 = vpack.i.bf16 %v2635_v49, %v2632_v17  ;;  %v4360_v37 = vpop.f32.mrb[63].mxu1 }
0x158a   :  { %4535 = vrot.lane.b32.xlu1 %v4534_v5, %s5029_s1 }
0x158d   :  { %v2753_v3 = vpop.f32.mrb[64].mxu1 }
0x158e   :  { %v4371_v26 = vpop.f32.mrb[65].mxu1 }
0x158f   :  { %v2756_v62 = vpop.f32.mrb[66].mxu1 }
0x1590   :  { %v4539_v23 = vpack.i.bf16 %v2756_v62, %v2753_v3  ;;  %v4372_v41 = vpop.f32.mrb[67].mxu1 }
0x1592   :  { %4540 = vrot.lane.b32.xlu1 %v4539_v23, %s5040_s5 }
0x1595   :  { %v5795_v40 = vpop.f32.mrb[68].mxu1 }
0x1596   :  { %v4383_v31 = vpop.f32.mrb[69].mxu1 }
0x1597   :  { %v5797_v33 = vpop.f32.mrb[70].mxu1 }
0x1598   :  { %v4384_v10 = vpop.f32.mrb[71].mxu1 }
0x15a5   :  { %v3021_v29 = vpop.f32.mrb[72].mxu1 }
0x15a6   :  { %v4395_v43 = vpop.f32.mrb[73].mxu1 }
0x15a7   :  { %v3024_v25 = vpop.f32.mrb[74].mxu1 }
0x15a8   :  { %v4544_v61 = vpack.i.bf16 %v3024_v25, %v3021_v29  ;;  %v4396_v1 = vpop.f32.mrb[75].mxu1 }
0x15aa   :  { %4545 = vrot.lane.b32.xlu0 %v4544_v61, %s5041_s25 }
0x15c6   :  { %v3142_v4 = vpop.f32.mrb[76].mxu1 }
0x15c7   :  { %v4407_v0 = vpop.f32.mrb[77].mxu1 }
0x15c8   :  { %v3145_v46 = vpop.f32.mrb[78].mxu1 }
0x15c9   :  { %v4549_v34 = vpack.i.bf16 %v3145_v46, %v3142_v4  ;;  %v4408_v18 = vpop.f32.mrb[79].mxu1 }
0x15cb   :  { %4550 = vrot.lane.b32.xlu0 %v4549_v34, %s5029_s1 }
0x15ce   :  { %v3263_v13 = vpop.f32.mrb[80].mxu1 }
0x15cf   :  { %v4419_v6 = vpop.f32.mrb[81].mxu1 }
0x15d0   :  { %v3266_v12 = vpop.f32.mrb[82].mxu1 }
0x15d1   :  { %v4554_v56 = vpack.i.bf16 %v3266_v12, %v3263_v13  ;;  %v4420_v42 = vpop.f32.mrb[83].mxu1 }
0x15d3   :  { %4555 = vrot.lane.b32.xlu1 %v4554_v56, %s5040_s5 }
0x15f2   :  { %v4531_v58 = vpop.permute.xlu0 %4530 }
0x15f3   :  { %v4533_v57 = vunpack.i.h.bf16 %v4531_v58  ;;  %v4532_v63 = vunpack.i.l.bf16 %v4531_v58 }
0x15f5   :  { %v2785_v7 = vsel %vm450_vm1, %v5628_v22, %v4533_v57  ;;  %v2784_v30 = vsel %vm450_vm1, %v5626_v21, %v4532_v63 }
0x15fc   :  { %v4536_v60 = vpop.permute.xlu1 %4535 }
0x15fd   :  { %v4538_v59 = vunpack.i.h.bf16 %v4536_v60  ;;  %v4537_v45 = vunpack.i.l.bf16 %v4536_v60 }
0x15ff   :  { %v2787_v14 = vsel %vm958_vm3, %v2785_v7, %v4538_v59  ;;  %v2786_v15 = vsel %vm958_vm3, %v2784_v30, %v4537_v45  ;;  %v4657_v7 = vld [vmem:[#allocation10 + $0x50] sm:$0xff]   ;;  %v4658_v30 = vld [vmem:[#allocation10 + $0x58] sm:$0xff]  }
0x1604   :  { %v4541_v55 = vpop.permute.xlu1 %4540 }
0x1605   :  { %v4543_v38 = vunpack.i.h.bf16 %v4541_v55  ;;  %v4542_v52 = vunpack.i.l.bf16 %v4541_v55  ;;  %v4656_v55 = vld [vmem:[#allocation10 + $0x48] sm:$0xff]  }
0x1607   :  { %v2788_v17 = vsel %vm961_vm4, %v2786_v15, %v4542_v52  ;;  %v2789_v20 = vsel %vm961_vm4, %v2787_v14, %v4543_v38  ;;  %v4659_v38 = vld [vmem:[#allocation10 + $0x60] sm:$0xff]   ;;  %v4660_v52 = vld [vmem:[#allocation10 + $0x68] sm:$0xff]   ;;  %v4661_v14 = vld [vmem:[#allocation10 + $0x70] sm:$0xff]  }
0x1608   :  { %v3300_v49 = vpack.c.bf16 %v2789_v20, %v2788_v17  ;;  %v4662_v15 = vld [vmem:[#allocation10 + $0x78] sm:$0xff]  }
0x160a   :  { %4437 = vmatprep.mubr.bf16.mxu0 %v3300_v49 }
0x161c   :  { %v4546_v5 = vpop.permute.xlu0 %4545 }
0x161d   :  { %v4548_v3 = vunpack.i.h.bf16 %v4546_v5  ;;  %v4547_v26 = vunpack.i.l.bf16 %v4546_v5 }
0x161f   :  { %v3295_v21 = vsel %vm450_vm1, %v5797_v33, %v4548_v3  ;;  %v3294_v41 = vsel %vm450_vm1, %v5795_v40, %v4547_v26  ;;  %v3423_v33 = vrot.slane %v5818_v2, %v1595_v50 }
0x163d   :  { %v4551_v37 = vpop.permute.xlu0 %4550 }
0x163e   :  { %v4553_v22 = vunpack.i.h.bf16 %v4551_v37  ;;  %v4552_v62 = vunpack.i.l.bf16 %v4551_v37 }
0x1640   :  { %v3297_v9 = vsel %vm958_vm3, %v3295_v21, %v4553_v22  ;;  %v3296_v51 = vsel %vm958_vm3, %v3294_v41, %v4552_v62 }
0x1645   :  { %v4556_v23 = vpop.permute.xlu1 %4555 }
0x1646   :  { %v4558_v31 = vunpack.i.h.bf16 %v4556_v23  ;;  %v4557_v10 = vunpack.i.l.bf16 %v4556_v23 }
0x1648   :  { %v3299_v39 = vsel %vm961_vm4, %v3297_v9, %v4558_v31  ;;  %v3298_v29 = vsel %vm961_vm4, %v3296_v51, %v4557_v10  ;;  %v3475_v31 = vrot.slane %v5818_v2, %v1647_v48 }
0x1649   :  { %v3301_v43 = vpack.c.bf16 %v3299_v39, %v3298_v29 }
0x164b   :  { %4438 = vmatmul.mubr.bf16.vlgmr.msra.gmra.mrb[80].mxu0 %v3301_v43  ;;  %v3483_v43 = vrot.slane %v5818_v2, %v1655_v54  ;;  %v4665_v54 = vld [vmem:[#allocation11 + $0x50] sm:$0xff]  }
0x171e   :  { %v4439_v25 = vpop.f32.mrb[80].mxu0 }
0x171f   :  { %v3401_v40 = vpop.f32.mrb[81].mxu0  ;;  %v3418_v16 = vadd.f32 %v4439_v25, %v5525_v32  ;;  %v4655_v32 = vld [vmem:[#allocation10 + $0x40] sm:$0xff]  }
0x1720   :  { %v3416_v61 = vadd.f32 %v3401_v40, %v5528_v35  ;;  %v4440_v1 = vpop.f32.mrb[82].mxu0  ;;  %4441 = vmatprep.subr.bf16.mxu1 %v4655_v32 }
0x1721   :  { %v3404_v11 = vpop.f32.mrb[83].mxu0  ;;  %v5831_v0 = vadd.f32 %v3423_v33, %v3418_v16  ;;  %v3419_v46 = vadd.f32 %v4440_v1, %v5531_v24  ;;  %4442 = vmatpush3.bf16.msra.mxu1 %v4655_v32 }
0x1722   :  { %v5825_v19 = vadd.f32 %v3423_v33, %v3416_v61  ;;  %v3417_v4 = vadd.f32 %v3404_v11, %v5533_v36  ;;  %4443 = vmatprep.subr.bf16.mxu1 %v4656_v55 }
0x1723   :  { %v5836_v50 = vadd.f32 %v3423_v33, %v3419_v46 }
0x1724   :  { %v5828_v8 = vadd.f32 %v3423_v33, %v3417_v4  ;;  %3428 = vadd.xlane.f32.xlu0 %v5825_v19 }
0x1725   :  { %4444 = vmatpush3.bf16.msra.mxu1 %v4656_v55 }
0x1726   :  { %3430 = vadd.xlane.f32.xlu1 %v5828_v8  ;;  %4445 = vmatprep.subr.bf16.mxu1 %v4657_v7 }
0x1728   :  { %3432 = vadd.xlane.f32.xlu0 %v5831_v0 }
0x1729   :  { %4446 = vmatpush3.bf16.msra.mxu1 %v4657_v7 }
0x172a   :  { %4447 = vmatprep.subr.bf16.mxu1 %v4658_v30 }
0x172c   :  { %3434 = vadd.xlane.f32.xlu0 %v5836_v50 }
0x172d   :  { %4448 = vmatpush3.bf16.msra.mxu1 %v4658_v30 }
0x172e   :  { %4449 = vmatprep.subr.bf16.mxu1 %v4659_v38 }
0x1731   :  { %4450 = vmatpush3.bf16.msra.mxu1 %v4659_v38 }
0x1732   :  { %4451 = vmatprep.subr.bf16.mxu1 %v4660_v52 }
0x1735   :  { %4452 = vmatpush3.bf16.msra.mxu1 %v4660_v52 }
0x1736   :  { %4453 = vmatprep.subr.bf16.mxu1 %v4661_v14 }
0x1739   :  { %4454 = vmatpush3.bf16.msra.mxu1 %v4661_v14 }
0x173a   :  { %4455 = vmatprep.subr.bf16.mxu1 %v4662_v15 }
0x173d   :  { %4456 = vmatpush3.bf16.msra.mxu1 %v4662_v15 }
0x17b1   :  { %v3429_v35 = vpop.xlane.xlu0 %3428 }
0x17b2   :  { %v3436_v36 = vmul.f32 0.0078125, %v3429_v35 }
0x17b3   :  { %v3431_v34 = vpop.xlane.xlu1 %3430 }
0x17b4   :  { %v3440_v18 = vsub.f32 %v5825_v19, %v3436_v36  ;;  %v3437_v13 = vmul.f32 0.0078125, %v3431_v34  ;;  %v4663_v34 = vld [vmem:[#allocation11 + $0x40] sm:$0xff]  }
0x17b5   :  { %v3433_v6 = vpop.xlane.xlu0 %3432  ;;  %4461 = vmatprep.subr.bf16.mxu0 %v4663_v34 }
0x17b6   :  { %v3441_v24 = vsub.f32 %v5828_v8, %v3437_v13  ;;  %v3438_v12 = vmul.f32 0.0078125, %v3433_v6  ;;  %v3444_v56 = vmul.f32 %v3440_v18, %v3440_v18  ;;  %4462 = vmatpush3.bf16.msra.mxu0 %v4663_v34  ;;  %v4666_v13 = vld [vmem:[#allocation11 + $0x58] sm:$0xff]   ;;  %v4667_v6 = vld [vmem:[#allocation11 + $0x60] sm:$0xff]  }
0x17b8   :  { %v3442_v42 = vsub.f32 %v5831_v0, %v3438_v12  ;;  %3448 = vadd.xlane.f32.xlu0 %v3444_v56  ;;  %v3445_v58 = vmul.f32 %v3441_v24, %v3441_v24  ;;  %v4669_v12 = vld [vmem:[#allocation11 + $0x70] sm:$0xff]   ;;  %v4670_v56 = vld [vmem:[#allocation11 + $0x78] sm:$0xff]  }
0x17b9   :  { %v3435_v60 = vpop.xlane.xlu0 %3434 }
0x17ba   :  { %v3439_v57 = vmul.f32 0.0078125, %v3435_v60  ;;  %3450 = vadd.xlane.f32.xlu1 %v3445_v58  ;;  %v3446_v63 = vmul.f32 %v3442_v42, %v3442_v42 }
0x17bc   :  { %v3443_v59 = vsub.f32 %v5836_v50, %v3439_v57  ;;  %3452 = vadd.xlane.f32.xlu0 %v3446_v63 }
0x17be   :  { %v3447_v45 = vmul.f32 %v3443_v59, %v3443_v59 }
0x17c0   :  { %3454 = vadd.xlane.f32.xlu1 %v3447_v45 }
0x1845   :  { %v3449_v17 = vpop.xlane.xlu0 %3448 }
0x1846   :  { %v3456_v20 = vmul.f32 0.0078125, %v3449_v17 }
0x1847   :  { %v3451_v49 = vpop.xlane.xlu1 %3450 }
0x1848   :  { %v3460_v5 = vadd.f32 1e-05, %v3456_v20  ;;  %v3457_v37 = vmul.f32 0.0078125, %v3451_v49 }
0x1849   :  { %v3453_v3 = vpop.xlane.xlu0 %3452 }
0x184a   :  { %4831 = vrsqrt.f32 %v3460_v5  ;;  %v3461_v26 = vadd.f32 1e-05, %v3457_v37  ;;  %v3458_v22 = vmul.f32 0.0078125, %v3453_v3 }
0x184c   :  { %4833 = vrsqrt.f32 %v3461_v26  ;;  %v3462_v62 = vadd.f32 1e-05, %v3458_v22 }
0x184d   :  { %v3455_v23 = vpop.xlane.xlu1 %3454 }
0x184e   :  { %4835 = vrsqrt.f32 %v3462_v62  ;;  %v3459_v21 = vmul.f32 0.0078125, %v3455_v23 }
0x1850   :  { %v3463_v41 = vadd.f32 1e-05, %v3459_v21 }
0x1852   :  { %4837 = vrsqrt.f32 %v3463_v41 }
0x1854   :  { %v4832_v10 = vpop.eup %4831 }
0x1855   :  { %v3468_v9 = vmul.f32 %v4832_v10, %v3440_v18  ;;  %v4664_v18 = vld [vmem:[#allocation11 + $0x48] sm:$0xff]  }
0x1856   :  { %v4834_v51 = vpop.eup %4833  ;;  %4463 = vmatprep.subr.bf16.mxu0 %v4664_v18 }
0x1857   :  { %v3469_v39 = vmul.f32 %v4834_v51, %v3441_v24  ;;  %v3476_v29 = vmul.f32 %v3475_v31, %v3468_v9  ;;  %4464 = vmatpush3.bf16.msra.mxu0 %v4664_v18  ;;  %v4668_v24 = vld [vmem:[#allocation11 + $0x68] sm:$0xff]   ;;  %v3767_v18 = vrot.slane %v5818_v2, %v1937_v27 }
0x1858   :  { %v4836_v25 = vpop.eup %4835  ;;  %4465 = vmatprep.subr.bf16.mxu0 %v4665_v54 }
0x1859   :  { %v3470_v33 = vmul.f32 %v4836_v25, %v3442_v42  ;;  %v3477_v40 = vmul.f32 %v3475_v31, %v3469_v39  ;;  %v3484_v61 = vadd.f32 %v3483_v43, %v3476_v29  ;;  %v3510_v42 = vrot.slane %v5818_v2, %v1681_v28 }
0x185b   :  { %v3485_v1 = vadd.f32 %v3483_v43, %v3477_v40  ;;  %v3478_v46 = vmul.f32 %v3475_v31, %v3470_v33  ;;  %4466 = vmatpush3.bf16.msra.mxu0 %v4665_v54 }
0x185c   :  { %v4838_v11 = vpop.eup %4837  ;;  %4467 = vmatprep.subr.bf16.mxu0 %v4666_v13 }
0x185d   :  { %v3471_v16 = vmul.f32 %v4838_v11, %v3443_v59  ;;  %v3488_v4 = vpack.c.bf16 %v3485_v1, %v3484_v61  ;;  %v3486_v32 = vadd.f32 %v3483_v43, %v3478_v46 }
0x185f   :  { %4457 = vmatprep.mubr.bf16.mxu1 %v3488_v4  ;;  %v3479_v48 = vmul.f32 %v3475_v31, %v3471_v16  ;;  %4468 = vmatpush3.bf16.msra.mxu0 %v4666_v13 }
0x1860   :  { %4469 = vmatprep.subr.bf16.mxu0 %v4667_v6 }
0x1861   :  { %v3487_v35 = vadd.f32 %v3483_v43, %v3479_v48 }
0x1863   :  { %v3489_v36 = vpack.c.bf16 %v3487_v35, %v3486_v32  ;;  %4470 = vmatpush3.bf16.msra.mxu0 %v4667_v6 }
0x1864   :  { %4471 = vmatprep.subr.bf16.mxu0 %v4668_v24 }
0x1865   :  { %4458 = vmatmul.mubr.bf16.vlgmr.msra.gmra.mrb[84].mxu1 %v3489_v36 }
0x1867   :  { %4472 = vmatpush3.bf16.msra.mxu0 %v4668_v24 }
0x1868   :  { %4473 = vmatprep.subr.bf16.mxu0 %v4669_v12 }
0x186b   :  { %4474 = vmatpush3.bf16.msra.mxu0 %v4669_v12 }
0x186c   :  { %4475 = vmatprep.subr.bf16.mxu0 %v4670_v56 }
0x186f   :  { %4476 = vmatpush3.bf16.msra.mxu0 %v4670_v56 }
0x1938   :  { %v4459_v58 = vpop.f32.mrb[84].mxu1 }
0x1939   :  { %v3602_v60 = vadd.f32 %v4459_v58, %v3510_v42  ;;  %v3593_v57 = vpop.f32.mrb[85].mxu1 }
0x193a   :  { %v3594_v63 = vadd.f32 %v3593_v57, %v3510_v42  ;;  %v4460_v59 = vpop.f32.mrb[86].mxu1 }
0x193b   :  { %v3614_v45 = vmul.f32 0.044715, %v3602_v60  ;;  %v3605_v55 = vadd.f32 %v4460_v59, %v3510_v42  ;;  %v3596_v7 = vpop.f32.mrb[87].mxu1  ;;  %v3610_v33 = vmul.f32 0.5, %v3602_v60 }
0x193c   :  { %v3612_v30 = vmul.f32 0.044715, %v3594_v63  ;;  %v3597_v38 = vadd.f32 %v3596_v7, %v3510_v42  ;;  %v3608_v1 = vmul.f32 0.5, %v3594_v63 }
0x193d   :  { %v3618_v52 = vmul.f32 %v3614_v45, %v3602_v60  ;;  %v3615_v14 = vmul.f32 0.044715, %v3605_v55  ;;  %v3611_v40 = vmul.f32 0.5, %v3605_v55 }
0x193e   :  { %v3616_v15 = vmul.f32 %v3612_v30, %v3594_v63  ;;  %v3613_v17 = vmul.f32 0.044715, %v3597_v38  ;;  %v3609_v11 = vmul.f32 0.5, %v3597_v38 }
0x193f   :  { %v3622_v20 = vmul.f32 %v3618_v52, %v3602_v60  ;;  %v3619_v49 = vmul.f32 %v3615_v14, %v3605_v55 }
0x1940   :  { %v3620_v5 = vmul.f32 %v3616_v15, %v3594_v63  ;;  %v3617_v37 = vmul.f32 %v3613_v17, %v3597_v38 }
0x1941   :  { %v3626_v3 = vadd.f32 %v3622_v20, %v3602_v60  ;;  %v3623_v28 = vmul.f32 %v3619_v49, %v3605_v55 }
0x1942   :  { %v3621_v26 = vmul.f32 %v3617_v37, %v3597_v38  ;;  %v3624_v22 = vadd.f32 %v3620_v5, %v3594_v63 }
0x1943   :  { %v3630_v62 = vmul.f32 0.7978846, %v3626_v3  ;;  %v3627_v23 = vadd.f32 %v3623_v28, %v3605_v55 }
0x1944   :  { %v3625_v21 = vadd.f32 %v3621_v26, %v3597_v38  ;;  %v3628_v41 = vmul.f32 0.7978846, %v3624_v22 }
0x1945   :  { %4839 = vtanh.f32 %v3630_v62  ;;  %v3631_v31 = vmul.f32 0.7978846, %v3627_v23 }
0x1946   :  { %v3629_v10 = vmul.f32 0.7978846, %v3625_v21  ;;  %4841 = vtanh.f32 %v3628_v41  ;;  %v3772_v41 = vld [vmem:[%s5885_s6] sm:$0x3]  ;;  %s3842_s6 = sshll.u32 %s5042_s12, 4  ;;  %s3843_s6 = int_to_ptr.vmem [resolvable:$true] %s3842_s6 }
0x1947   :  { %4843 = vtanh.f32 %v3631_v31  ;;  %v3820_v31 = vrot.slane %v3772_v41, %v5207_v47  ;;  %s4993_s15 = scalar_lea.vmem %s3843_s6, 512  ;;  %p4998_p7 = scmp.lt.s32.totalorder %s3843_s6, %s3843_s6 }
0x1948   :  { %4845 = vtanh.f32 %v3629_v10  ;;  %p4994_p6 = scmp.ne.s32.totalorder %s3843_s6, %s4993_s15  ;;  %p4999_p8 = scmp.lt.s32.totalorder %s4993_s15, %s4993_s15 }
0x194a   :  { %p5000_p9 = por %p4999_p8, %p4998_p7 }
0x194c   :  { %p5001_p10 = pnand %p5000_p9, %p4994_p6 }
0x194f   :  { %v4840_v9 = vpop.eup %4839 }
0x1950   :  { %v4842_v51 = vpop.eup %4841  ;;  %v3638_v39 = vadd.f32 1.0, %v4840_v9 }
0x1951   :  { %v4844_v29 = vpop.eup %4843  ;;  %v3636_v43 = vadd.f32 1.0, %v4842_v51  ;;  %v3828_v51 = vrot.slane %v3772_v41, %v5212_v53 }
0x1952   :  { %v4846_v25 = vpop.eup %4845  ;;  %v3639_v61 = vadd.f32 1.0, %v4844_v29  ;;  %v3642_v4 = vmul.f32 %v3638_v39, %v3610_v33 }
0x1953   :  { %v3637_v16 = vadd.f32 1.0, %v4846_v25  ;;  %v3640_v48 = vmul.f32 %v3636_v43, %v3608_v1 }
0x1954   :  { %v3643_v46 = vmul.f32 %v3639_v61, %v3611_v40 }
0x1955   :  { %v3641_v32 = vmul.f32 %v3637_v16, %v3609_v11 }
0x1956   :  { %v3645_v35 = vpack.c.bf16 %v3643_v46, %v3642_v4 }
0x1957   :  { %v3644_v36 = vpack.c.bf16 %v3641_v32, %v3640_v48 }
0x1959   :  { %4477 = vmatprep.mubr.bf16.mxu0 %v3644_v36 }
0x195a   :  { %4478 = vmatmul.mubr.bf16.vlgmr.msra.gmra.mrb[84].mxu0 %v3645_v35 }
0x1a2d   :  { %v4479_v34 = vpop.f32.mrb[84].mxu0 }
0x1a2e   :  { %v3745_v54 = vpop.f32.mrb[85].mxu0  ;;  %v3762_v12 = vadd.f32 %v4479_v34, %v5831_v0 }
0x1a2f   :  { %v3760_v13 = vadd.f32 %v3745_v54, %v5825_v19  ;;  %v4480_v6 = vpop.f32.mrb[86].mxu0 }
0x1a30   :  { %v3748_v24 = vpop.f32.mrb[87].mxu0  ;;  %v3763_v58 = vadd.f32 %v4480_v6, %v5836_v50  ;;  %v3770_v57 = vadd.f32 %v3767_v18, %v3762_v12 }
0x1a31   :  { %v3768_v56 = vadd.f32 %v3767_v18, %v3760_v13  ;;  %v3761_v42 = vadd.f32 %v3748_v24, %v5828_v8 }
0x1a32   :  { %v3771_v63 = vadd.f32 %v3767_v18, %v3763_v58 }
0x1a33   :  { %v3769_v60 = vadd.f32 %v3767_v18, %v3761_v42  ;;  %3773 = vadd.xlane.f32.xlu0 %v3768_v56 }
0x1a35   :  { %3775 = vadd.xlane.f32.xlu1 %v3769_v60 }
0x1a37   :  { %3777 = vadd.xlane.f32.xlu0 %v3770_v57 }
0x1a39   :  { %3779 = vadd.xlane.f32.xlu1 %v3771_v63 }
0x1ac0   :  { %v3774_v44 = vpop.xlane.xlu0 %3773 }
0x1ac1   :  { %v3781_v27 = vmul.f32 0.0078125, %v3774_v44 }
0x1ac2   :  { %v3776_v2 = vpop.xlane.xlu1 %3775 }
0x1ac3   :  { %v3785_v19 = vsub.f32 %v3768_v56, %v3781_v27  ;;  %v3782_v59 = vmul.f32 0.0078125, %v3776_v2 }
0x1ac4   :  { %v3778_v45 = vpop.xlane.xlu0 %3777 }
0x1ac5   :  { %v3786_v55 = vsub.f32 %v3769_v60, %v3782_v59  ;;  %v3783_v0 = vmul.f32 0.0078125, %v3778_v45  ;;  %v3789_v7 = vmul.f32 %v3785_v19, %v3785_v19 }
0x1ac6   :  { %v3780_v30 = vpop.xlane.xlu1 %3779 }
0x1ac7   :  { %v3787_v8 = vsub.f32 %v3770_v57, %v3783_v0  ;;  %v3784_v38 = vmul.f32 0.0078125, %v3780_v30  ;;  %3793 = vadd.xlane.f32.xlu0 %v3789_v7  ;;  %v3790_v50 = vmul.f32 %v3786_v55, %v3786_v55 }
0x1ac9   :  { %v3788_v52 = vsub.f32 %v3771_v63, %v3784_v38  ;;  %3795 = vadd.xlane.f32.xlu1 %v3790_v50  ;;  %v3791_v14 = vmul.f32 %v3787_v8, %v3787_v8 }
0x1acb   :  { %3797 = vadd.xlane.f32.xlu0 %v3791_v14  ;;  %v3792_v15 = vmul.f32 %v3788_v52, %v3788_v52 }
0x1acd   :  { %3799 = vadd.xlane.f32.xlu1 %v3792_v15 }
0x1b54   :  { %v3794_v17 = vpop.xlane.xlu0 %3793 }
0x1b55   :  { %v3801_v20 = vmul.f32 0.0078125, %v3794_v17 }
0x1b56   :  { %v3796_v49 = vpop.xlane.xlu1 %3795 }
0x1b57   :  { %v3805_v5 = vadd.f32 1e-05, %v3801_v20  ;;  %v3802_v37 = vmul.f32 0.0078125, %v3796_v49 }
0x1b58   :  { %v3798_v3 = vpop.xlane.xlu0 %3797 }
0x1b59   :  { %4847 = vrsqrt.f32 %v3805_v5  ;;  %v3806_v28 = vadd.f32 1e-05, %v3802_v37  ;;  %v3803_v26 = vmul.f32 0.0078125, %v3798_v3 }
0x1b5a   :  { %v3800_v22 = vpop.xlane.xlu1 %3799 }
0x1b5b   :  { %4849 = vrsqrt.f32 %v3806_v28  ;;  %v3807_v62 = vadd.f32 1e-05, %v3803_v26  ;;  %v3804_v23 = vmul.f32 0.0078125, %v3800_v22 }
0x1b5d   :  { %4851 = vrsqrt.f32 %v3807_v62  ;;  %v3808_v21 = vadd.f32 1e-05, %v3804_v23 }
0x1b5f   :  { %4853 = vrsqrt.f32 %v3808_v21 }
0x1b63   :  { %v4848_v10 = vpop.eup %4847 }
0x1b64   :  { %v3813_v9 = vmul.f32 %v4848_v10, %v3785_v19 }
0x1b65   :  { %v4850_v39 = vpop.eup %4849 }
0x1b66   :  { %v3814_v29 = vmul.f32 %v4850_v39, %v3786_v55  ;;  %v3821_v43 = vmul.f32 %v3820_v31, %v3813_v9 }
0x1b67   :  { %v4852_v25 = vpop.eup %4851 }
0x1b68   :  { %v3815_v33 = vmul.f32 %v4852_v25, %v3787_v8  ;;  %v3822_v40 = vmul.f32 %v3820_v31, %v3814_v29  ;;  %v3829_v61 = vadd.f32 %v3828_v51, %v3821_v43 }
0x1b69   :  { %v4854_v1 = vpop.eup %4853 }
0x1b6a   :  { %v3816_v11 = vmul.f32 %v4854_v1, %v3788_v52  ;;  %v3823_v16 = vmul.f32 %v3820_v31, %v3815_v33  ;;  %v3830_v4 = vadd.f32 %v3828_v51, %v3822_v40  ;;  %3833 = vst [vmem:[#allocation13] sm:$0xff] %v3829_v61 }
0x1b6c   :  { %v3824_v46 = vmul.f32 %v3820_v31, %v3816_v11  ;;  %v3831_v47 = vadd.f32 %v3828_v51, %v3823_v16  ;;  %3834 = vst [vmem:[#allocation13 + $0x8] sm:$0xff] %v3830_v4 }
0x1b6e   :  { %v3832_v48 = vadd.f32 %v3828_v51, %v3824_v46  ;;  %3835 = vst [vmem:[#allocation13 + $0x10] sm:$0xff] %v3831_v47 }
0x1b70   :  { %3836 = vst [vmem:[#allocation13 + $0x18] sm:$0xff] %v3832_v48 }
0x1b71   :  { %5004 = shalt.err (!%p5001_p10)
}
0x1b72   :  { %s5005_s18 = scalar_lea.hbm %s5886_s7, 512 }
0x1b73   :  { %p5006_p11 = scmp.ne.s32.totalorder %s5886_s7, %s5005_s18  ;;  %p5009_p12 = scmp.lt.u32.totalorder %s5005_s18, %s5886_s7 }
0x1b75   :  { %p5011_p13 = pnand %p5009_p12, %p5006_p11 }
0x1b77   :  { %5014 = shalt.err (!%p5011_p13)
}
0x1b78   :  { %3848 = dma.vmem_to_hbm [thread:$0]  %s3843_s6, 512, %s5886_s7, [#allocation4], %s5027_s13, %s5027_s13, %s5028_s14  }
0x1b79   :  { %5023 = dma.done.wait [#allocation4], 512  }
0x1b7a   :  { %5024 = vsyncadd [#allocation4], 4294966784 }
0x1b7b   :  { %3852 = vsyncpa [#allocation3], 1 }
0x1b7c   :  { %3853 = vsyncpa [#allocation6], 1 }
0x1b7d   :  { %3854 = vsyncpa [#allocation9], 1 }
0x1b7e   :  { %3855 = vsyncpa [#allocation12], 1 }
0x1b7f   :  { %3856 = vsyncpa [#allocation4], 1 }

</bundles_post_ra>
